<compile_context>
chip_gen: v6e
topology: v6e:2x2x1
jax: 0.10.0
libtpu: 0.0.40
codegen_flags: <defaults>
</compile_context>

<pallas_src>
import jax
import jax.numpy as jnp
from jax.experimental import pallas as pl
from jax.experimental.pallas import tpu as pltpu

FEAT_DIM = 1000       # inception_v3 feature dim
HIDDEN = 1000
NUM_CLASSES = 2

# 128-lane-aligned padded dims (zero padding -> numerics unchanged).
FEAT_PAD = 1024
HIDDEN_PAD = 1024
OUT_PAD = 128
MAX_TILE_N = 512      # max batch rows per grid step


def _cdiv(a, b):
    return -(-a // b)


def _round_up(v, m):
    return _cdiv(v, m) * m


def inception_fused_kernel(p_ref, wf_ref, bf_ref, w1_ref, b1_ref, w2_ref, b2_ref, o_ref):
    # ---- feature stub (stand-in for the pretrained inception_v3 backbone) ----
    # pooled activations arrive pre-pooled, bf16, lane-dense (TN, C_PAD)
    feats = (
        jnp.dot(p_ref[...], wf_ref[...], preferred_element_type=jnp.float32)
        + bf_ref[...]
    )                                                     # (TN, FEAT_PAD) f32

    # ---- classifier: Linear(1000,1000) -> ReLU(True) -> Dropout(0.5) -> Linear(1000,2)
    h = (
        jnp.dot(feats.astype(jnp.bfloat16), w1_ref[...],
                preferred_element_type=jnp.float32)
        + b1_ref[...]
    )
    h = jnp.maximum(h, 0.0)                               # ReLU (f32; v5e has no bf16 VPU)
    # Dropout(0.5): eval-mode forward => identity.
    o_ref[...] = (
        jnp.dot(h.astype(jnp.bfloat16), w2_ref[...],
                preferred_element_type=jnp.float32)
        + b2_ref[...]
    )                                                     # (TN, OUT_PAD) lane-dense store


def inception_forward(x, params, *, max_tile_n=MAX_TILE_N):
    wf, bf, w1, b1, w2, b2 = params
    n, c, h, w = x.shape
    c_pad = wf.shape[0]

    # Backbone stand-in pooling: global average over H*W, done in f32 as a plain
    # XLA op so the kernel never sees the (N, C, H*W) image stream.
    pooled = jnp.mean(x.astype(jnp.float32).reshape(n, c, h * w), axis=-1)   # (N, C)

    # Balanced batch tiling:
    #  - keep padding waste small for ragged batches,
    #  - ensure >= 2 grid steps whenever n allows (v7x megacore sharding).
    n8 = _round_up(n, 8)
    num_steps = max(_cdiv(n8, max_tile_n), 2 if n8 >= 16 else 1)
    tile_n = _round_up(_cdiv(n8, num_steps), 8)
    n_pad = _round_up(n, tile_n)
    grid = (n_pad // tile_n,)

    # Pad batch (zero rows) + channels (zero cols); feed as bf16 (halves input DMA).
    p_pad = (
        jnp.zeros((n_pad, c_pad), jnp.float32)
        .at[:n, :c].set(pooled)
        .astype(jnp.bfloat16)
    )

    logits_pad = pl.pallas_call(
        inception_fused_kernel,
        out_shape=jax.ShapeDtypeStruct((n_pad, OUT_PAD), jnp.float32),
        grid_spec=pltpu.PrefetchScalarGridSpec(
            num_scalar_prefetch=0,
            grid=grid,
            in_specs=[
                # activations: tiled over the batch axis, bf16, lane-dense
                pl.BlockSpec((tile_n, c_pad), lambda i: (i, 0)),
                # weights/biases: constant block index -> DMA once, stay resident
                pl.BlockSpec((c_pad, FEAT_PAD), lambda i: (0, 0)),
                pl.BlockSpec((1, FEAT_PAD), lambda i: (0, 0)),
                pl.BlockSpec((FEAT_PAD, HIDDEN_PAD), lambda i: (0, 0)),
                pl.BlockSpec((1, HIDDEN_PAD), lambda i: (0, 0)),
                pl.BlockSpec((HIDDEN_PAD, OUT_PAD), lambda i: (0, 0)),
                pl.BlockSpec((1, OUT_PAD), lambda i: (0, 0)),
            ],
            out_specs=pl.BlockSpec((tile_n, OUT_PAD), lambda i: (i, 0)),
        ),
        compiler_params=pltpu.CompilerParams(
            dimension_semantics=("parallel",),   # shard batch steps across TCs on v7x
            vmem_limit_bytes=24 << 20,           # working set << 24 MiB; v7x-safe
        ),
    )(p_pad, wf, bf, w1, b1, w2, b2)

    # Drop batch padding and the lane-padded logit columns.
    return logits_pad[:n, :NUM_CLASSES]


def init_params(key, in_channels):
    # Deterministic synthetic weights at the logical (unpadded) shapes,
    # PyTorch-default-style uniform init, then zero-padded to aligned shapes.
    kwf, kbf, kw1, kb1, kw2, kb2 = jax.random.split(key, 6)

    def unif(k, shape, fan_in):
        bound = 1.0 / jnp.sqrt(jnp.float32(fan_in))
        return jax.random.uniform(k, shape, jnp.float32, -bound, bound)

    c_pad = max(128, _round_up(in_channels, 128))

    wf = unif(kwf, (in_channels, FEAT_DIM), in_channels)   # stand-in backbone proj
    bf = unif(kbf, (1, FEAT_DIM), in_channels)
    w1 = unif(kw1, (FEAT_DIM, HIDDEN), FEAT_DIM)           # Linear(1000, 1000)
    b1 = unif(kb1, (1, HIDDEN), FEAT_DIM)
    w2 = unif(kw2, (HIDDEN, NUM_CLASSES), HIDDEN)          # Linear(1000, 2)
    b2 = unif(kb2, (1, NUM_CLASSES), HIDDEN)

    # Zero-pad to 128-aligned shapes; matmul weights stored as bf16 (f32 accum in-kernel).
    wf_p = (jnp.zeros((c_pad, FEAT_PAD), jnp.float32)
            .at[:in_channels, :FEAT_DIM].set(wf).astype(jnp.bfloat16))
    bf_p = jnp.zeros((1, FEAT_PAD), jnp.float32).at[:, :FEAT_DIM].set(bf)
    w1_p = (jnp.zeros((FEAT_PAD, HIDDEN_PAD), jnp.float32)
            .at[:FEAT_DIM, :HIDDEN].set(w1).astype(jnp.bfloat16))
    b1_p = jnp.zeros((1, HIDDEN_PAD), jnp.float32).at[:, :HIDDEN].set(b1)
    w2_p = (jnp.zeros((HIDDEN_PAD, OUT_PAD), jnp.float32)
            .at[:HIDDEN, :NUM_CLASSES].set(w2).astype(jnp.bfloat16))
    b2_p = jnp.zeros((1, OUT_PAD), jnp.float32).at[:, :NUM_CLASSES].set(b2)
    return wf_p, bf_p, w1_p, b1_p, w2_p, b2_p


if __name__ == "__main__":
    key = jax.random.PRNGKey(0)
    kx, kp = jax.random.split(key)

    # Small NCHW image batch consistent with the conv backbone interface.
    N, C, H, W = 2, 3, 16, 16
    x = jax.random.normal(kx, (N, C, H, W), jnp.float32)

    params = init_params(kp, C)

    out = inception_forward(x, params)
    out = jax.block_until_ready(out)
    assert out.shape == (N, NUM_CLASSES), out.shape
    assert out.dtype == jnp.float32
    assert bool(jnp.all(jnp.isfinite(out)))

    print("KERNEL_OK")
</pallas_src>

<mosaic_0001>
module attributes {stable_mosaic.version = 11 : i64} {
  func.func @inception_fused_kernel(%arg0: i32, %arg1: memref<8x128xbf16, #tpu.memory_space<vmem>>, %arg2: memref<128x1024xbf16, #tpu.memory_space<vmem>>, %arg3: memref<1x1024xf32, #tpu.memory_space<vmem>>, %arg4: memref<1024x1024xbf16, #tpu.memory_space<vmem>>, %arg5: memref<1x1024xf32, #tpu.memory_space<vmem>>, %arg6: memref<1024x128xbf16, #tpu.memory_space<vmem>>, %arg7: memref<1x128xf32, #tpu.memory_space<vmem>>, %arg8: memref<8x128xf32, #tpu.memory_space<vmem>>) attributes {dimension_semantics = [#tpu.dimension_semantics<parallel>], iteration_bounds = array<i64: 1>, scalar_prefetch = 0 : i64, scratch_operands = 0 : i64, tpu.core_type = #tpu.core_type<tc>, window_params = [{transform_indices = @transform_0, window_bounds = array<i64: 8, 128>}, {pipeline_mode = #tpu.pipeline_mode<synchronous>, transform_indices = @transform_1, window_bounds = array<i64: 128, 1024>}, {pipeline_mode = #tpu.pipeline_mode<synchronous>, transform_indices = @transform_2, window_bounds = array<i64: 1, 1024>}, {pipeline_mode = #tpu.pipeline_mode<synchronous>, transform_indices = @transform_3, window_bounds = array<i64: 1024, 1024>}, {pipeline_mode = #tpu.pipeline_mode<synchronous>, transform_indices = @transform_4, window_bounds = array<i64: 1, 1024>}, {pipeline_mode = #tpu.pipeline_mode<synchronous>, transform_indices = @transform_5, window_bounds = array<i64: 1024, 128>}, {pipeline_mode = #tpu.pipeline_mode<synchronous>, transform_indices = @transform_6, window_bounds = array<i64: 1, 128>}, {transform_indices = @transform_7, window_bounds = array<i64: 8, 128>}]} {
    %c0 = arith.constant 0 : index
    %c0_0 = arith.constant 0 : index
    %0 = vector.load %arg1[%c0, %c0_0] : memref<8x128xbf16, #tpu.memory_space<vmem>>, vector<8x128xbf16>
    %c0_1 = arith.constant 0 : index
    %c0_2 = arith.constant 0 : index
    %1 = vector.load %arg2[%c0_1, %c0_2] : memref<128x1024xbf16, #tpu.memory_space<vmem>>, vector<128x1024xbf16>
    %cst = arith.constant dense<0.000000e+00> : vector<8x1024xf32>
    %2 = tpu.matmul %0, %1, %cst {dimension_numbers = #tpu.dot_dimension_numbers<[1], [0], [0], [1], [0, 0, 1, 1], [], []>} : vector<8x128xbf16>, vector<128x1024xbf16>, vector<8x1024xf32> -> vector<8x1024xf32>
    %c0_3 = arith.constant 0 : index
    %c0_4 = arith.constant 0 : index
    %3 = vector.load %arg3[%c0_3, %c0_4] : memref<1x1024xf32, #tpu.memory_space<vmem>>, vector<1x1024xf32>
    %4 = vector.broadcast %3 : vector<1x1024xf32> to vector<8x1024xf32>
    %5 = arith.addf %2, %4 : vector<8x1024xf32>
    %6 = arith.truncf %5 : vector<8x1024xf32> to vector<8x1024xbf16>
    %c0_5 = arith.constant 0 : index
    %c0_6 = arith.constant 0 : index
    %7 = vector.load %arg4[%c0_5, %c0_6] : memref<1024x1024xbf16, #tpu.memory_space<vmem>>, vector<1024x1024xbf16>
    %cst_7 = arith.constant dense<0.000000e+00> : vector<8x1024xf32>
    %8 = tpu.matmul %6, %7, %cst_7 {dimension_numbers = #tpu.dot_dimension_numbers<[1], [0], [0], [1], [0, 0, 1, 1], [], []>} : vector<8x1024xbf16>, vector<1024x1024xbf16>, vector<8x1024xf32> -> vector<8x1024xf32>
    %c0_8 = arith.constant 0 : index
    %c0_9 = arith.constant 0 : index
    %9 = vector.load %arg5[%c0_8, %c0_9] : memref<1x1024xf32, #tpu.memory_space<vmem>>, vector<1x1024xf32>
    %10 = vector.broadcast %9 : vector<1x1024xf32> to vector<8x1024xf32>
    %11 = arith.addf %8, %10 : vector<8x1024xf32>
    %cst_10 = arith.constant 0.000000e+00 : f32
    %12 = vector.broadcast %cst_10 : f32 to vector<8x1024xf32>
    %13 = arith.maximumf %11, %12 : vector<8x1024xf32>
    %14 = arith.truncf %13 : vector<8x1024xf32> to vector<8x1024xbf16>
    %c0_11 = arith.constant 0 : index
    %c0_12 = arith.constant 0 : index
    %15 = vector.load %arg6[%c0_11, %c0_12] : memref<1024x128xbf16, #tpu.memory_space<vmem>>, vector<1024x128xbf16>
    %cst_13 = arith.constant dense<0.000000e+00> : vector<8x128xf32>
    %16 = tpu.matmul %14, %15, %cst_13 {dimension_numbers = #tpu.dot_dimension_numbers<[1], [0], [0], [1], [0, 0, 1, 1], [], []>} : vector<8x1024xbf16>, vector<1024x128xbf16>, vector<8x128xf32> -> vector<8x128xf32>
    %c0_14 = arith.constant 0 : index
    %c0_15 = arith.constant 0 : index
    %17 = vector.load %arg7[%c0_14, %c0_15] : memref<1x128xf32, #tpu.memory_space<vmem>>, vector<1x128xf32>
    %18 = vector.broadcast %17 : vector<1x128xf32> to vector<8x128xf32>
    %19 = arith.addf %16, %18 : vector<8x128xf32>
    %c0_16 = arith.constant 0 : index
    %c0_17 = arith.constant 0 : index
    %20 = vector.load %arg8[%c0_16, %c0_17] : memref<8x128xf32, #tpu.memory_space<vmem>>, vector<8x128xf32>
    tpu.vector_store %arg8[%c0_16, %c0_17], %19 {strides = array<i32>} : memref<8x128xf32, #tpu.memory_space<vmem>>, vector<8x128xf32>,
    return
  }
  func.func @transform_0(%arg0: i32) -> (i32, i32) {
    %c0_i32 = arith.constant 0 : i32
    %c0_i32_0 = arith.constant 0 : i32
    return %arg0, %c0_i32 : i32, i32
  }
  func.func @transform_1(%arg0: i32) -> (i32, i32) {
    %c0_i32 = arith.constant 0 : i32
    %c0_i32_0 = arith.constant 0 : i32
    %c0_i32_1 = arith.constant 0 : i32
    return %c0_i32, %c0_i32_0 : i32, i32
  }
  func.func @transform_2(%arg0: i32) -> (i32, i32) {
    %c0_i32 = arith.constant 0 : i32
    %c0_i32_0 = arith.constant 0 : i32
    %c0_i32_1 = arith.constant 0 : i32
    return %c0_i32, %c0_i32_0 : i32, i32
  }
  func.func @transform_3(%arg0: i32) -> (i32, i32) {
    %c0_i32 = arith.constant 0 : i32
    %c0_i32_0 = arith.constant 0 : i32
    %c0_i32_1 = arith.constant 0 : i32
    return %c0_i32, %c0_i32_0 : i32, i32
  }
  func.func @transform_4(%arg0: i32) -> (i32, i32) {
    %c0_i32 = arith.constant 0 : i32
    %c0_i32_0 = arith.constant 0 : i32
    %c0_i32_1 = arith.constant 0 : i32
    return %c0_i32, %c0_i32_0 : i32, i32
  }
  func.func @transform_5(%arg0: i32) -> (i32, i32) {
    %c0_i32 = arith.constant 0 : i32
    %c0_i32_0 = arith.constant 0 : i32
    %c0_i32_1 = arith.constant 0 : i32
    return %c0_i32, %c0_i32_0 : i32, i32
  }
  func.func @transform_6(%arg0: i32) -> (i32, i32) {
    %c0_i32 = arith.constant 0 : i32
    %c0_i32_0 = arith.constant 0 : i32
    %c0_i32_1 = arith.constant 0 : i32
    return %c0_i32, %c0_i32_0 : i32, i32
  }
  func.func @transform_7(%arg0: i32) -> (i32, i32) {
    %c0_i32 = arith.constant 0 : i32
    %c0_i32_0 = arith.constant 0 : i32
    return %arg0, %c0_i32 : i32, i32
  }
}

</mosaic_0001>

<bundles_post_ra>
// kernel: tpu_custom_call.1
= control target key start
LH: loop header
LB: loop body
LE: loop exit
PB: predicated region body
PF: predicated region fallthrough
CT: control target
= control target key end

     0   :  { %12 = vsyncpa [#allocation3], 0  ;;  %s6435_s0 = inlined_call_operand.hbm [shape: bf16[8,128], index: 0, kind: input, shape index: {}]   ;;  %s6436_s1 = inlined_call_operand.hbm [shape: bf16[128,1024], index: 1, kind: input, shape index: {}]   ;;  %s6437_s2 = inlined_call_operand.hbm [shape: f32[1,1024], index: 2, kind: input, shape index: {}]   ;;  %s6438_s3 = inlined_call_operand.hbm [shape: bf16[1024,1024], index: 3, kind: input, shape index: {}]   ;;  %s6439_s4 = inlined_call_operand.hbm [shape: f32[1,1024], index: 4, kind: input, shape index: {}]   ;;  %s6440_s5 = inlined_call_operand.hbm [shape: bf16[1024,128], index: 5, kind: input, shape index: {}]   ;;  %s6441_s6 = inlined_call_operand.hbm [shape: f32[1,128], index: 6, kind: input, shape index: {}]   ;;  %s6442_s7 = inlined_call_operand.hbm [shape: f32[8,128], index: 7, kind: output, shape index: {}]  }
   0x1   :  { %13 = vsyncpa [#allocation6], 0 }
   0x2   :  { %14 = vsyncpa [#allocation9], 0 }
   0x3   :  { %15 = vsyncpa [#allocation12], 0 }
   0x4   :  { %16 = vsyncpa [#allocation4], 0  ;;  %s6175_s24 = smov [#allocation5]  }
   0x5   :  { %s32_s25 = sshll.u32 %s6175_s24, 4  ;;  %s33_s25 = int_to_ptr.vmem [resolvable:$true] %s32_s25 }
   0x6   :  { %s6013_s26 = scalar_lea.vmem %s33_s25, 8192  ;;  %p6018_p1 = scmp.lt.s32.totalorder %s33_s25, %s33_s25 }
   0x7   :  { %p6014_p0 = scmp.ne.s32.totalorder %s33_s25, %s6013_s26  ;;  %p6019_p2 = scmp.lt.s32.totalorder %s6013_s26, %s6013_s26 }
   0x9   :  { %p6020_p3 = por %p6019_p2, %p6018_p1 }
   0xb   :  { %p6021_p4 = pnand %p6020_p3, %p6014_p0 }
   0xd   :  { %6024 = shalt.err (!%p6021_p4)
}
   0xe   :  { %s6176_s27 = smov 512   ;;  %s6177_s28 = smov 32  }
   0xf   :  { %38 = dma.hbm_to_vmem [thread:$0]  %s6436_s1, 8192, %s33_s25, [#allocation6], %s6176_s27, %s6176_s27, %s6177_s28  }
  0x10   :  { %s6178_s8 = smov [#allocation8]   ;;  %s6179_s10 = smov [#allocation11]  }
  0x11   :  { %s54_s9 = sshll.u32 %s6178_s8, 4  ;;  %s76_s11 = sshll.u32 %s6179_s10, 4  ;;  %s55_s9 = int_to_ptr.vmem [resolvable:$true] %s54_s9  ;;  %s77_s11 = int_to_ptr.vmem [resolvable:$true] %s76_s11 }
  0x12   :  { %s6033_s12 = scalar_lea.vmem %s55_s9, 65536  ;;  %p6038_p6 = scmp.lt.s32.totalorder %s55_s9, %s55_s9 }
  0x13   :  { %p6034_p5 = scmp.ne.s32.totalorder %s55_s9, %s6033_s12  ;;  %p6039_p7 = scmp.lt.s32.totalorder %s6033_s12, %s6033_s12 }
  0x15   :  { %p6040_p8 = por %p6039_p7, %p6038_p6 }
  0x17   :  { %p6041_p9 = pnand %p6040_p8, %p6034_p5 }
  0x19   :  { %6044 = shalt.err (!%p6041_p9)
}
  0x1a   :  { %60 = dma.hbm_to_vmem [thread:$0]  %s6438_s3, 65536, %s55_s9, [#allocation9], %s6176_s27, %s6176_s27, %s6177_s28  }
  0x1b   :  { %s6053_s15 = scalar_lea.vmem %s77_s11, 8192  ;;  %p6058_p11 = scmp.lt.s32.totalorder %s77_s11, %s77_s11 }
  0x1c   :  { %p6054_p10 = scmp.ne.s32.totalorder %s77_s11, %s6053_s15  ;;  %p6059_p12 = scmp.lt.s32.totalorder %s6053_s15, %s6053_s15 }
  0x1e   :  { %p6060_p13 = por %p6059_p12, %p6058_p11 }
  0x20   :  { %p6061_p0 = pnand %p6060_p13, %p6054_p10 }
  0x22   :  { %6064 = shalt.err (!%p6061_p0)
}
  0x23   :  { %s6180_s1 = smov 64   ;;  %s6181_s16 = smov 4  }
  0x24   :  { %82 = dma.hbm_to_vmem [thread:$0]  %s6440_s5, 8192, %s77_s11, [#allocation12], %s6180_s1, %s6180_s1, %s6181_s16  }
  0x25   :  { %s6182_s19 = smov [#allocation2]   ;;  %s6183_s21 = smov [#allocation7]  }
  0x26   :  { %s23_s20 = sshll.u32 %s6182_s19, 4  ;;  %s45_s22 = sshll.u32 %s6183_s21, 4  ;;  %s24_s20 = int_to_ptr.vmem [resolvable:$true] %s23_s20  ;;  %s46_s22 = int_to_ptr.vmem [resolvable:$true] %s45_s22 }
  0x27   :  { %s6073_s3 = scalar_lea.vmem %s24_s20, 64  ;;  %p6078_p2 = scmp.lt.s32.totalorder %s24_s20, %s24_s20 }
  0x28   :  { %p6074_p1 = scmp.ne.s32.totalorder %s24_s20, %s6073_s3  ;;  %p6079_p3 = scmp.lt.s32.totalorder %s6073_s3, %s6073_s3 }
  0x2a   :  { %p6080_p4 = por %p6079_p3, %p6078_p2 }
  0x2c   :  { %p6081_p5 = pnand %p6080_p4, %p6074_p1 }
  0x2e   :  { %6084 = shalt.err (!%p6081_p5)
}
  0x2f   :  { %26 = dma.hbm_to_vmem [thread:$0]  %s6435_s0, 64, %s24_s20, [#allocation3]  }
  0x30   :  { %s6093_s25 = scalar_lea.vmem %s46_s22, 128  ;;  %p6098_p7 = scmp.lt.s32.totalorder %s46_s22, %s46_s22 }
  0x31   :  { %p6094_p6 = scmp.ne.s32.totalorder %s46_s22, %s6093_s25  ;;  %p6099_p8 = scmp.lt.s32.totalorder %s6093_s25, %s6093_s25 }
  0x33   :  { %p6100_p9 = por %p6099_p8, %p6098_p7 }
  0x35   :  { %p6101_p10 = pnand %p6100_p9, %p6094_p6 }
  0x37   :  { %6104 = shalt.err (!%p6101_p10)
}
  0x38   :  { %48 = dma.hbm_to_vmem [thread:$0]  %s6437_s2, 128, %s46_s22, [#allocation6]  }
  0x39   :  { %s6184_s27 = smov [#allocation10]   ;;  %s6185_s29 = smov [#allocation13]  }
  0x3a   :  { %s67_s28 = sshll.u32 %s6184_s27, 4  ;;  %s89_s30 = sshll.u32 %s6185_s29, 4  ;;  %s68_s28 = int_to_ptr.vmem [resolvable:$true] %s67_s28  ;;  %s90_s30 = int_to_ptr.vmem [resolvable:$true] %s89_s30 }
  0x3b   :  { %s6113_s8 = scalar_lea.vmem %s68_s28, 128  ;;  %p6118_p12 = scmp.lt.s32.totalorder %s68_s28, %s68_s28 }
  0x3c   :  { %p6114_p11 = scmp.ne.s32.totalorder %s68_s28, %s6113_s8  ;;  %p6119_p13 = scmp.lt.s32.totalorder %s6113_s8, %s6113_s8 }
  0x3e   :  { %p6120_p0 = por %p6119_p13, %p6118_p12 }
  0x40   :  { %p6121_p1 = pnand %p6120_p0, %p6114_p11 }
  0x42   :  { %6124 = shalt.err (!%p6121_p1)
}
  0x43   :  { %70 = dma.hbm_to_vmem [thread:$0]  %s6439_s4, 128, %s68_s28, [#allocation9]  }
  0x44   :  { %s6133_s10 = scalar_lea.vmem %s90_s30, 16  ;;  %s6137_s2 = scalar_lea.vmem %s90_s30, 32 }
  0x45   :  { %p6134_p2 = scmp.ne.s32.totalorder %s90_s30, %s6133_s10  ;;  %p6138_p3 = scmp.lt.s32.totalorder %s90_s30, %s90_s30 }
  0x46   :  { %p6139_p4 = scmp.lt.s32.totalorder %s6137_s2, %s6133_s10 }
  0x48   :  { %p6140_p5 = por %p6139_p4, %p6138_p3 }
  0x4a   :  { %p6141_p6 = pnand %p6140_p5, %p6134_p2 }
  0x4c   :  { %6144 = shalt.err (!%p6141_p6)
}
  0x4d   :  { %92 = dma.hbm_to_vmem [thread:$0]  %s6441_s6, 16, %s90_s30, [#allocation12]  }
  0x4e   :  { %6165 = dma.done.wait [#allocation3], 64  }
  0x4f   :  { %6166 = vsyncadd [#allocation3], 4294967232 }
  0x50   :  { %6167 = dma.done.wait [#allocation6], 8320  }
  0x51   :  { %6168 = vsyncadd [#allocation6], 4294958976 }
  0x52   :  { %6169 = dma.done.wait [#allocation9], 65664  }
  0x53   :  { %6170 = vsyncadd [#allocation9], 4294901632 }
  0x54   :  { %6171 = dma.done.wait [#allocation12], 8208  }
  0x55   :  { %6172 = vsyncadd [#allocation12], 4294959088  ;;  %v6186_v0 = vmov 0   ;;  %v172_v1 = vld [vmem:[#allocation5 + $0x1c0] sm:$0xff]  ;;  %v173_v3 = vld [vmem:[#allocation5 + $0x1c8] sm:$0xff]  ;;  %s6187_s4 = smov [#allocation14]  }
  0x56   :  { %574 = vmatprep.mubr.bf16.mxu0 %v6186_v0  ;;  %615 = vmatprep.mubr.bf16.mxu1 %v6186_v0  ;;  %v176_v2 = vld [vmem:[#allocation5 + $0x1e0] sm:$0xff]  ;;  %v177_v5 = vld [vmem:[#allocation5 + $0x1e8] sm:$0xff]  ;;  %v174_v63 = vld [vmem:[#allocation5 + $0x1d0] sm:$0xff]  ;;  %s5186_s6 = sshll.u32 %s6187_s4, 4  ;;  %s5187_s6 = int_to_ptr.vmem [resolvable:$true] %s5186_s6 }
  0x57   :  { %v5255_v4 = vcombine.high %v172_v1, %v176_v2  ;;  %v5254_v6 = vcombine.low %v172_v1, %v176_v2  ;;  %v164_v7 = vld [vmem:[#allocation5 + $0x180] sm:$0xff]  ;;  %v5257_v9 = vcombine.high %v173_v3, %v177_v5  ;;  %v5256_v10 = vcombine.low %v173_v3, %v177_v5  ;;  %v165_v12 = vld [vmem:[#allocation5 + $0x188] sm:$0xff]  ;;  %v178_v1 = vld [vmem:[#allocation5 + $0x1f0] sm:$0xff]  ;;  %s6145_s13 = scalar_lea.vmem %s5187_s6, 128  ;;  %p6150_p8 = scmp.lt.s32.totalorder %s5187_s6, %s5187_s6 }
  0x58   :  { %v168_v8 = vld [vmem:[#allocation5 + $0x1a0] sm:$0xff]  ;;  %v169_v13 = vld [vmem:[#allocation5 + $0x1a8] sm:$0xff]  ;;  %v175_v2 = vld [vmem:[#allocation5 + $0x1d8] sm:$0xff]  ;;  %p6146_p7 = scmp.ne.s32.totalorder %s5187_s6, %s6145_s13  ;;  %p6151_p9 = scmp.lt.s32.totalorder %s6145_s13, %s6145_s13 }
  0x59   :  { %v5247_v11 = vcombine.high %v164_v7, %v168_v8  ;;  %v156_v14 = vld [vmem:[#allocation5 + $0x140] sm:$0xff]  ;;  %542 = vmatprep.subr.bf16.mxu0 %v5255_v4  ;;  %v5249_v15 = vcombine.high %v165_v12, %v169_v13  ;;  %v157_v17 = vld [vmem:[#allocation5 + $0x148] sm:$0xff]  ;;  %583 = vmatprep.subr.bf16.mxu1 %v5257_v9  ;;  %v5246_v19 = vcombine.low %v164_v7, %v168_v8  ;;  %v179_v3 = vld [vmem:[#allocation5 + $0x1f8] sm:$0xff] }
  0x5a   :  { %v160_v16 = vld [vmem:[#allocation5 + $0x160] sm:$0xff]  ;;  %v161_v18 = vld [vmem:[#allocation5 + $0x168] sm:$0xff]  ;;  %543 = vmatpush1.bf16.msra.mxu0 %v5254_v6  ;;  %584 = vmatpush1.bf16.msra.mxu1 %v5256_v10  ;;  %v5248_v20 = vcombine.low %v165_v12, %v169_v13  ;;  %v5259_v6 = vcombine.high %v174_v63, %v178_v1  ;;  %v5261_v7 = vcombine.high %v175_v2, %v179_v3  ;;  %v166_v8 = vld [vmem:[#allocation5 + $0x190] sm:$0xff]  ;;  %p6152_p10 = por %p6151_p9, %p6150_p8 }
  0x5b   :  { %544 = vmatprep.subr.bf16.mxu0 %v5247_v11  ;;  %v5239_v21 = vcombine.high %v156_v14, %v160_v16  ;;  %585 = vmatprep.subr.bf16.mxu1 %v5249_v15  ;;  %v5241_v22 = vcombine.high %v157_v17, %v161_v18  ;;  %v148_v23 = vld [vmem:[#allocation5 + $0x100] sm:$0xff]  ;;  %v149_v25 = vld [vmem:[#allocation5 + $0x108] sm:$0xff]  ;;  %v5238_v27 = vcombine.low %v156_v14, %v160_v16  ;;  %v170_v9 = vld [vmem:[#allocation5 + $0x1b0] sm:$0xff] }
  0x5c   :  { %v152_v24 = vld [vmem:[#allocation5 + $0x120] sm:$0xff]  ;;  %v153_v26 = vld [vmem:[#allocation5 + $0x128] sm:$0xff]  ;;  %v5240_v28 = vcombine.low %v157_v17, %v161_v18  ;;  %v167_v10 = vld [vmem:[#allocation5 + $0x198] sm:$0xff]  ;;  %v5258_v13 = vcombine.low %v174_v63, %v178_v1  ;;  %v5260_v14 = vcombine.low %v175_v2, %v179_v3  ;;  %v5251_v15 = vcombine.high %v166_v8, %v170_v9  ;;  %p6153_p11 = pnand %p6152_p10, %p6146_p7 }
  0x5d   :  { %v5231_v29 = vcombine.high %v148_v23, %v152_v24  ;;  %v5233_v30 = vcombine.high %v149_v25, %v153_v26  ;;  %v140_v31 = vld [vmem:[#allocation5 + $0xc0] sm:$0xff]  ;;  %v141_v33 = vld [vmem:[#allocation5 + $0xc8] sm:$0xff]  ;;  %v5230_v35 = vcombine.low %v148_v23, %v152_v24  ;;  %v5232_v36 = vcombine.low %v149_v25, %v153_v26  ;;  %v171_v11 = vld [vmem:[#allocation5 + $0x1b8] sm:$0xff] }
  0x5e   :  { %545 = vmatpush1.bf16.msra.mxu0 %v5246_v19  ;;  %586 = vmatpush1.bf16.msra.mxu1 %v5248_v20  ;;  %v144_v32 = vld [vmem:[#allocation5 + $0xe0] sm:$0xff]  ;;  %v145_v34 = vld [vmem:[#allocation5 + $0xe8] sm:$0xff]  ;;  %v6251_v12 = vld [vmem:[#allocation2] sm:$0xf]  ;;  %v5253_v16 = vcombine.high %v167_v10, %v171_v11 }
  0x5f   :  { %546 = vmatprep.subr.bf16.mxu0 %v5239_v21  ;;  %587 = vmatprep.subr.bf16.mxu1 %v5241_v22  ;;  %v5223_v37 = vcombine.high %v140_v31, %v144_v32  ;;  %v5225_v38 = vcombine.high %v141_v33, %v145_v34  ;;  %v132_v39 = vld [vmem:[#allocation5 + $0x80] sm:$0xff]  ;;  %v133_v41 = vld [vmem:[#allocation5 + $0x88] sm:$0xff]  ;;  %v5222_v43 = vcombine.low %v140_v31, %v144_v32  ;;  %v158_v17 = vld [vmem:[#allocation5 + $0x150] sm:$0xff] }
  0x60   :  { %v136_v40 = vld [vmem:[#allocation5 + $0xa0] sm:$0xff]  ;;  %v137_v42 = vld [vmem:[#allocation5 + $0xa8] sm:$0xff]  ;;  %v5224_v44 = vcombine.low %v141_v33, %v145_v34  ;;  %v162_v18 = vld [vmem:[#allocation5 + $0x170] sm:$0xff]  ;;  %v5250_v21 = vcombine.low %v166_v8, %v170_v9  ;;  %v5252_v22 = vcombine.low %v167_v10, %v171_v11 }
  0x61   :  { %v5215_v45 = vcombine.high %v132_v39, %v136_v40  ;;  %v5217_v46 = vcombine.high %v133_v41, %v137_v42  ;;  %v124_v47 = vld [vmem:[#allocation5 + $0x40] sm:$0xff]  ;;  %v125_v49 = vld [vmem:[#allocation5 + $0x48] sm:$0xff]  ;;  %v5214_v51 = vcombine.low %v132_v39, %v136_v40  ;;  %v5216_v52 = vcombine.low %v133_v41, %v137_v42  ;;  %v159_v19 = vld [vmem:[#allocation5 + $0x158] sm:$0xff] }
  0x62   :  { %547 = vmatpush1.bf16.msra.mxu0 %v5238_v27  ;;  %588 = vmatpush1.bf16.msra.mxu1 %v5240_v28  ;;  %v128_v48 = vld [vmem:[#allocation5 + $0x60] sm:$0xff]  ;;  %v129_v50 = vld [vmem:[#allocation5 + $0x68] sm:$0xff]  ;;  %v163_v20 = vld [vmem:[#allocation5 + $0x178] sm:$0xff]  ;;  %v5243_v23 = vcombine.high %v158_v17, %v162_v18 }
  0x63   :  { %548 = vmatprep.subr.bf16.mxu0 %v5231_v29  ;;  %589 = vmatprep.subr.bf16.mxu1 %v5233_v30  ;;  %v5207_v53 = vcombine.high %v124_v47, %v128_v48  ;;  %v5209_v54 = vcombine.high %v125_v49, %v129_v50  ;;  %v116_v55 = vld [vmem:[#allocation5] sm:$0xff]  ;;  %v117_v57 = vld [vmem:[#allocation5 + $0x8] sm:$0xff]  ;;  %v5206_v59 = vcombine.low %v124_v47, %v128_v48  ;;  %v150_v25 = vld [vmem:[#allocation5 + $0x110] sm:$0xff] }
  0x64   :  { %v120_v56 = vld [vmem:[#allocation5 + $0x20] sm:$0xff]  ;;  %v121_v58 = vld [vmem:[#allocation5 + $0x28] sm:$0xff]  ;;  %v5208_v60 = vcombine.low %v125_v49, %v129_v50  ;;  %v5245_v24 = vcombine.high %v159_v19, %v163_v20  ;;  %v154_v26 = vld [vmem:[#allocation5 + $0x130] sm:$0xff]  ;;  %v5242_v29 = vcombine.low %v158_v17, %v162_v18  ;;  %v5244_v31 = vcombine.low %v159_v19, %v163_v20 }
  0x65   :  { %v5199_v61 = vcombine.high %v116_v55, %v120_v56  ;;  %v5201_v62 = vcombine.high %v117_v57, %v121_v58  ;;  %v5198_v4 = vcombine.low %v116_v55, %v120_v56  ;;  %v5200_v5 = vcombine.low %v117_v57, %v121_v58  ;;  %v151_v27 = vld [vmem:[#allocation5 + $0x118] sm:$0xff]  ;;  %v142_v30 = vld [vmem:[#allocation5 + $0xd0] sm:$0xff]  ;;  %v898_v2 = vld [vmem:[#allocation8 + $0x5c0] sm:$0xff] }
  0x66   :  { %549 = vmatpush1.bf16.msra.mxu0 %v5230_v35  ;;  %590 = vmatpush1.bf16.msra.mxu1 %v5232_v36  ;;  %v155_v28 = vld [vmem:[#allocation5 + $0x138] sm:$0xff]  ;;  %v5235_v32 = vcombine.high %v150_v25, %v154_v26  ;;  %v146_v33 = vld [vmem:[#allocation5 + $0xf0] sm:$0xff]  ;;  %v902_v3 = vld [vmem:[#allocation8 + $0x5e0] sm:$0xff] }
  0x67   :  { %550 = vmatprep.subr.bf16.mxu0 %v5223_v37  ;;  %591 = vmatprep.subr.bf16.mxu1 %v5225_v38  ;;  %v143_v34 = vld [vmem:[#allocation5 + $0xd8] sm:$0xff]  ;;  %v5237_v36 = vcombine.high %v151_v27, %v155_v28  ;;  %v5234_v37 = vcombine.low %v150_v25, %v154_v26  ;;  %v134_v38 = vld [vmem:[#allocation5 + $0x90] sm:$0xff]  ;;  %v5236_v40 = vcombine.low %v151_v27, %v155_v28  ;;  %v890_v10 = vld [vmem:[#allocation8 + $0x580] sm:$0xff] }
  0x68   :  { %v147_v35 = vld [vmem:[#allocation5 + $0xf8] sm:$0xff]  ;;  %v138_v39 = vld [vmem:[#allocation5 + $0xb0] sm:$0xff]  ;;  %v894_v11 = vld [vmem:[#allocation8 + $0x5a0] sm:$0xff]  ;;  %v5446_v17 = vcombine.low %v898_v2, %v902_v3 }
  0x69   :  { %v135_v41 = vld [vmem:[#allocation5 + $0x98] sm:$0xff]  ;;  %v5228_v47 = vcombine.low %v143_v34, %v147_v35  ;;  %v5219_v48 = vcombine.high %v134_v38, %v138_v39  ;;  %v882_v19 = vld [vmem:[#allocation8 + $0x540] sm:$0xff]  ;;  %v5438_v25 = vcombine.low %v890_v10, %v894_v11 }
  0x6a   :  { %551 = vmatpush1.bf16.msra.mxu0 %v5222_v43  ;;  %592 = vmatpush1.bf16.msra.mxu1 %v5224_v44  ;;  %v139_v42 = vld [vmem:[#allocation5 + $0xb8] sm:$0xff]  ;;  %v5229_v43 = vcombine.high %v143_v34, %v147_v35  ;;  %v5226_v44 = vcombine.low %v142_v30, %v146_v33  ;;  %v886_v20 = vld [vmem:[#allocation8 + $0x560] sm:$0xff] }
  0x6b   :  { %552 = vmatprep.subr.bf16.mxu0 %v5215_v45  ;;  %593 = vmatprep.subr.bf16.mxu1 %v5217_v46  ;;  %v126_v45 = vld [vmem:[#allocation5 + $0x50] sm:$0xff]  ;;  %v127_v49 = vld [vmem:[#allocation5 + $0x58] sm:$0xff]  ;;  %v5220_v55 = vcombine.low %v135_v41, %v139_v42  ;;  %v874_v27 = vld [vmem:[#allocation8 + $0x500] sm:$0xff] }
  0x6c   :  { %v130_v46 = vld [vmem:[#allocation5 + $0x70] sm:$0xff]  ;;  %v131_v50 = vld [vmem:[#allocation5 + $0x78] sm:$0xff]  ;;  %v878_v28 = vld [vmem:[#allocation8 + $0x520] sm:$0xff] }
  0x6d   :  { %v5211_v56 = vcombine.high %v126_v45, %v130_v46  ;;  %v119_v57 = vld [vmem:[#allocation5 + $0x18] sm:$0xff]  ;;  %v5212_v63 = vcombine.low %v127_v49, %v131_v50  ;;  %v866_v34 = vld [vmem:[#allocation8 + $0x4c0] sm:$0xff] }
  0x6e   :  { %553 = vmatpush1.bf16.msra.mxu0 %v5214_v51  ;;  %594 = vmatpush1.bf16.msra.mxu1 %v5216_v52  ;;  %v5221_v51 = vcombine.high %v135_v41, %v139_v42  ;;  %v5218_v52 = vcombine.low %v134_v38, %v138_v39  ;;  %v123_v58 = vld [vmem:[#allocation5 + $0x38] sm:$0xff]  ;;  %v870_v35 = vld [vmem:[#allocation8 + $0x4e0] sm:$0xff] }
  0x6f   :  { %554 = vmatprep.subr.bf16.mxu0 %v5207_v53  ;;  %595 = vmatprep.subr.bf16.mxu1 %v5209_v54  ;;  %v118_v53 = vld [vmem:[#allocation5 + $0x10] sm:$0xff]  ;;  %v5204_v8 = vcombine.low %v119_v57, %v123_v58  ;;  %v730_v38 = vld [vmem:[#allocation8 + $0x80] sm:$0xff] }
  0x70   :  { %v122_v54 = vld [vmem:[#allocation5 + $0x30] sm:$0xff]  ;;  %v734_v39 = vld [vmem:[#allocation8 + $0xa0] sm:$0xff] }
  0x71   :  { %v5203_v1 = vcombine.high %v118_v53, %v122_v54  ;;  %v858_v41 = vld [vmem:[#allocation8 + $0x480] sm:$0xff] }
  0x72   :  { %555 = vmatpush1.bf16.msra.mxu0 %v5206_v59  ;;  %596 = vmatpush1.bf16.msra.mxu1 %v5208_v60  ;;  %v5213_v59 = vcombine.high %v127_v49, %v131_v50  ;;  %v5210_v60 = vcombine.low %v126_v45, %v130_v46  ;;  %v862_v42 = vld [vmem:[#allocation8 + $0x4a0] sm:$0xff] }
  0x73   :  { %556 = vmatprep.subr.bf16.mxu0 %v5199_v61  ;;  %597 = vmatprep.subr.bf16.mxu1 %v5201_v62  ;;  %v770_v61 = vld [vmem:[#allocation8 + $0x1c0] sm:$0xff] }
  0x74   :  { %v774_v62 = vld [vmem:[#allocation8 + $0x1e0] sm:$0xff] }
  0x75   :  { %v5319_v9 = vcombine.high %v770_v61, %v774_v62  ;;  %v722_v45 = vld [vmem:[#allocation8 + $0x40] sm:$0xff] }
  0x76   :  { %557 = vmatpush1.bf16.msra.mxu0 %v5198_v4  ;;  %598 = vmatpush1.bf16.msra.mxu1 %v5200_v5  ;;  %v5205_v4 = vcombine.high %v119_v57, %v123_v58  ;;  %v5202_v5 = vcombine.low %v118_v53, %v122_v54  ;;  %v726_v46 = vld [vmem:[#allocation8 + $0x60] sm:$0xff]  ;;  %v5406_v53 = vcombine.low %v858_v41, %v862_v42 }
  0x77   :  { %624 = vmatprep.subr.bf16.mxu0 %v5259_v6  ;;  %665 = vmatprep.subr.bf16.mxu1 %v5261_v7  ;;  %v762_v6 = vld [vmem:[#allocation8 + $0x180] sm:$0xff]  ;;  %v5271_v54 = vcombine.high %v722_v45, %v726_v46 }
  0x78   :  { %v766_v7 = vld [vmem:[#allocation8 + $0x1a0] sm:$0xff] }
  0x79   :  { %575 = vmatmul.mubr.bf16.vlgmr.msra.gmra.mxu0 %v6251_v12  ;;  %616 = vmatmul.mubr.bf16.vlgmr.msra.gmra.mxu1 %v6251_v12  ;;  %v5311_v18 = vcombine.high %v762_v6, %v766_v7  ;;  %v850_v49 = vld [vmem:[#allocation8 + $0x440] sm:$0xff] }
  0x7a   :  { %625 = vmatpush1.bf16.msra.mxu0 %v5258_v13  ;;  %666 = vmatpush1.bf16.msra.mxu1 %v5260_v14  ;;  %v5447_v13 = vcombine.high %v898_v2, %v902_v3  ;;  %v5318_v14 = vcombine.low %v770_v61, %v774_v62  ;;  %v854_v50 = vld [vmem:[#allocation8 + $0x460] sm:$0xff] }
  0x7b   :  { %626 = vmatprep.subr.bf16.mxu0 %v5251_v15  ;;  %667 = vmatprep.subr.bf16.mxu1 %v5253_v16  ;;  %v754_v15 = vld [vmem:[#allocation8 + $0x140] sm:$0xff]  ;;  %v5398_v61 = vcombine.low %v850_v49, %v854_v50 }
  0x7c   :  { %656 = vmatprep.mubr.bf16.mxu0 %v6186_v0  ;;  %697 = vmatprep.mubr.bf16.mxu1 %v6186_v0  ;;  %v5227_v0 = vcombine.high %v142_v30, %v146_v33  ;;  %v758_v16 = vld [vmem:[#allocation8 + $0x160] sm:$0xff]  ;;  %v5430_v33 = vcombine.low %v882_v19, %v886_v20 }
  0x7d   :  { %v5303_v26 = vcombine.high %v754_v15, %v758_v16  ;;  %v5302_v30 = vcombine.low %v754_v15, %v758_v16  ;;  %v718_v57 = vld [vmem:[#allocation8 + $0x20] sm:$0xff] }
  0x7e   :  { %627 = vmatpush1.bf16.msra.mxu0 %v5250_v21  ;;  %668 = vmatpush1.bf16.msra.mxu1 %v5252_v22  ;;  %v5439_v21 = vcombine.high %v890_v10, %v894_v11  ;;  %v5310_v22 = vcombine.low %v762_v6, %v766_v7  ;;  %v842_v58 = vld [vmem:[#allocation8 + $0x400] sm:$0xff] }
  0x7f   :  { %628 = vmatprep.subr.bf16.mxu0 %v5243_v23  ;;  %669 = vmatprep.subr.bf16.mxu1 %v5245_v24  ;;  %v746_v23 = vld [vmem:[#allocation8 + $0x100] sm:$0xff] }
  0x80   :  { %v750_v24 = vld [vmem:[#allocation8 + $0x120] sm:$0xff] }
  0x81   :  { %v838_v2 = vld [vmem:[#allocation8 + $0x3e0] sm:$0xff] }
  0x82   :  { %629 = vmatpush1.bf16.msra.mxu0 %v5242_v29  ;;  %670 = vmatpush1.bf16.msra.mxu1 %v5244_v31  ;;  %v5431_v29 = vcombine.high %v882_v19, %v886_v20  ;;  %v738_v31 = vld [vmem:[#allocation8 + $0xc0] sm:$0xff] }
  0x83   :  { %630 = vmatprep.subr.bf16.mxu0 %v5235_v32  ;;  %671 = vmatprep.subr.bf16.mxu1 %v5237_v36  ;;  %v742_v32 = vld [vmem:[#allocation8 + $0xe0] sm:$0xff]  ;;  %v5423_v36 = vcombine.high %v874_v27, %v878_v28 }
  0x84   :  { %v962_v3 = vld [vmem:[#allocation8 + $0x7c0] sm:$0xff] }
  0x85   :  { %v830_v10 = vld [vmem:[#allocation8 + $0x3a0] sm:$0xff] }
  0x86   :  { %631 = vmatpush1.bf16.msra.mxu0 %v5234_v37  ;;  %672 = vmatpush1.bf16.msra.mxu1 %v5236_v40  ;;  %v5294_v37 = vcombine.low %v746_v23, %v750_v24  ;;  %v5422_v40 = vcombine.low %v874_v27, %v878_v28  ;;  %v954_v11 = vld [vmem:[#allocation8 + $0x780] sm:$0xff] }
  0x87   :  { %632 = vmatprep.subr.bf16.mxu0 %v5227_v0  ;;  %673 = vmatprep.subr.bf16.mxu1 %v5229_v43  ;;  %v5287_v0 = vcombine.high %v738_v31, %v742_v32  ;;  %v5415_v43 = vcombine.high %v866_v34, %v870_v35  ;;  %v822_v19 = vld [vmem:[#allocation8 + $0x360] sm:$0xff] }
  0x88   :  { %v946_v20 = vld [vmem:[#allocation8 + $0x740] sm:$0xff] }
  0x89   :  { %v814_v27 = vld [vmem:[#allocation8 + $0x320] sm:$0xff] }
  0x8a   :  { %633 = vmatpush1.bf16.msra.mxu0 %v5226_v44  ;;  %674 = vmatpush1.bf16.msra.mxu1 %v5228_v47  ;;  %v5286_v44 = vcombine.low %v738_v31, %v742_v32  ;;  %v5414_v47 = vcombine.low %v866_v34, %v870_v35  ;;  %v938_v28 = vld [vmem:[#allocation8 + $0x700] sm:$0xff] }
  0x8b   :  { %634 = vmatprep.subr.bf16.mxu0 %v5219_v48  ;;  %675 = vmatprep.subr.bf16.mxu1 %v5221_v51  ;;  %v5279_v48 = vcombine.high %v730_v38, %v734_v39  ;;  %v5407_v51 = vcombine.high %v858_v41, %v862_v42  ;;  %v6259_v31 = vld [vmem:[#allocation8 + $0x9c0] sm:$0xff] }
  0x8c   :  { %v6261_v32 = vld [vmem:[#allocation8 + $0x9e0] sm:$0xff] }
  0x8d   :  { %v6265_v35 = vld [vmem:[#allocation8 + $0xde0] sm:$0xff] }
  0x8e   :  { %635 = vmatpush1.bf16.msra.mxu0 %v5218_v52  ;;  %676 = vmatpush1.bf16.msra.mxu1 %v5220_v55  ;;  %v5278_v52 = vcombine.low %v730_v38, %v734_v39  ;;  %v5399_v55 = vcombine.high %v850_v49, %v854_v50  ;;  %v806_v38 = vld [vmem:[#allocation8 + $0x2e0] sm:$0xff]  ;;  %v5574_v39 = vcombine.low %v6259_v31, %v6261_v32 }
  0x8f   :  { %636 = vmatprep.subr.bf16.mxu0 %v5211_v56  ;;  %677 = vmatprep.subr.bf16.mxu1 %v5213_v59  ;;  %v714_v56 = vld [vmem:[#allocation8] sm:$0xff] }
  0x90   :  { %v846_v59 = vld [vmem:[#allocation8 + $0x420] sm:$0xff]  ;;  %v5263_v62 = vcombine.high %v714_v56, %v718_v57 }
  0x91   :  { %v5390_v6 = vcombine.low %v842_v58, %v846_v59  ;;  %v934_v41 = vld [vmem:[#allocation8 + $0x6e0] sm:$0xff] }
  0x92   :  { %637 = vmatpush1.bf16.msra.mxu0 %v5210_v60  ;;  %678 = vmatpush1.bf16.msra.mxu1 %v5212_v63  ;;  %v5270_v60 = vcombine.low %v722_v45, %v726_v46  ;;  %v5391_v63 = vcombine.high %v842_v58, %v846_v59  ;;  %v794_v46 = vld [vmem:[#allocation8 + $0x280] sm:$0xff] }
  0x93   :  { %638 = vmatprep.subr.bf16.mxu0 %v5203_v1  ;;  %679 = vmatprep.subr.bf16.mxu1 %v5205_v4  ;;  %v834_v1 = vld [vmem:[#allocation8 + $0x3c0] sm:$0xff] }
  0x94   :  { %v966_v4 = vld [vmem:[#allocation8 + $0x7e0] sm:$0xff]  ;;  %v5383_v7 = vcombine.high %v834_v1, %v838_v2 }
  0x95   :  { %v5510_v15 = vcombine.low %v962_v3, %v966_v4  ;;  %v926_v49 = vld [vmem:[#allocation8 + $0x6a0] sm:$0xff] }
  0x96   :  { %639 = vmatpush1.bf16.msra.mxu0 %v5202_v5  ;;  %680 = vmatpush1.bf16.msra.mxu1 %v5204_v8  ;;  %v5262_v5 = vcombine.low %v714_v56, %v718_v57  ;;  %v5511_v8 = vcombine.high %v962_v3, %v966_v4  ;;  %v914_v56 = vld [vmem:[#allocation8 + $0x640] sm:$0xff] }
  0x97   :  { %3828 = vmatprep.subr.bf16.mxu0 %v5319_v9  ;;  %3869 = vmatprep.subr.bf16.mxu1 %v5447_v13  ;;  %v826_v9 = vld [vmem:[#allocation8 + $0x380] sm:$0xff] }
  0x98   :  { %v958_v13 = vld [vmem:[#allocation8 + $0x7a0] sm:$0xff]  ;;  %v5375_v16 = vcombine.high %v826_v9, %v830_v10 }
  0x99   :  { %657 = vmatmul.mubr.bf16.vlgmr.msra.gmra.mxu0 %v6251_v12  ;;  %698 = vmatmul.mubr.bf16.vlgmr.msra.gmra.mxu1 %v6251_v12  ;;  %v5295_v12 = vcombine.high %v746_v23, %v750_v24  ;;  %v5502_v23 = vcombine.low %v954_v11, %v958_v13  ;;  %v918_v57 = vld [vmem:[#allocation8 + $0x660] sm:$0xff] }
  0x9a   :  { %3829 = vmatpush1.bf16.msra.mxu0 %v5318_v14  ;;  %3870 = vmatpush1.bf16.msra.mxu1 %v5446_v17  ;;  %v5382_v14 = vcombine.low %v834_v1, %v838_v2  ;;  %v5503_v17 = vcombine.high %v954_v11, %v958_v13  ;;  %v906_v1 = vld [vmem:[#allocation8 + $0x600] sm:$0xff]  ;;  %v5462_v4 = vcombine.low %v914_v56, %v918_v57  ;;  %v182_v11 = vlaneseq }
  0x9b   :  { %3830 = vmatprep.subr.bf16.mxu0 %v5311_v18  ;;  %3871 = vmatprep.subr.bf16.mxu1 %v5439_v21  ;;  %v818_v18 = vld [vmem:[#allocation8 + $0x340] sm:$0xff] }
  0x9c   :  { %v950_v21 = vld [vmem:[#allocation8 + $0x760] sm:$0xff]  ;;  %v5367_v24 = vcombine.high %v818_v18, %v822_v19  ;;  %v6275_v13 = vshrl.u32 %v182_v11, 7 }
  0x9d   :  { %v910_v2 = vld [vmem:[#allocation8 + $0x620] sm:$0xff] }
  0x9e   :  { %3831 = vmatpush1.bf16.msra.mxu0 %v5310_v22  ;;  %3872 = vmatpush1.bf16.msra.mxu1 %v5438_v25  ;;  %v5374_v22 = vcombine.low %v826_v9, %v830_v10  ;;  %v5495_v25 = vcombine.high %v946_v20, %v950_v21  ;;  %v5575_v9 = vcombine.high %v6259_v31, %v6261_v32 }
  0x9f   :  { %3832 = vmatprep.subr.bf16.mxu0 %v5303_v26  ;;  %3873 = vmatprep.subr.bf16.mxu1 %v5431_v29  ;;  %v810_v26 = vld [vmem:[#allocation8 + $0x300] sm:$0xff] }
  0xa0   :  { %v942_v29 = vld [vmem:[#allocation8 + $0x720] sm:$0xff]  ;;  %v5359_v34 = vcombine.high %v810_v26, %v814_v27  ;;  %v5358_v42 = vcombine.low %v810_v26, %v814_v27 }
  0xa2   :  { %3833 = vmatpush1.bf16.msra.mxu0 %v5302_v30  ;;  %3874 = vmatpush1.bf16.msra.mxu1 %v5430_v33  ;;  %v5366_v30 = vcombine.low %v818_v18, %v822_v19  ;;  %v6263_v33 = vld [vmem:[#allocation8 + $0xdc0] sm:$0xff]  ;;  %v196_v18 = vsub.s32 3, %v6275_v13 }
  0xa3   :  { %3834 = vmatprep.subr.bf16.mxu0 %v5295_v12  ;;  %3875 = vmatprep.subr.bf16.mxu1 %v5423_v36  ;;  %v5494_v12 = vcombine.low %v946_v20, %v950_v21  ;;  %v5487_v36 = vcombine.high %v938_v28, %v942_v29  ;;  %v5703_v10 = vcombine.high %v6263_v33, %v6265_v35 }
  0xa6   :  { %3835 = vmatpush1.bf16.msra.mxu0 %v5294_v37  ;;  %3876 = vmatpush1.bf16.msra.mxu1 %v5422_v40  ;;  %v802_v37 = vld [vmem:[#allocation8 + $0x2c0] sm:$0xff]  ;;  %v5702_v40 = vcombine.low %v6263_v33, %v6265_v35 }
  0xa7   :  { %3836 = vmatprep.subr.bf16.mxu0 %v5287_v0  ;;  %3877 = vmatprep.subr.bf16.mxu1 %v5415_v43  ;;  %v930_v0 = vld [vmem:[#allocation8 + $0x6c0] sm:$0xff]  ;;  %v5486_v43 = vcombine.low %v938_v28, %v942_v29  ;;  %v5350_v50 = vcombine.low %v802_v37, %v806_v38 }
  0xa8   :  { %v5479_v45 = vcombine.high %v930_v0, %v934_v41  ;;  %v998_v33 = vld [vmem:[#allocation8 + $0x8e0] sm:$0xff] }
  0xa9   :  { %v1122_v35 = vld [vmem:[#allocation8 + $0xcc0] sm:$0xff] }
  0xaa   :  { %3837 = vmatpush1.bf16.msra.mxu0 %v5286_v44  ;;  %3878 = vmatpush1.bf16.msra.mxu1 %v5414_v47  ;;  %v5351_v44 = vcombine.high %v802_v37, %v806_v38  ;;  %v798_v47 = vld [vmem:[#allocation8 + $0x2a0] sm:$0xff] }
  0xab   :  { %3838 = vmatprep.subr.bf16.mxu0 %v5279_v48  ;;  %3879 = vmatprep.subr.bf16.mxu1 %v5407_v51  ;;  %v922_v48 = vld [vmem:[#allocation8 + $0x680] sm:$0xff]  ;;  %v5478_v51 = vcombine.low %v930_v0, %v934_v41  ;;  %v5342_v58 = vcombine.low %v794_v46, %v798_v47 }
  0xac   :  { %v5470_v59 = vcombine.low %v922_v48, %v926_v49  ;;  %v1146_v37 = vld [vmem:[#allocation8 + $0xd80] sm:$0xff] }
  0xad   :  { %v1150_v38 = vld [vmem:[#allocation8 + $0xda0] sm:$0xff] }
  0xae   :  { %3839 = vmatpush1.bf16.msra.mxu0 %v5278_v52  ;;  %3880 = vmatpush1.bf16.msra.mxu1 %v5406_v53  ;;  %v5343_v52 = vcombine.high %v794_v46, %v798_v47  ;;  %v5471_v53 = vcombine.high %v922_v48, %v926_v49  ;;  %v5695_v48 = vcombine.high %v1146_v37, %v1150_v38  ;;  %v1010_v49 = vld [vmem:[#allocation8 + $0x940] sm:$0xff] }
  0xaf   :  { %3840 = vmatprep.subr.bf16.mxu0 %v5271_v54  ;;  %3881 = vmatprep.subr.bf16.mxu1 %v5399_v55  ;;  %v786_v54 = vld [vmem:[#allocation8 + $0x240] sm:$0xff] }
  0xb0   :  { %v790_v55 = vld [vmem:[#allocation8 + $0x260] sm:$0xff] }
  0xb1   :  { %v5334_v3 = vcombine.low %v786_v54, %v790_v55 }
  0xb2   :  { %3841 = vmatpush1.bf16.msra.mxu0 %v5270_v60  ;;  %3882 = vmatpush1.bf16.msra.mxu1 %v5398_v61  ;;  %v5335_v60 = vcombine.high %v786_v54, %v790_v55  ;;  %v5463_v61 = vcombine.high %v914_v56, %v918_v57  ;;  %v5694_v54 = vcombine.low %v1146_v37, %v1150_v38  ;;  %v1002_v57 = vld [vmem:[#allocation8 + $0x900] sm:$0xff] }
  0xb3   :  { %3842 = vmatprep.subr.bf16.mxu0 %v5263_v62  ;;  %3883 = vmatprep.subr.bf16.mxu1 %v5391_v63  ;;  %v778_v62 = vld [vmem:[#allocation8 + $0x200] sm:$0xff] }
  0xb4   :  { %v782_v63 = vld [vmem:[#allocation8 + $0x220] sm:$0xff] }
  0xb6   :  { %3843 = vmatpush1.bf16.msra.mxu0 %v5262_v5  ;;  %3884 = vmatpush1.bf16.msra.mxu1 %v5390_v6  ;;  %v5327_v5 = vcombine.high %v778_v62, %v782_v63  ;;  %v5455_v6 = vcombine.high %v906_v1, %v910_v2 }
  0xb7   :  { %3844 = vmatprep.subr.bf16.mxu0 %v5383_v7  ;;  %3885 = vmatprep.subr.bf16.mxu1 %v5511_v8  ;;  %v5326_v7 = vcombine.low %v778_v62, %v782_v63  ;;  %v5454_v8 = vcombine.low %v906_v1, %v910_v2  ;;  %v994_v62 = vld [vmem:[#allocation8 + $0x8c0] sm:$0xff] }
  0xb8   :  { %v5543_v2 = vcombine.high %v994_v62, %v998_v33 }
  0xba   :  { %3845 = vmatpush2.bf16.msra.mxu0 %v5382_v14  ;;  %3886 = vmatpush2.bf16.msra.mxu1 %v5510_v15  ;;  %v184_v14 = vsub.s32 0, %v6275_v13  ;;  %v192_v15 = vsub.s32 2, %v6275_v13 }
  0xbb   :  { %3846 = vmatprep.subr.bf16.mxu0 %v5375_v16  ;;  %3887 = vmatprep.subr.bf16.mxu1 %v5503_v17  ;;  %v6279_v16 = vld [vmem:[#allocation7] sm:$0xff]  ;;  %v188_v17 = vsub.s32 1, %v6275_v13 }
  0xbc   :  { %v185_v19 = vrot.slane %v6279_v16, %v184_v14  ;;  %v193_v20 = vrot.slane %v6279_v16, %v192_v15 }
  0xbd   :  { %v189_v21 = vrot.slane %v6279_v16, %v188_v17 }
  0xbe   :  { %3847 = vmatpush2.bf16.msra.mxu0 %v5374_v22  ;;  %3888 = vmatpush2.bf16.msra.mxu1 %v5502_v23  ;;  %v197_v23 = vrot.slane %v6279_v16, %v196_v18 }
  0xbf   :  { %3848 = vmatprep.subr.bf16.mxu0 %v5367_v24  ;;  %3889 = vmatprep.subr.bf16.mxu1 %v5495_v25 }
  0xc2   :  { %3849 = vmatpush2.bf16.msra.mxu0 %v5366_v30  ;;  %3890 = vmatpush2.bf16.msra.mxu1 %v5494_v12  ;;  %v1018_v30 = vld [vmem:[#allocation8 + $0x980] sm:$0xff] }
  0xc3   :  { %3850 = vmatprep.subr.bf16.mxu0 %v5359_v34  ;;  %3891 = vmatprep.subr.bf16.mxu1 %v5487_v36  ;;  %v1022_v12 = vld [vmem:[#allocation8 + $0x9a0] sm:$0xff] }
  0xc4   :  { %v5567_v46 = vcombine.high %v1018_v30, %v1022_v12 }
  0xc6   :  { %3851 = vmatpush2.bf16.msra.mxu0 %v5358_v42  ;;  %3892 = vmatpush2.bf16.msra.mxu1 %v5486_v43 }
  0xc7   :  { %3852 = vmatprep.subr.bf16.mxu0 %v5351_v44  ;;  %3893 = vmatprep.subr.bf16.mxu1 %v5479_v45 }
  0xca   :  { %3853 = vmatpush2.bf16.msra.mxu0 %v5350_v50  ;;  %3894 = vmatpush2.bf16.msra.mxu1 %v5478_v51  ;;  %v1014_v50 = vld [vmem:[#allocation8 + $0x960] sm:$0xff] }
  0xcb   :  { %3854 = vmatprep.subr.bf16.mxu0 %v5343_v52  ;;  %3895 = vmatprep.subr.bf16.mxu1 %v5471_v53  ;;  %v1138_v51 = vld [vmem:[#allocation8 + $0xd40] sm:$0xff]  ;;  %v5566_v53 = vcombine.low %v1018_v30, %v1022_v12  ;;  %v5559_v55 = vcombine.high %v1010_v49, %v1014_v50 }
  0xcc   :  { %v1142_v52 = vld [vmem:[#allocation8 + $0xd60] sm:$0xff] }
  0xcd   :  { %v5687_v56 = vcombine.high %v1138_v51, %v1142_v52  ;;  %v5686_v31 = vcombine.low %v1138_v51, %v1142_v52  ;;  %v1098_v30 = vld [vmem:[#allocation8 + $0xc00] sm:$0xff] }
  0xce   :  { %3855 = vmatpush2.bf16.msra.mxu0 %v5342_v58  ;;  %3896 = vmatpush2.bf16.msra.mxu1 %v5470_v59  ;;  %v1006_v58 = vld [vmem:[#allocation8 + $0x920] sm:$0xff] }
  0xcf   :  { %3856 = vmatprep.subr.bf16.mxu0 %v5335_v60  ;;  %3897 = vmatprep.subr.bf16.mxu1 %v5463_v61  ;;  %v1130_v59 = vld [vmem:[#allocation8 + $0xd00] sm:$0xff]  ;;  %v5558_v61 = vcombine.low %v1010_v49, %v1014_v50  ;;  %v5551_v32 = vcombine.high %v1002_v57, %v1006_v58  ;;  %v5550_v63 = vcombine.low %v1002_v57, %v1006_v58 }
  0xd0   :  { %v1134_v60 = vld [vmem:[#allocation8 + $0xd20] sm:$0xff] }
  0xd1   :  { %v5678_v1 = vcombine.low %v1130_v59, %v1134_v60  ;;  %v1102_v12 = vld [vmem:[#allocation8 + $0xc20] sm:$0xff] }
  0xd2   :  { %3857 = vmatpush2.bf16.msra.mxu0 %v5334_v3  ;;  %3898 = vmatpush2.bf16.msra.mxu1 %v5462_v4  ;;  %v986_v4 = vld [vmem:[#allocation8 + $0x880] sm:$0xff] }
  0xd3   :  { %3858 = vmatprep.subr.bf16.mxu0 %v5327_v5  ;;  %3899 = vmatprep.subr.bf16.mxu1 %v5455_v6  ;;  %v990_v5 = vld [vmem:[#allocation8 + $0x8a0] sm:$0xff] }
  0xd4   :  { %v1114_v6 = vld [vmem:[#allocation8 + $0xc80] sm:$0xff] }
  0xd5   :  { %v1222_v49 = vld [vmem:[#allocation8 + $0xfe0] sm:$0xff] }
  0xd6   :  { %3859 = vmatpush2.bf16.msra.mxu0 %v5326_v7  ;;  %3900 = vmatpush2.bf16.msra.mxu1 %v5454_v8  ;;  %v1118_v7 = vld [vmem:[#allocation8 + $0xca0] sm:$0xff]  ;;  %v5542_v8 = vcombine.low %v994_v62, %v998_v33 }
  0xd7   :  { %3910 = vmatprep.subr.bf16.mxu0 %v5575_v9  ;;  %3951 = vmatprep.subr.bf16.mxu1 %v5703_v10  ;;  %v5535_v10 = vcombine.high %v986_v4, %v990_v5  ;;  %v5663_v11 = vcombine.high %v1114_v6, %v1118_v7  ;;  %v1082_v58 = vld [vmem:[#allocation8 + $0xb80] sm:$0xff] }
 0x139   :  { %v576_v22 = vpop.f32.mrf.mxu0  ;;  %v617_v24 = vpop.f32.mrf.mxu1 }
 0x13a   :  { %v577_v25 = vadd.f32 %v576_v22, %v185_v19  ;;  %v618_v26 = vadd.f32 %v617_v24, %v193_v20  ;;  %v978_v19 = vld [vmem:[#allocation8 + $0x840] sm:$0xff]  ;;  %v5662_v24 = vcombine.low %v1114_v6, %v1118_v7 }
 0x13b   :  { %v578_v27 = vpop.f32.mrf.mxu0  ;;  %v619_v29 = vpop.f32.mrf.mxu1  ;;  %v982_v20 = vld [vmem:[#allocation8 + $0x860] sm:$0xff] }
 0x13c   :  { %v579_v28 = vadd.f32 %v578_v27, %v189_v21  ;;  %v620_v34 = vadd.f32 %v619_v29, %v197_v23  ;;  %v6295_v0 = vpack.c.bf16 %v618_v26, %v618_v26  ;;  %v6299_v43 = vpack.c.bf16 %v577_v25, %v577_v25  ;;  %v1106_v21 = vld [vmem:[#allocation8 + $0xc40] sm:$0xff] }
 0x13d   :  { %v580_v36 = vpop.f32.mrf.mxu0  ;;  %v621_v42 = vpop.f32.mrf.mxu1  ;;  %v1110_v22 = vld [vmem:[#allocation8 + $0xc60] sm:$0xff]  ;;  %v5534_v23 = vcombine.low %v986_v4, %v990_v5  ;;  %v5527_v25 = vcombine.high %v978_v19, %v982_v20  ;;  %v204_v29 = vsub.s32 5, %v6275_v13 }
 0x13e   :  { %v6297_v41 = vpack.c.bf16 %v579_v28, %v579_v28  ;;  %v6301_v44 = vpack.c.bf16 %v620_v34, %v620_v34  ;;  %v5655_v26 = vcombine.high %v1106_v21, %v1110_v22  ;;  %v970_v27 = vld [vmem:[#allocation8 + $0x800] sm:$0xff]  ;;  %v212_v34 = vsub.s32 7, %v6275_v13 }
 0x13f   :  { %v581_v45 = vpop.f32.mrf.mxu0  ;;  %v622_v47 = vpop.f32.mrf.mxu1  ;;  %v974_v28 = vld [vmem:[#allocation8 + $0x820] sm:$0xff]  ;;  %v5526_v36 = vcombine.low %v978_v19, %v982_v20  ;;  %v5654_v37 = vcombine.low %v1106_v21, %v1110_v22  ;;  %v5647_v42 = vcombine.high %v1098_v30, %v1102_v12 }
 0x140   :  { %3860 = vmatprep.mubr.bf16.mxu0 %v6297_v41  ;;  %3901 = vmatprep.mubr.bf16.mxu1 %v6301_v44  ;;  %v5519_v38 = vcombine.high %v970_v27, %v974_v28  ;;  %v1090_v45 = vld [vmem:[#allocation8 + $0xbc0] sm:$0xff]  ;;  %v205_v47 = vrot.slane %v6279_v16, %v204_v29  ;;  %v213_v51 = vrot.slane %v6279_v16, %v212_v34 }
 0x141   :  { %3861 = vmatmul.mubr.bf16.vlgmr.msra.gmra.mxu0 %v6299_v43  ;;  %3902 = vmatmul.mubr.bf16.vlgmr.msra.gmra.mxu1 %v6295_v0  ;;  %v5518_v52 = vcombine.low %v970_v27, %v974_v28  ;;  %v1074_v5 = vld [vmem:[#allocation8 + $0xb40] sm:$0xff] }
 0x142   :  { %3911 = vmatpush1.bf16.msra.mxu0 %v5574_v39  ;;  %3952 = vmatpush1.bf16.msra.mxu1 %v5702_v40  ;;  %v5679_v39 = vcombine.high %v1130_v59, %v1134_v60  ;;  %v1126_v40 = vld [vmem:[#allocation8 + $0xce0] sm:$0xff] }
 0x143   :  { %3912 = vmatprep.subr.bf16.mxu0 %v5567_v46  ;;  %3953 = vmatprep.subr.bf16.mxu1 %v5695_v48  ;;  %v5671_v3 = vcombine.high %v1122_v35, %v1126_v40  ;;  %v5670_v9 = vcombine.low %v1122_v35, %v1126_v40  ;;  %v1094_v46 = vld [vmem:[#allocation8 + $0xbe0] sm:$0xff] }
 0x144   :  { %v1218_v48 = vld [vmem:[#allocation8 + $0xfc0] sm:$0xff]  ;;  %v5638_v33 = vcombine.low %v1090_v45, %v1094_v46 }
 0x145   :  { %v5767_v57 = vcombine.high %v1218_v48, %v1222_v49  ;;  %v1086_v59 = vld [vmem:[#allocation8 + $0xba0] sm:$0xff] }
 0x146   :  { %3913 = vmatpush1.bf16.msra.mxu0 %v5566_v53  ;;  %3954 = vmatpush1.bf16.msra.mxu1 %v5694_v54  ;;  %v5646_v54 = vcombine.low %v1098_v30, %v1102_v12  ;;  %v1078_v6 = vld [vmem:[#allocation8 + $0xb60] sm:$0xff] }
 0x147   :  { %3914 = vmatprep.subr.bf16.mxu0 %v5559_v55  ;;  %3955 = vmatprep.subr.bf16.mxu1 %v5687_v56  ;;  %v5639_v55 = vcombine.high %v1090_v45, %v1094_v46  ;;  %v5623_v19 = vcombine.high %v1074_v5, %v1078_v6  ;;  %v1066_v21 = vld [vmem:[#allocation8 + $0xb00] sm:$0xff] }
 0x148   :  { %v1070_v22 = vld [vmem:[#allocation8 + $0xb20] sm:$0xff] }
 0x149   :  { %v5615_v27 = vcombine.high %v1066_v21, %v1070_v22  ;;  %v1058_v30 = vld [vmem:[#allocation8 + $0xac0] sm:$0xff] }
 0x14a   :  { %3915 = vmatpush1.bf16.msra.mxu0 %v5558_v61  ;;  %3956 = vmatpush1.bf16.msra.mxu1 %v5686_v31  ;;  %v1210_v31 = vld [vmem:[#allocation8 + $0xf80] sm:$0xff] }
 0x14b   :  { %3916 = vmatprep.subr.bf16.mxu0 %v5551_v32  ;;  %3957 = vmatprep.subr.bf16.mxu1 %v5679_v39  ;;  %v1214_v32 = vld [vmem:[#allocation8 + $0xfa0] sm:$0xff] }
 0x14c   :  { %v5759_v4 = vcombine.high %v1210_v31, %v1214_v32  ;;  %v1062_v12 = vld [vmem:[#allocation8 + $0xae0] sm:$0xff] }
 0x14d   :  { %v5607_v45 = vcombine.high %v1058_v30, %v1062_v12 }
 0x14e   :  { %3917 = vmatpush1.bf16.msra.mxu0 %v5550_v63  ;;  %3958 = vmatpush1.bf16.msra.mxu1 %v5678_v1  ;;  %v5766_v63 = vcombine.low %v1218_v48, %v1222_v49  ;;  %v5631_v1 = vcombine.high %v1082_v58, %v1086_v59  ;;  %v1054_v48 = vld [vmem:[#allocation8 + $0xaa0] sm:$0xff] }
 0x14f   :  { %3918 = vmatprep.subr.bf16.mxu0 %v5543_v2  ;;  %3959 = vmatprep.subr.bf16.mxu1 %v5671_v3  ;;  %v1178_v49 = vld [vmem:[#allocation8 + $0xe80] sm:$0xff] }
 0x152   :  { %3919 = vmatpush1.bf16.msra.mxu0 %v5542_v8  ;;  %3960 = vmatpush1.bf16.msra.mxu1 %v5670_v9  ;;  %v1202_v8 = vld [vmem:[#allocation8 + $0xf40] sm:$0xff] }
 0x153   :  { %3920 = vmatprep.subr.bf16.mxu0 %v5535_v10  ;;  %3961 = vmatprep.subr.bf16.mxu1 %v5663_v11  ;;  %v1206_v9 = vld [vmem:[#allocation8 + $0xf60] sm:$0xff]  ;;  %v5630_v10 = vcombine.low %v1082_v58, %v1086_v59  ;;  %v5758_v11 = vcombine.low %v1210_v31, %v1214_v32  ;;  %v208_v31 = vsub.s32 6, %v6275_v13  ;;  %v200_v32 = vsub.s32 4, %v6275_v13 }
 0x154   :  { %v5751_v20 = vcombine.high %v1202_v8, %v1206_v9  ;;  %v1046_v58 = vld [vmem:[#allocation8 + $0xa60] sm:$0xff] }
 0x155   :  { %v1170_v59 = vld [vmem:[#allocation8 + $0xe40] sm:$0xff] }
 0x156   :  { %3921 = vmatpush1.bf16.msra.mxu0 %v5534_v23  ;;  %3962 = vmatpush1.bf16.msra.mxu1 %v5662_v24  ;;  %v1194_v23 = vld [vmem:[#allocation8 + $0xf00] sm:$0xff] }
 0x157   :  { %3922 = vmatprep.subr.bf16.mxu0 %v5527_v25  ;;  %3963 = vmatprep.subr.bf16.mxu1 %v5655_v26  ;;  %v1198_v24 = vld [vmem:[#allocation8 + $0xf20] sm:$0xff]  ;;  %v5622_v25 = vcombine.low %v1074_v5, %v1078_v6  ;;  %v5750_v26 = vcombine.low %v1202_v8, %v1206_v9  ;;  %v201_v6 = vrot.slane %v6279_v16, %v200_v32 }
 0x158   :  { %v5743_v28 = vcombine.high %v1194_v23, %v1198_v24 }
 0x159   :  { %v6318_v50 = vpop.f32.mrf.mxu0  ;;  %v6323_v53 = vpop.f32.mrf.mxu1 }
 0x15a   :  { %3923 = vmatpush1.bf16.msra.mxu0 %v5526_v36  ;;  %3964 = vmatpush1.bf16.msra.mxu1 %v5654_v37  ;;  %v1186_v36 = vld [vmem:[#allocation8 + $0xec0] sm:$0xff] }
 0x15b   :  { %3924 = vmatprep.subr.bf16.mxu0 %v5519_v38  ;;  %v660_v56 = vpop.f32.mrf.mxu0  ;;  %3965 = vmatprep.subr.bf16.mxu1 %v5647_v42  ;;  %v701_v61 = vpop.f32.mrf.mxu1  ;;  %v1190_v37 = vld [vmem:[#allocation8 + $0xee0] sm:$0xff]  ;;  %v5614_v38 = vcombine.low %v1066_v21, %v1070_v22  ;;  %v5742_v42 = vcombine.low %v1194_v23, %v1198_v24  ;;  %v659_v23 = vadd.f32 %v6318_v50, %v201_v6  ;;  %v735_v6 = vld [vmem:[#allocation8 + $0xa8] sm:$0xff] }
 0x15c   :  { %v661_v60 = vadd.f32 %v660_v56, %v205_v47  ;;  %v702_v62 = vadd.f32 %v701_v61, %v213_v51  ;;  %v5735_v46 = vcombine.high %v1186_v36, %v1190_v37  ;;  %v1050_v47 = vld [vmem:[#allocation8 + $0xa80] sm:$0xff] }
 0x15d   :  { %v662_v39 = vpop.f32.mrf.mxu0  ;;  %v703_v40 = vpop.f32.mrf.mxu1  ;;  %v1182_v51 = vld [vmem:[#allocation8 + $0xea0] sm:$0xff]  ;;  %v5598_v61 = vcombine.low %v1050_v47, %v1054_v48 }
 0x15e   :  { %3925 = vmatpush1.bf16.msra.mxu0 %v5518_v52  ;;  %v6325_v35 = vpack.c.bf16 %v661_v60, %v661_v60  ;;  %3966 = vmatpush1.bf16.msra.mxu1 %v5646_v54  ;;  %v6327_v2 = vpack.c.bf16 %v702_v62, %v702_v62  ;;  %v5606_v52 = vcombine.low %v1058_v30, %v1062_v12  ;;  %v1174_v60 = vld [vmem:[#allocation8 + $0xe60] sm:$0xff]  ;;  %v891_v12 = vld [vmem:[#allocation8 + $0x588] sm:$0xff] }
 0x15f   :  { %3926 = vmatprep.subr.bf16.mxu0 %v5639_v55  ;;  %v663_v3 = vpop.f32.mrf.mxu0  ;;  %3967 = vmatprep.subr.bf16.mxu1 %v5767_v57  ;;  %v704_v7 = vpop.f32.mrf.mxu1  ;;  %v5734_v54 = vcombine.low %v1186_v36, %v1190_v37  ;;  %v5599_v55 = vcombine.high %v1050_v47, %v1054_v48  ;;  %v5727_v56 = vcombine.high %v1178_v49, %v1182_v51  ;;  %v1042_v57 = vld [vmem:[#allocation8 + $0xa40] sm:$0xff]  ;;  %v895_v36 = vld [vmem:[#allocation8 + $0x5a8] sm:$0xff] }
 0x160   :  { %3942 = vmatprep.mubr.bf16.mxu0 %v6325_v35  ;;  %3983 = vmatprep.mubr.bf16.mxu1 %v6327_v2  ;;  %v5726_v39 = vcombine.low %v1178_v49, %v1182_v51  ;;  %v5591_v62 = vcombine.high %v1042_v57, %v1046_v58  ;;  %v1034_v40 = vld [vmem:[#allocation8 + $0xa00] sm:$0xff]  ;;  %v5590_v5 = vcombine.low %v1042_v57, %v1046_v58  ;;  %v887_v47 = vld [vmem:[#allocation8 + $0x568] sm:$0xff] }
 0x161   :  { %v1166_v3 = vld [vmem:[#allocation8 + $0xe20] sm:$0xff]  ;;  %v5718_v7 = vcombine.low %v1170_v59, %v1174_v60  ;;  %v6343_v37 = vpack.c.bf16 %v659_v23, %v659_v23  ;;  %v5440_v49 = vcombine.low %v891_v12, %v895_v36  ;;  %v879_v57 = vld [vmem:[#allocation8 + $0x528] sm:$0xff] }
 0x162   :  { %3927 = vmatpush2.bf16.msra.mxu0 %v5638_v33  ;;  %3968 = vmatpush2.bf16.msra.mxu1 %v5766_v63  ;;  %v5719_v33 = vcombine.high %v1170_v59, %v1174_v60  ;;  %v1038_v63 = vld [vmem:[#allocation8 + $0xa20] sm:$0xff]  ;;  %v855_v23 = vld [vmem:[#allocation8 + $0x468] sm:$0xff] }
 0x163   :  { %3928 = vmatprep.subr.bf16.mxu0 %v5631_v1  ;;  %3969 = vmatprep.subr.bf16.mxu1 %v5759_v4  ;;  %v1162_v1 = vld [vmem:[#allocation8 + $0xe00] sm:$0xff]  ;;  %v209_v4 = vrot.slane %v6279_v16, %v208_v31  ;;  %v5583_v8 = vcombine.high %v1034_v40, %v1038_v63  ;;  %v5582_v22 = vcombine.low %v1034_v40, %v1038_v63  ;;  %v871_v40 = vld [vmem:[#allocation8 + $0x4e8] sm:$0xff] }
 0x164   :  { %v5711_v9 = vcombine.high %v1162_v1, %v1166_v3  ;;  %v5710_v24 = vcombine.low %v1162_v1, %v1166_v3 }
 0x165   :  { %v700_v21 = vadd.f32 %v6323_v53, %v209_v4 }
 0x166   :  { %3929 = vmatpush2.bf16.msra.mxu0 %v5630_v10  ;;  %3970 = vmatpush2.bf16.msra.mxu1 %v5758_v11  ;;  %v771_v10 = vld [vmem:[#allocation8 + $0x1c8] sm:$0xff] }
 0x167   :  { %3930 = vmatprep.subr.bf16.mxu0 %v5623_v19  ;;  %3971 = vmatprep.subr.bf16.mxu1 %v5751_v20  ;;  %v775_v11 = vld [vmem:[#allocation8 + $0x1e8] sm:$0xff] }
 0x168   :  { %v899_v19 = vld [vmem:[#allocation8 + $0x5c8] sm:$0xff]  ;;  %v5321_v16 = vcombine.high %v771_v10, %v775_v11  ;;  %v5320_v30 = vcombine.low %v771_v10, %v775_v11 }
 0x169   :  { %v903_v20 = vld [vmem:[#allocation8 + $0x5e8] sm:$0xff] }
 0x16a   :  { %3931 = vmatpush2.bf16.msra.mxu0 %v5622_v25  ;;  %3972 = vmatpush2.bf16.msra.mxu1 %v5750_v26  ;;  %v5449_v25 = vcombine.high %v899_v19, %v903_v20  ;;  %v763_v26 = vld [vmem:[#allocation8 + $0x188] sm:$0xff]  ;;  %v5448_v53 = vcombine.low %v899_v19, %v903_v20 }
 0x16b   :  { %3932 = vmatprep.subr.bf16.mxu0 %v5615_v27  ;;  %3973 = vmatprep.subr.bf16.mxu1 %v5743_v28  ;;  %v767_v27 = vld [vmem:[#allocation8 + $0x1a8] sm:$0xff]  ;;  %v6341_v28 = vpack.c.bf16 %v700_v21, %v700_v21 }
 0x16c   :  { %v5313_v50 = vcombine.high %v763_v26, %v767_v27  ;;  %v5312_v48 = vcombine.low %v763_v26, %v767_v27  ;;  %v723_v20 = vld [vmem:[#allocation8 + $0x48] sm:$0xff] }
 0x16d   :  { %v727_v21 = vld [vmem:[#allocation8 + $0x68] sm:$0xff] }
 0x16e   :  { %3933 = vmatpush2.bf16.msra.mxu0 %v5614_v38  ;;  %3974 = vmatpush2.bf16.msra.mxu1 %v5742_v42  ;;  %v755_v38 = vld [vmem:[#allocation8 + $0x148] sm:$0xff] }
 0x16f   :  { %3934 = vmatprep.subr.bf16.mxu0 %v5607_v45  ;;  %3975 = vmatprep.subr.bf16.mxu1 %v5735_v46  ;;  %v759_v42 = vld [vmem:[#allocation8 + $0x168] sm:$0xff]  ;;  %v5441_v45 = vcombine.high %v891_v12, %v895_v36 }
 0x170   :  { %v883_v46 = vld [vmem:[#allocation8 + $0x548] sm:$0xff]  ;;  %v5305_v51 = vcombine.high %v755_v38, %v759_v42  ;;  %v5304_v58 = vcombine.low %v755_v38, %v759_v42 }
 0x171   :  { %v5432_v59 = vcombine.low %v883_v46, %v887_v47  ;;  %v715_v27 = vld [vmem:[#allocation8 + $0x8] sm:$0xff] }
 0x172   :  { %3935 = vmatpush2.bf16.msra.mxu0 %v5606_v52  ;;  %3976 = vmatpush2.bf16.msra.mxu1 %v5734_v54  ;;  %v5433_v52 = vcombine.high %v883_v46, %v887_v47  ;;  %v747_v54 = vld [vmem:[#allocation8 + $0x108] sm:$0xff] }
 0x173   :  { %3936 = vmatprep.subr.bf16.mxu0 %v5599_v55  ;;  %3977 = vmatprep.subr.bf16.mxu1 %v5727_v56  ;;  %v751_v55 = vld [vmem:[#allocation8 + $0x128] sm:$0xff] }
 0x174   :  { %v875_v56 = vld [vmem:[#allocation8 + $0x508] sm:$0xff]  ;;  %v5297_v60 = vcombine.high %v747_v54, %v751_v55  ;;  %v5296_v63 = vcombine.low %v747_v54, %v751_v55 }
 0x175   :  { %v5424_v1 = vcombine.low %v875_v56, %v879_v57  ;;  %v843_v12 = vld [vmem:[#allocation8 + $0x408] sm:$0xff] }
 0x176   :  { %3937 = vmatpush2.bf16.msra.mxu0 %v5598_v61  ;;  %3978 = vmatpush2.bf16.msra.mxu1 %v5726_v39  ;;  %v5425_v61 = vcombine.high %v875_v56, %v879_v57  ;;  %v739_v39 = vld [vmem:[#allocation8 + $0xc8] sm:$0xff] }
 0x177   :  { %3938 = vmatprep.subr.bf16.mxu0 %v5591_v62  ;;  %3979 = vmatprep.subr.bf16.mxu1 %v5719_v33  ;;  %v743_v62 = vld [vmem:[#allocation8 + $0xe8] sm:$0xff] }
 0x178   :  { %v867_v33 = vld [vmem:[#allocation8 + $0x4c8] sm:$0xff]  ;;  %v5289_v3 = vcombine.high %v739_v39, %v743_v62 }
 0x179   :  { %v5417_v4 = vcombine.high %v867_v33, %v871_v40  ;;  %v5416_v10 = vcombine.low %v867_v33, %v871_v40  ;;  %v847_v36 = vld [vmem:[#allocation8 + $0x428] sm:$0xff] }
 0x17a   :  { %3939 = vmatpush2.bf16.msra.mxu0 %v5590_v5  ;;  %3980 = vmatpush2.bf16.msra.mxu1 %v5718_v7  ;;  %v731_v5 = vld [vmem:[#allocation8 + $0x88] sm:$0xff]  ;;  %v5393_v42 = vcombine.high %v843_v12, %v847_v36 }
 0x17b   :  { %3940 = vmatprep.subr.bf16.mxu0 %v5583_v8  ;;  %3981 = vmatprep.subr.bf16.mxu1 %v5711_v9  ;;  %v859_v7 = vld [vmem:[#allocation8 + $0x488] sm:$0xff]  ;;  %v5288_v9 = vcombine.low %v739_v39, %v743_v62  ;;  %v5281_v11 = vcombine.high %v731_v5, %v735_v6 }
 0x17c   :  { %v863_v8 = vld [vmem:[#allocation8 + $0x4a8] sm:$0xff] }
 0x17d   :  { %v5409_v19 = vcombine.high %v859_v7, %v863_v8  ;;  %v839_v46 = vld [vmem:[#allocation8 + $0x3e8] sm:$0xff] }
 0x17e   :  { %3941 = vmatpush2.bf16.msra.mxu0 %v5582_v22  ;;  %3982 = vmatpush2.bf16.msra.mxu1 %v5710_v24  ;;  %v851_v22 = vld [vmem:[#allocation8 + $0x448] sm:$0xff]  ;;  %v5280_v24 = vcombine.low %v731_v5, %v735_v6 }
 0x17f   :  { %3992 = vmatprep.subr.bf16.mxu0 %v5321_v16  ;;  %4033 = vmatprep.subr.bf16.mxu1 %v5449_v25  ;;  %v5408_v16 = vcombine.low %v859_v7, %v863_v8  ;;  %v5273_v25 = vcombine.high %v723_v20, %v727_v21  ;;  %v5401_v26 = vcombine.high %v851_v22, %v855_v23  ;;  %v963_v47 = vld [vmem:[#allocation8 + $0x7c8] sm:$0xff] }
 0x180   :  { %v827_v55 = vld [vmem:[#allocation8 + $0x388] sm:$0xff] }
 0x181   :  { %3943 = vmatmul.mubr.bf16.vlgmr.msra.gmra.mxu0 %v6343_v37  ;;  %3984 = vmatmul.mubr.bf16.vlgmr.msra.gmra.mxu1 %v6341_v28  ;;  %v831_v56 = vld [vmem:[#allocation8 + $0x3a8] sm:$0xff] }
 0x182   :  { %3993 = vmatpush1.bf16.msra.mxu0 %v5320_v30  ;;  %4024 = vmatprep.mubr.bf16.mxu0 %v6297_v41  ;;  %v719_v30 = vld [vmem:[#allocation8 + $0x28] sm:$0xff] }
 0x183   :  { %4034 = vmatpush1.bf16.msra.mxu1 %v5448_v53  ;;  %4065 = vmatprep.mubr.bf16.mxu1 %v6301_v44  ;;  %v5272_v53 = vcombine.low %v723_v20, %v727_v21  ;;  %v5265_v38 = vcombine.high %v715_v27, %v719_v30  ;;  %v955_v57 = vld [vmem:[#allocation8 + $0x788] sm:$0xff] }
 0x184   :  { %3994 = vmatprep.subr.bf16.mxu0 %v5313_v50  ;;  %4035 = vmatprep.subr.bf16.mxu1 %v5441_v45  ;;  %v5400_v50 = vcombine.low %v851_v22, %v855_v23  ;;  %v835_v45 = vld [vmem:[#allocation8 + $0x3c8] sm:$0xff] }
 0x185   :  { %v819_v62 = vld [vmem:[#allocation8 + $0x348] sm:$0xff] }
 0x186   :  { %3995 = vmatpush1.bf16.msra.mxu0 %v5312_v48  ;;  %v967_v48 = vld [vmem:[#allocation8 + $0x7e8] sm:$0xff] }
 0x187   :  { %4036 = vmatpush1.bf16.msra.mxu1 %v5440_v49  ;;  %3996 = vmatprep.subr.bf16.mxu0 %v5305_v51  ;;  %v5264_v49 = vcombine.low %v715_v27, %v719_v30  ;;  %v5392_v51 = vcombine.low %v843_v12, %v847_v36  ;;  %v5513_v54 = vcombine.high %v963_v47, %v967_v48  ;;  %v823_v33 = vld [vmem:[#allocation8 + $0x368] sm:$0xff] }
 0x188   :  { %4037 = vmatprep.subr.bf16.mxu1 %v5433_v52  ;;  %v5385_v52 = vcombine.high %v835_v45, %v839_v46  ;;  %v947_v40 = vld [vmem:[#allocation8 + $0x748] sm:$0xff] }
 0x189   :  { %v811_v6 = vld [vmem:[#allocation8 + $0x308] sm:$0xff] }
 0x18a   :  { %3997 = vmatpush1.bf16.msra.mxu0 %v5304_v58  ;;  %v959_v58 = vld [vmem:[#allocation8 + $0x7a8] sm:$0xff] }
 0x18b   :  { %4038 = vmatpush1.bf16.msra.mxu1 %v5432_v59  ;;  %3998 = vmatprep.subr.bf16.mxu0 %v5297_v60  ;;  %v5384_v59 = vcombine.low %v835_v45, %v839_v46  ;;  %v5512_v60 = vcombine.low %v963_v47, %v967_v48  ;;  %v5505_v39 = vcombine.high %v955_v57, %v959_v58  ;;  %v815_v7 = vld [vmem:[#allocation8 + $0x328] sm:$0xff] }
 0x18c   :  { %4039 = vmatprep.subr.bf16.mxu1 %v5425_v61  ;;  %v5377_v61 = vcombine.high %v827_v55, %v831_v56  ;;  %v939_v8 = vld [vmem:[#allocation8 + $0x708] sm:$0xff] }
 0x18d   :  { %v803_v21 = vld [vmem:[#allocation8 + $0x2c8] sm:$0xff] }
 0x18e   :  { %3999 = vmatpush1.bf16.msra.mxu0 %v5296_v63  ;;  %v951_v63 = vld [vmem:[#allocation8 + $0x768] sm:$0xff] }
 0x18f   :  { %4040 = vmatpush1.bf16.msra.mxu1 %v5424_v1  ;;  %4000 = vmatprep.subr.bf16.mxu0 %v5289_v3  ;;  %v5376_v1 = vcombine.low %v827_v55, %v831_v56  ;;  %v5504_v3 = vcombine.low %v955_v57, %v959_v58  ;;  %v5497_v5 = vcombine.high %v947_v40, %v951_v63  ;;  %v807_v22 = vld [vmem:[#allocation8 + $0x2e8] sm:$0xff] }
 0x190   :  { %4041 = vmatprep.subr.bf16.mxu1 %v5417_v4  ;;  %v5369_v4 = vcombine.high %v819_v62, %v823_v33  ;;  %v931_v23 = vld [vmem:[#allocation8 + $0x6c8] sm:$0xff] }
 0x191   :  { %v795_v30 = vld [vmem:[#allocation8 + $0x288] sm:$0xff] }
 0x192   :  { %4001 = vmatpush1.bf16.msra.mxu0 %v5288_v9  ;;  %v943_v9 = vld [vmem:[#allocation8 + $0x728] sm:$0xff] }
 0x193   :  { %4042 = vmatpush1.bf16.msra.mxu1 %v5416_v10  ;;  %4002 = vmatprep.subr.bf16.mxu0 %v5281_v11  ;;  %v5368_v10 = vcombine.low %v819_v62, %v823_v33  ;;  %v5496_v11 = vcombine.low %v947_v40, %v951_v63  ;;  %v5489_v20 = vcombine.high %v939_v8, %v943_v9  ;;  %v799_v12 = vld [vmem:[#allocation8 + $0x2a8] sm:$0xff] }
 0x194   :  { %4043 = vmatprep.subr.bf16.mxu1 %v5409_v19  ;;  %v5361_v19 = vcombine.high %v811_v6, %v815_v7  ;;  %v923_v36 = vld [vmem:[#allocation8 + $0x688] sm:$0xff] }
 0x195   :  { %v787_v46 = vld [vmem:[#allocation8 + $0x248] sm:$0xff] }
 0x196   :  { %4003 = vmatpush1.bf16.msra.mxu0 %v5280_v24  ;;  %v935_v24 = vld [vmem:[#allocation8 + $0x6e8] sm:$0xff] }
 0x197   :  { %4044 = vmatpush1.bf16.msra.mxu1 %v5408_v16  ;;  %4004 = vmatprep.subr.bf16.mxu0 %v5273_v25  ;;  %v5360_v16 = vcombine.low %v811_v6, %v815_v7  ;;  %v5488_v25 = vcombine.low %v939_v8, %v943_v9  ;;  %v5481_v27 = vcombine.high %v931_v23, %v935_v24  ;;  %v791_v47 = vld [vmem:[#allocation8 + $0x268] sm:$0xff] }
 0x198   :  { %4045 = vmatprep.subr.bf16.mxu1 %v5401_v26  ;;  %v5353_v26 = vcombine.high %v803_v21, %v807_v22  ;;  %v915_v48 = vld [vmem:[#allocation8 + $0x648] sm:$0xff] }
 0x199   :  { %v779_v56 = vld [vmem:[#allocation8 + $0x208] sm:$0xff] }
 0x19a   :  { %4005 = vmatpush1.bf16.msra.mxu0 %v5272_v53  ;;  %v927_v53 = vld [vmem:[#allocation8 + $0x6a8] sm:$0xff] }
 0x19b   :  { %4046 = vmatpush1.bf16.msra.mxu1 %v5400_v50  ;;  %4006 = vmatprep.subr.bf16.mxu0 %v5265_v38  ;;  %v5352_v50 = vcombine.low %v803_v21, %v807_v22  ;;  %v5480_v38 = vcombine.low %v931_v23, %v935_v24  ;;  %v5473_v45 = vcombine.high %v923_v36, %v927_v53  ;;  %v783_v57 = vld [vmem:[#allocation8 + $0x228] sm:$0xff] }
 0x19c   :  { %4047 = vmatprep.subr.bf16.mxu1 %v5393_v42  ;;  %v5345_v42 = vcombine.high %v795_v30, %v799_v12  ;;  %v907_v58 = vld [vmem:[#allocation8 + $0x608] sm:$0xff] }
 0x19d   :  { %v1027_v33 = vld [vmem:[#allocation8 + $0x9c8] sm:$0xff] }
 0x19e   :  { %4007 = vmatpush1.bf16.msra.mxu0 %v5264_v49  ;;  %v919_v49 = vld [vmem:[#allocation8 + $0x668] sm:$0xff] }
 0x19f   :  { %4048 = vmatpush1.bf16.msra.mxu1 %v5392_v51  ;;  %4008 = vmatprep.subr.bf16.mxu0 %v5385_v52  ;;  %v5344_v51 = vcombine.low %v795_v30, %v799_v12  ;;  %v5472_v52 = vcombine.low %v923_v36, %v927_v53  ;;  %v5465_v55 = vcombine.high %v915_v48, %v919_v49  ;;  %v1031_v40 = vld [vmem:[#allocation8 + $0x9e8] sm:$0xff] }
 0x1a0   :  { %4049 = vmatprep.subr.bf16.mxu1 %v5513_v54  ;;  %v5337_v54 = vcombine.high %v787_v46, %v791_v47  ;;  %v1155_v63 = vld [vmem:[#allocation8 + $0xdc8] sm:$0xff]  ;;  %v5576_v9 = vcombine.low %v1027_v33, %v1031_v40 }
 0x1a1   :  { %v1019_v7 = vld [vmem:[#allocation8 + $0x988] sm:$0xff] }
 0x1a2   :  { %4009 = vmatpush2.bf16.msra.mxu0 %v5384_v59  ;;  %v911_v59 = vld [vmem:[#allocation8 + $0x628] sm:$0xff] }
 0x1a3   :  { %4050 = vmatpush2.bf16.msra.mxu1 %v5512_v60  ;;  %4010 = vmatprep.subr.bf16.mxu0 %v5377_v61  ;;  %v5336_v60 = vcombine.low %v787_v46, %v791_v47  ;;  %v5464_v61 = vcombine.low %v915_v48, %v919_v49  ;;  %v5457_v62 = vcombine.high %v907_v58, %v911_v59  ;;  %v1023_v8 = vld [vmem:[#allocation8 + $0x9a8] sm:$0xff] }
 0x1a4   :  { %4051 = vmatprep.subr.bf16.mxu1 %v5505_v39  ;;  %v5329_v39 = vcombine.high %v779_v56, %v783_v57  ;;  %v1011_v21 = vld [vmem:[#allocation8 + $0x948] sm:$0xff] }
 0x1a5   :  { %v1015_v22 = vld [vmem:[#allocation8 + $0x968] sm:$0xff] }
 0x1a6   :  { %4011 = vmatpush2.bf16.msra.mxu0 %v5376_v1  ;;  %v1159_v1 = vld [vmem:[#allocation8 + $0xde8] sm:$0xff] }
 0x1a7   :  { %4052 = vmatpush2.bf16.msra.mxu1 %v5504_v3  ;;  %4012 = vmatprep.subr.bf16.mxu0 %v5369_v4  ;;  %v5328_v3 = vcombine.low %v779_v56, %v783_v57  ;;  %v5456_v4 = vcombine.low %v907_v58, %v911_v59  ;;  %v5705_v6 = vcombine.high %v1155_v63, %v1159_v1  ;;  %v1139_v24 = vld [vmem:[#allocation8 + $0xd48] sm:$0xff] }
 0x1a8   :  { %4053 = vmatprep.subr.bf16.mxu1 %v5497_v5  ;;  %v5577_v5 = vcombine.high %v1027_v33, %v1031_v40  ;;  %v1003_v12 = vld [vmem:[#allocation8 + $0x908] sm:$0xff] }
 0x1a9   :  { %v1007_v36 = vld [vmem:[#allocation8 + $0x928] sm:$0xff] }
 0x1aa   :  { %4013 = vmatpush2.bf16.msra.mxu0 %v5368_v10  ;;  %v1147_v10 = vld [vmem:[#allocation8 + $0xd88] sm:$0xff] }
 0x1ab   :  { %4054 = vmatpush2.bf16.msra.mxu1 %v5496_v11  ;;  %4014 = vmatprep.subr.bf16.mxu0 %v5361_v19  ;;  %v1151_v11 = vld [vmem:[#allocation8 + $0xda8] sm:$0xff]  ;;  %v5704_v19 = vcombine.low %v1155_v63, %v1159_v1 }
 0x1ac   :  { %4055 = vmatprep.subr.bf16.mxu1 %v5489_v20  ;;  %v5569_v20 = vcombine.high %v1019_v7, %v1023_v8  ;;  %v5697_v23 = vcombine.high %v1147_v10, %v1151_v11  ;;  %v1131_v53 = vld [vmem:[#allocation8 + $0xd08] sm:$0xff] }
 0x1ad   :  { %v995_v47 = vld [vmem:[#allocation8 + $0x8c8] sm:$0xff] }
 0x1ae   :  { %4015 = vmatpush2.bf16.msra.mxu0 %v5360_v16  ;;  %v1143_v16 = vld [vmem:[#allocation8 + $0xd68] sm:$0xff] }
 0x1af   :  { %4056 = vmatpush2.bf16.msra.mxu1 %v5488_v25  ;;  %4016 = vmatprep.subr.bf16.mxu0 %v5353_v26  ;;  %v5568_v25 = vcombine.low %v1019_v7, %v1023_v8  ;;  %v5696_v26 = vcombine.low %v1147_v10, %v1151_v11  ;;  %v5689_v30 = vcombine.high %v1139_v24, %v1143_v16  ;;  %v999_v48 = vld [vmem:[#allocation8 + $0x8e8] sm:$0xff] }
 0x1b0   :  { %4057 = vmatprep.subr.bf16.mxu1 %v5481_v27  ;;  %v5561_v27 = vcombine.high %v1011_v21, %v1015_v22  ;;  %v1123_v49 = vld [vmem:[#allocation8 + $0xcc8] sm:$0xff] }
 0x1b1   :  { %v987_v57 = vld [vmem:[#allocation8 + $0x888] sm:$0xff] }
 0x1b2   :  { %4017 = vmatpush2.bf16.msra.mxu0 %v5352_v50  ;;  %v1135_v50 = vld [vmem:[#allocation8 + $0xd28] sm:$0xff] }
 0x1b3   :  { %4058 = vmatpush2.bf16.msra.mxu1 %v5480_v38  ;;  %4018 = vmatprep.subr.bf16.mxu0 %v5345_v42  ;;  %v5560_v38 = vcombine.low %v1011_v21, %v1015_v22  ;;  %v5688_v42 = vcombine.low %v1139_v24, %v1143_v16  ;;  %v5681_v46 = vcombine.high %v1131_v53, %v1135_v50  ;;  %v991_v58 = vld [vmem:[#allocation8 + $0x8a8] sm:$0xff] }
 0x1b4   :  { %4059 = vmatprep.subr.bf16.mxu1 %v5473_v45  ;;  %v5553_v45 = vcombine.high %v1003_v12, %v1007_v36  ;;  %v1115_v59 = vld [vmem:[#allocation8 + $0xc88] sm:$0xff] }
 0x1b5   :  { %v979_v40 = vld [vmem:[#allocation8 + $0x848] sm:$0xff] }
 0x1b6   :  { %4019 = vmatpush2.bf16.msra.mxu0 %v5344_v51  ;;  %v1127_v51 = vld [vmem:[#allocation8 + $0xce8] sm:$0xff] }
 0x1b7   :  { %4060 = vmatpush2.bf16.msra.mxu1 %v5472_v52  ;;  %4020 = vmatprep.subr.bf16.mxu0 %v5337_v54  ;;  %v5552_v52 = vcombine.low %v1003_v12, %v1007_v36  ;;  %v5680_v54 = vcombine.low %v1131_v53, %v1135_v50  ;;  %v5673_v56 = vcombine.high %v1123_v49, %v1127_v51  ;;  %v983_v63 = vld [vmem:[#allocation8 + $0x868] sm:$0xff] }
 0x1b8   :  { %4061 = vmatprep.subr.bf16.mxu1 %v5465_v55  ;;  %v5545_v55 = vcombine.high %v995_v47, %v999_v48  ;;  %v1107_v1 = vld [vmem:[#allocation8 + $0xc48] sm:$0xff] }
 0x1b9   :  { %v971_v8 = vld [vmem:[#allocation8 + $0x808] sm:$0xff] }
 0x1ba   :  { %4021 = vmatpush2.bf16.msra.mxu0 %v5336_v60  ;;  %v1119_v60 = vld [vmem:[#allocation8 + $0xca8] sm:$0xff] }
 0x1bb   :  { %4062 = vmatpush2.bf16.msra.mxu1 %v5464_v61  ;;  %4022 = vmatprep.subr.bf16.mxu0 %v5329_v39  ;;  %v5544_v61 = vcombine.low %v995_v47, %v999_v48  ;;  %v5672_v39 = vcombine.low %v1123_v49, %v1127_v51  ;;  %v5665_v33 = vcombine.high %v1115_v59, %v1119_v60  ;;  %v1099_v10 = vld [vmem:[#allocation8 + $0xc08] sm:$0xff] }
 0x1bc   :  { %4063 = vmatprep.subr.bf16.mxu1 %v5457_v62  ;;  %v5537_v62 = vcombine.high %v987_v57, %v991_v58  ;;  %v1103_v11 = vld [vmem:[#allocation8 + $0xc28] sm:$0xff] }
 0x1bd   :  { %v5649_v22 = vcombine.high %v1099_v10, %v1103_v11  ;;  %v1095_v24 = vld [vmem:[#allocation8 + $0xbe8] sm:$0xff] }
 0x1be   :  { %4023 = vmatpush2.bf16.msra.mxu0 %v5328_v3  ;;  %v1111_v3 = vld [vmem:[#allocation8 + $0xc68] sm:$0xff] }
 0x1bf   :  { %4064 = vmatpush2.bf16.msra.mxu1 %v5456_v4  ;;  %4074 = vmatprep.subr.bf16.mxu0 %v5577_v5  ;;  %v5536_v4 = vcombine.low %v987_v57, %v991_v58  ;;  %v5664_v5 = vcombine.low %v1115_v59, %v1119_v60  ;;  %v5657_v7 = vcombine.high %v1107_v1, %v1111_v3  ;;  %v1219_v16 = vld [vmem:[#allocation8 + $0xfc8] sm:$0xff] }
 0x1c0   :  { %4115 = vmatprep.subr.bf16.mxu1 %v5705_v6  ;;  %v5529_v6 = vcombine.high %v979_v40, %v983_v63  ;;  %v1083_v36 = vld [vmem:[#allocation8 + $0xb88] sm:$0xff] }
 0x1c1   :  { %4025 = vmatmul.mubr.bf16.vlgmr.msra.gmra.mxu0 %v6299_v43  ;;  %v1087_v53 = vld [vmem:[#allocation8 + $0xba8] sm:$0xff] }
 0x1c2   :  { %4066 = vmatmul.mubr.bf16.vlgmr.msra.gmra.mxu1 %v6295_v0  ;;  %4075 = vmatpush1.bf16.msra.mxu0 %v5576_v9  ;;  %v975_v9 = vld [vmem:[#allocation8 + $0x828] sm:$0xff] }
 0x1c3   :  { %4106 = vmatprep.mubr.bf16.mxu0 %v6325_v35  ;;  %4116 = vmatpush1.bf16.msra.mxu1 %v5704_v19  ;;  %v5528_v19 = vcombine.low %v979_v40, %v983_v63  ;;  %v5521_v21 = vcombine.high %v971_v8, %v975_v9  ;;  %v1211_v50 = vld [vmem:[#allocation8 + $0xf88] sm:$0xff] }
 0x1c4   :  { %4147 = vmatprep.mubr.bf16.mxu1 %v6327_v2  ;;  %4076 = vmatprep.subr.bf16.mxu0 %v5569_v20  ;;  %v5656_v20 = vcombine.low %v1107_v1, %v1111_v3  ;;  %v1075_v48 = vld [vmem:[#allocation8 + $0xb48] sm:$0xff] }
 0x1c5   :  { %4117 = vmatprep.subr.bf16.mxu1 %v5697_v23  ;;  %v1091_v23 = vld [vmem:[#allocation8 + $0xbc8] sm:$0xff] }
 0x1c6   :  { %4077 = vmatpush1.bf16.msra.mxu0 %v5568_v25  ;;  %v1223_v25 = vld [vmem:[#allocation8 + $0xfe8] sm:$0xff] }
 0x1c7   :  { %4118 = vmatpush1.bf16.msra.mxu1 %v5696_v26  ;;  %4078 = vmatprep.subr.bf16.mxu0 %v5561_v27  ;;  %v5520_v26 = vcombine.low %v971_v8, %v975_v9  ;;  %v5648_v27 = vcombine.low %v1099_v10, %v1103_v11  ;;  %v5769_v12 = vcombine.high %v1219_v16, %v1223_v25  ;;  %v1079_v49 = vld [vmem:[#allocation8 + $0xb68] sm:$0xff] }
 0x1c8   :  { %4119 = vmatprep.subr.bf16.mxu1 %v5689_v30  ;;  %v5641_v30 = vcombine.high %v1091_v23, %v1095_v24  ;;  %v1203_v51 = vld [vmem:[#allocation8 + $0xf48] sm:$0xff] }
 0x1c9   :  { %v1067_v58 = vld [vmem:[#allocation8 + $0xb08] sm:$0xff] }
 0x1ca   :  { %4079 = vmatpush1.bf16.msra.mxu0 %v5560_v38  ;;  %v1215_v38 = vld [vmem:[#allocation8 + $0xfa8] sm:$0xff] }
 0x1cb   :  { %4120 = vmatpush1.bf16.msra.mxu1 %v5688_v42  ;;  %4080 = vmatprep.subr.bf16.mxu0 %v5553_v45  ;;  %v5640_v42 = vcombine.low %v1091_v23, %v1095_v24  ;;  %v5768_v45 = vcombine.low %v1219_v16, %v1223_v25  ;;  %v5761_v47 = vcombine.high %v1211_v50, %v1215_v38  ;;  %v1071_v59 = vld [vmem:[#allocation8 + $0xb28] sm:$0xff] }
 0x1cc   :  { %4121 = vmatprep.subr.bf16.mxu1 %v5681_v46  ;;  %v5633_v46 = vcombine.high %v1083_v36, %v1087_v53  ;;  %v1195_v60 = vld [vmem:[#allocation8 + $0xf08] sm:$0xff] }
 0x1cd   :  { %v1059_v63 = vld [vmem:[#allocation8 + $0xac8] sm:$0xff] }
 0x1ce   :  { %4081 = vmatpush1.bf16.msra.mxu0 %v5552_v52  ;;  %v1207_v52 = vld [vmem:[#allocation8 + $0xf68] sm:$0xff] }
 0x1cf   :  { %4122 = vmatpush1.bf16.msra.mxu1 %v5680_v54  ;;  %4082 = vmatprep.subr.bf16.mxu0 %v5545_v55  ;;  %v5632_v54 = vcombine.low %v1083_v36, %v1087_v53  ;;  %v5760_v55 = vcombine.low %v1211_v50, %v1215_v38  ;;  %v5753_v57 = vcombine.high %v1203_v51, %v1207_v52  ;;  %v1063_v1 = vld [vmem:[#allocation8 + $0xae8] sm:$0xff] }
 0x1d0   :  { %4123 = vmatprep.subr.bf16.mxu1 %v5673_v56  ;;  %v5625_v56 = vcombine.high %v1075_v48, %v1079_v49  ;;  %v1187_v3 = vld [vmem:[#allocation8 + $0xec8] sm:$0xff] }
 0x1d1   :  { %v1051_v9 = vld [vmem:[#allocation8 + $0xa88] sm:$0xff] }
 0x1d2   :  { %4083 = vmatpush1.bf16.msra.mxu0 %v5544_v61  ;;  %v1199_v61 = vld [vmem:[#allocation8 + $0xf28] sm:$0xff] }
 0x1d3   :  { %4124 = vmatpush1.bf16.msra.mxu1 %v5672_v39  ;;  %4084 = vmatprep.subr.bf16.mxu0 %v5537_v62  ;;  %v5624_v39 = vcombine.low %v1075_v48, %v1079_v49  ;;  %v5752_v62 = vcombine.low %v1203_v51, %v1207_v52  ;;  %v5745_v40 = vcombine.high %v1195_v60, %v1199_v61  ;;  %v1055_v10 = vld [vmem:[#allocation8 + $0xaa8] sm:$0xff]  ;;  %v772_v49 = vld [vmem:[#allocation8 + $0x1d0] sm:$0xff] }
 0x1d4   :  { %4125 = vmatprep.subr.bf16.mxu1 %v5665_v33  ;;  %v5617_v33 = vcombine.high %v1067_v58, %v1071_v59  ;;  %v1179_v11 = vld [vmem:[#allocation8 + $0xe88] sm:$0xff]  ;;  %v776_v51 = vld [vmem:[#allocation8 + $0x1f0] sm:$0xff] }
 0x1d5   :  { %v1043_v24 = vld [vmem:[#allocation8 + $0xa48] sm:$0xff]  ;;  %v900_v52 = vld [vmem:[#allocation8 + $0x5d0] sm:$0xff] }
 0x1d6   :  { %4085 = vmatpush1.bf16.msra.mxu0 %v5536_v4  ;;  %v1191_v4 = vld [vmem:[#allocation8 + $0xee8] sm:$0xff] }
 0x1d7   :  { %4126 = vmatpush1.bf16.msra.mxu1 %v5664_v5  ;;  %4086 = vmatprep.subr.bf16.mxu0 %v5529_v6  ;;  %v5616_v5 = vcombine.low %v1067_v58, %v1071_v59  ;;  %v5744_v6 = vcombine.low %v1195_v60, %v1199_v61  ;;  %v5737_v8 = vcombine.high %v1187_v3, %v1191_v4  ;;  %v1047_v16 = vld [vmem:[#allocation8 + $0xa68] sm:$0xff]  ;;  %v6353_v58 = vld [vmem:[#allocation10] sm:$0xff]  ;;  %v764_v60 = vld [vmem:[#allocation8 + $0x190] sm:$0xff] }
 0x1d8   :  { %4127 = vmatprep.subr.bf16.mxu1 %v5657_v7  ;;  %v5609_v7 = vcombine.high %v1059_v63, %v1063_v1  ;;  %v1171_v25 = vld [vmem:[#allocation8 + $0xe48] sm:$0xff]  ;;  %v768_v61 = vld [vmem:[#allocation8 + $0x1b0] sm:$0xff] }
 0x1d9   :  { %v1035_v53 = vld [vmem:[#allocation8 + $0xa08] sm:$0xff] }
 0x1da   :  { %4087 = vmatpush1.bf16.msra.mxu0 %v5528_v19  ;;  %v1183_v19 = vld [vmem:[#allocation8 + $0xea8] sm:$0xff] }
 0x1db   :  { %4128 = vmatpush1.bf16.msra.mxu1 %v5656_v20  ;;  %4088 = vmatprep.subr.bf16.mxu0 %v5521_v21  ;;  %v5608_v20 = vcombine.low %v1059_v63, %v1063_v1  ;;  %v5736_v21 = vcombine.low %v1187_v3, %v1191_v4  ;;  %v5729_v23 = vcombine.high %v1179_v11, %v1183_v19  ;;  %v1039_v50 = vld [vmem:[#allocation8 + $0xa28] sm:$0xff]  ;;  %v756_v4 = vld [vmem:[#allocation8 + $0x150] sm:$0xff] }
 0x1dc   :  { %4129 = vmatprep.subr.bf16.mxu1 %v5649_v22  ;;  %v5601_v22 = vcombine.high %v1051_v9, %v1055_v10  ;;  %v1163_v38 = vld [vmem:[#allocation8 + $0xe08] sm:$0xff]  ;;  %v1235_v1 = vrot.slane %v6353_v58, %v188_v17  ;;  %v5315_v3 = vcombine.high %v764_v60, %v768_v61 }
 0x1de   :  { %4089 = vmatpush1.bf16.msra.mxu0 %v5520_v26  ;;  %v1175_v26 = vld [vmem:[#allocation8 + $0xe68] sm:$0xff] }
 0x1df   :  { %4130 = vmatpush1.bf16.msra.mxu1 %v5648_v27  ;;  %4090 = vmatprep.subr.bf16.mxu0 %v5641_v30  ;;  %v5600_v27 = vcombine.low %v1051_v9, %v1055_v10  ;;  %v5728_v30 = vcombine.low %v1179_v11, %v1183_v19  ;;  %v5721_v36 = vcombine.high %v1171_v25, %v1175_v26  ;;  %v888_v9 = vld [vmem:[#allocation8 + $0x570] sm:$0xff] }
 0x1e0   :  { %4131 = vmatprep.subr.bf16.mxu1 %v5769_v12  ;;  %v5593_v12 = vcombine.high %v1043_v24, %v1047_v16  ;;  %v5314_v11 = vcombine.low %v764_v60, %v768_v61  ;;  %v860_v60 = vld [vmem:[#allocation8 + $0x490] sm:$0xff] }
 0x1e1   :  { %v864_v61 = vld [vmem:[#allocation8 + $0x4b0] sm:$0xff] }
 0x1e2   :  { %4091 = vmatpush2.bf16.msra.mxu0 %v5640_v42  ;;  %v1167_v42 = vld [vmem:[#allocation8 + $0xe28] sm:$0xff] }
 0x1e3   :  { %4132 = vmatpush2.bf16.msra.mxu1 %v5768_v45  ;;  %4092 = vmatprep.subr.bf16.mxu0 %v5633_v46  ;;  %v5592_v45 = vcombine.low %v1043_v24, %v1047_v16  ;;  %v5720_v46 = vcombine.low %v1171_v25, %v1175_v26  ;;  %v5713_v48 = vcombine.high %v1163_v38, %v1167_v42  ;;  %v748_v16 = vld [vmem:[#allocation8 + $0x110] sm:$0xff] }
 0x1e4   :  { %4133 = vmatprep.subr.bf16.mxu1 %v5761_v47  ;;  %v5585_v47 = vcombine.high %v1035_v53, %v1039_v50  ;;  %v752_v25 = vld [vmem:[#allocation8 + $0x130] sm:$0xff] }
 0x1e6   :  { %4093 = vmatpush2.bf16.msra.mxu0 %v5632_v54  ;;  %v904_v54 = vld [vmem:[#allocation8 + $0x5f0] sm:$0xff] }
 0x1e7   :  { %4134 = vmatpush2.bf16.msra.mxu1 %v5760_v55  ;;  %4094 = vmatprep.subr.bf16.mxu0 %v5625_v56  ;;  %v5584_v55 = vcombine.low %v1035_v53, %v1039_v50  ;;  %v5712_v56 = vcombine.low %v1163_v38, %v1167_v42  ;;  %v5451_v59 = vcombine.high %v900_v52, %v904_v54 }
 0x1e8   :  { %4135 = vmatprep.subr.bf16.mxu1 %v5753_v57  ;;  %v5323_v57 = vcombine.high %v772_v49, %v776_v51  ;;  %v5450_v63 = vcombine.low %v900_v52, %v904_v54  ;;  %v5299_v42 = vcombine.high %v748_v16, %v752_v25  ;;  %v5298_v52 = vcombine.low %v748_v16, %v752_v25  ;;  %v964_v16 = vld [vmem:[#allocation8 + $0x7d0] sm:$0xff] }
 0x1e9   :  { %v968_v25 = vld [vmem:[#allocation8 + $0x7f0] sm:$0xff] }
 0x1ea   :  { %4095 = vmatpush2.bf16.msra.mxu0 %v5624_v39  ;;  %v5322_v39 = vcombine.low %v772_v49, %v776_v51  ;;  %v868_v49 = vld [vmem:[#allocation8 + $0x4d0] sm:$0xff] }
 0x1eb   :  { %4136 = vmatpush2.bf16.msra.mxu1 %v5752_v62  ;;  %4096 = vmatprep.subr.bf16.mxu0 %v5617_v33  ;;  %v1231_v62 = vrot.slane %v6353_v58, %v184_v14  ;;  %v892_v33 = vld [vmem:[#allocation8 + $0x590] sm:$0xff] }
 0x1ec   :  { %4137 = vmatprep.subr.bf16.mxu1 %v5745_v40  ;;  %v896_v40 = vld [vmem:[#allocation8 + $0x5b0] sm:$0xff] }
 0x1ed   :  { %v5442_v17 = vcombine.low %v892_v33, %v896_v40  ;;  %v872_v51 = vld [vmem:[#allocation8 + $0x4f0] sm:$0xff] }
 0x1ee   :  { %4097 = vmatpush2.bf16.msra.mxu0 %v5616_v5  ;;  %v760_v5 = vld [vmem:[#allocation8 + $0x170] sm:$0xff] }
 0x1ef   :  { %4138 = vmatpush2.bf16.msra.mxu1 %v5744_v6  ;;  %4098 = vmatprep.subr.bf16.mxu0 %v5609_v7  ;;  %v5443_v7 = vcombine.high %v892_v33, %v896_v40  ;;  %v5306_v53 = vcombine.low %v756_v4, %v760_v5  ;;  %v5411_v40 = vcombine.high %v860_v60, %v864_v61 }
 0x1f0   :  { %4139 = vmatprep.subr.bf16.mxu1 %v5737_v8  ;;  %v884_v8 = vld [vmem:[#allocation8 + $0x550] sm:$0xff] }
 0x1f1   :  { %v5435_v24 = vcombine.high %v884_v8, %v888_v9  ;;  %v5434_v38 = vcombine.low %v884_v8, %v888_v9  ;;  %v716_v9 = vld [vmem:[#allocation8 + $0x10] sm:$0xff] }
 0x1f2   :  { %4099 = vmatpush2.bf16.msra.mxu0 %v5608_v20  ;;  %v5307_v20 = vcombine.high %v756_v4, %v760_v5  ;;  %v856_v4 = vld [vmem:[#allocation8 + $0x470] sm:$0xff] }
 0x1f3   :  { %4140 = vmatpush2.bf16.msra.mxu1 %v5736_v21  ;;  %4100 = vmatprep.subr.bf16.mxu0 %v5601_v22 }
 0x1f4   :  { %4141 = vmatprep.subr.bf16.mxu1 %v5729_v23 }
 0x1f6   :  { %4101 = vmatpush2.bf16.msra.mxu0 %v5600_v27  ;;  %v876_v27 = vld [vmem:[#allocation8 + $0x510] sm:$0xff] }
 0x1f7   :  { %4142 = vmatpush2.bf16.msra.mxu1 %v5728_v30  ;;  %4102 = vmatprep.subr.bf16.mxu0 %v5593_v12  ;;  %v880_v30 = vld [vmem:[#allocation8 + $0x530] sm:$0xff] }
 0x1f8   :  { %4143 = vmatprep.subr.bf16.mxu1 %v5721_v36  ;;  %v5426_v54 = vcombine.low %v876_v27, %v880_v30 }
 0x1fa   :  { %4103 = vmatpush2.bf16.msra.mxu0 %v5592_v45 }
 0x1fb   :  { %4144 = vmatpush2.bf16.msra.mxu1 %v5720_v46  ;;  %4104 = vmatprep.subr.bf16.mxu0 %v5585_v47  ;;  %v5427_v46 = vcombine.high %v876_v27, %v880_v30  ;;  %v740_v47 = vld [vmem:[#allocation8 + $0xd0] sm:$0xff] }
 0x1fc   :  { %4145 = vmatprep.subr.bf16.mxu1 %v5713_v48  ;;  %v744_v48 = vld [vmem:[#allocation8 + $0xf0] sm:$0xff] }
 0x1fe   :  { %4105 = vmatpush2.bf16.msra.mxu0 %v5584_v55  ;;  %v5291_v55 = vcombine.high %v740_v47, %v744_v48 }
 0x1ff   :  { %4146 = vmatpush2.bf16.msra.mxu1 %v5712_v56  ;;  %4156 = vmatprep.subr.bf16.mxu0 %v5323_v57  ;;  %v5419_v56 = vcombine.high %v868_v49, %v872_v51  ;;  %v732_v57 = vld [vmem:[#allocation8 + $0x90] sm:$0xff] }
 0x200   :  { %4197 = vmatprep.subr.bf16.mxu1 %v5451_v59  ;;  %v736_v59 = vld [vmem:[#allocation8 + $0xb0] sm:$0xff] }
 0x201   :  { %4107 = vmatmul.mubr.bf16.vlgmr.msra.gmra.mxu0 %v6343_v37  ;;  %v3862_v6 = vpop.f32.mrf.mxu0  ;;  %v3903_v10 = vpop.f32.mrf.mxu1  ;;  %v5283_v33 = vcombine.high %v732_v57, %v736_v59  ;;  %v5282_v5 = vcombine.low %v732_v57, %v736_v59 }
 0x202   :  { %4148 = vmatmul.mubr.bf16.vlgmr.msra.gmra.mxu1 %v6341_v28  ;;  %v3863_v14 = vadd.f32 %v3862_v6, %v1231_v62  ;;  %4157 = vmatpush1.bf16.msra.mxu0 %v5322_v39  ;;  %v5290_v39 = vcombine.low %v740_v47, %v744_v48  ;;  %v5418_v62 = vcombine.low %v868_v49, %v872_v51  ;;  %v820_v49 = vld [vmem:[#allocation8 + $0x350] sm:$0xff] }
 0x203   :  { %4188 = vmatprep.mubr.bf16.mxu0 %v6297_v41  ;;  %4198 = vmatpush1.bf16.msra.mxu1 %v5450_v63  ;;  %v3864_v19 = vpop.f32.mrf.mxu0  ;;  %v3905_v23 = vpop.f32.mrf.mxu1  ;;  %v724_v63 = vld [vmem:[#allocation8 + $0x50] sm:$0xff]  ;;  %v5410_v6 = vcombine.low %v860_v60, %v864_v61 }
 0x204   :  { %v6364_v21 = vadd.f32 %v3903_v10, %v3863_v14  ;;  %4229 = vmatprep.mubr.bf16.mxu1 %v6301_v44  ;;  %v3865_v22 = vadd.f32 %v3864_v19, %v1235_v1  ;;  %4158 = vmatprep.subr.bf16.mxu0 %v5315_v3  ;;  %v728_v1 = vld [vmem:[#allocation8 + $0x70] sm:$0xff] }
 0x205   :  { %4199 = vmatprep.subr.bf16.mxu1 %v5443_v7  ;;  %v3866_v26 = vpop.f32.mrf.mxu0  ;;  %v3907_v36 = vpop.f32.mrf.mxu1  ;;  %v852_v3 = vld [vmem:[#allocation8 + $0x450] sm:$0xff]  ;;  %v5275_v7 = vcombine.high %v724_v63, %v728_v1  ;;  %v5274_v19 = vcombine.low %v724_v63, %v728_v1 }
 0x206   :  { %v6367_v12 = vadd.f32 %v3905_v23, %v3865_v22  ;;  %4159 = vmatpush1.bf16.msra.mxu0 %v5314_v11  ;;  %v5403_v8 = vcombine.high %v852_v3, %v856_v4  ;;  %v720_v14 = vld [vmem:[#allocation8 + $0x30] sm:$0xff]  ;;  %v5515_v36 = vcombine.high %v964_v16, %v968_v25 }
 0x207   :  { %4200 = vmatpush1.bf16.msra.mxu1 %v5442_v17  ;;  %v3867_v50 = vpop.f32.mrf.mxu0  ;;  %4160 = vmatprep.subr.bf16.mxu0 %v5307_v20  ;;  %v3908_v45 = vpop.f32.mrf.mxu1  ;;  %v844_v10 = vld [vmem:[#allocation8 + $0x410] sm:$0xff]  ;;  %v5402_v17 = vcombine.low %v852_v3, %v856_v4  ;;  %v5267_v20 = vcombine.high %v716_v9, %v720_v14  ;;  %v5266_v26 = vcombine.low %v716_v9, %v720_v14 }
 0x208   :  { %4201 = vmatprep.subr.bf16.mxu1 %v5435_v24  ;;  %v848_v11 = vld [vmem:[#allocation8 + $0x430] sm:$0xff] }
 0x209   :  { %v5395_v22 = vcombine.high %v844_v10, %v848_v11  ;;  %v836_v23 = vld [vmem:[#allocation8 + $0x3d0] sm:$0xff]  ;;  %v5394_v27 = vcombine.low %v844_v10, %v848_v11 }
 0x20a   :  { %4161 = vmatpush1.bf16.msra.mxu0 %v5306_v53  ;;  %v840_v24 = vld [vmem:[#allocation8 + $0x3f0] sm:$0xff] }
 0x20b   :  { %4202 = vmatpush1.bf16.msra.mxu1 %v5434_v38  ;;  %4162 = vmatprep.subr.bf16.mxu0 %v5299_v42  ;;  %v5387_v30 = vcombine.high %v836_v23, %v840_v24  ;;  %v828_v53 = vld [vmem:[#allocation8 + $0x390] sm:$0xff]  ;;  %v5386_v45 = vcombine.low %v836_v23, %v840_v24 }
 0x20c   :  { %4203 = vmatprep.subr.bf16.mxu1 %v5427_v46  ;;  %v832_v50 = vld [vmem:[#allocation8 + $0x3b0] sm:$0xff]  ;;  %v5514_v46 = vcombine.low %v964_v16, %v968_v25 }
 0x20d   :  { %v956_v38 = vld [vmem:[#allocation8 + $0x790] sm:$0xff]  ;;  %v5379_v47 = vcombine.high %v828_v53, %v832_v50 }
 0x20e   :  { %4163 = vmatpush1.bf16.msra.mxu0 %v5298_v52  ;;  %v960_v42 = vld [vmem:[#allocation8 + $0x7b0] sm:$0xff] }
 0x20f   :  { %4204 = vmatpush1.bf16.msra.mxu1 %v5426_v54  ;;  %4164 = vmatprep.subr.bf16.mxu0 %v5291_v55  ;;  %v5507_v48 = vcombine.high %v956_v38, %v960_v42  ;;  %v824_v51 = vld [vmem:[#allocation8 + $0x370] sm:$0xff]  ;;  %v5378_v55 = vcombine.low %v828_v53, %v832_v50 }
 0x210   :  { %4205 = vmatprep.subr.bf16.mxu1 %v5419_v56  ;;  %v948_v52 = vld [vmem:[#allocation8 + $0x750] sm:$0xff]  ;;  %v5506_v56 = vcombine.low %v956_v38, %v960_v42  ;;  %v5371_v57 = vcombine.high %v820_v49, %v824_v51 }
 0x211   :  { %v952_v54 = vld [vmem:[#allocation8 + $0x770] sm:$0xff] }
 0x212   :  { %4165 = vmatpush1.bf16.msra.mxu0 %v5290_v39  ;;  %v5499_v59 = vcombine.high %v948_v52, %v952_v54  ;;  %v812_v60 = vld [vmem:[#allocation8 + $0x310] sm:$0xff] }
 0x213   :  { %4206 = vmatpush1.bf16.msra.mxu1 %v5418_v62  ;;  %4166 = vmatprep.subr.bf16.mxu0 %v5283_v33  ;;  %v816_v61 = vld [vmem:[#allocation8 + $0x330] sm:$0xff]  ;;  %v5370_v33 = vcombine.low %v820_v49, %v824_v51 }
 0x214   :  { %4207 = vmatprep.subr.bf16.mxu1 %v5411_v40  ;;  %v940_v39 = vld [vmem:[#allocation8 + $0x710] sm:$0xff]  ;;  %v5498_v40 = vcombine.low %v948_v52, %v952_v54  ;;  %v5363_v63 = vcombine.high %v812_v60, %v816_v61 }
 0x215   :  { %v944_v62 = vld [vmem:[#allocation8 + $0x730] sm:$0xff] }
 0x216   :  { %4167 = vmatpush1.bf16.msra.mxu0 %v5282_v5  ;;  %v5491_v1 = vcombine.high %v940_v39, %v944_v62  ;;  %v804_v3 = vld [vmem:[#allocation8 + $0x2d0] sm:$0xff] }
 0x217   :  { %4208 = vmatpush1.bf16.msra.mxu1 %v5410_v6  ;;  %4168 = vmatprep.subr.bf16.mxu0 %v5275_v7  ;;  %v808_v4 = vld [vmem:[#allocation8 + $0x2f0] sm:$0xff]  ;;  %v5362_v7 = vcombine.low %v812_v60, %v816_v61 }
 0x218   :  { %4209 = vmatprep.subr.bf16.mxu1 %v5403_v8  ;;  %v932_v5 = vld [vmem:[#allocation8 + $0x6d0] sm:$0xff]  ;;  %v5490_v8 = vcombine.low %v940_v39, %v944_v62  ;;  %v5355_v9 = vcombine.high %v804_v3, %v808_v4 }
 0x219   :  { %v936_v6 = vld [vmem:[#allocation8 + $0x6f0] sm:$0xff] }
 0x21a   :  { %4169 = vmatpush1.bf16.msra.mxu0 %v5274_v19  ;;  %v5483_v14 = vcombine.high %v932_v5, %v936_v6  ;;  %v796_v10 = vld [vmem:[#allocation8 + $0x290] sm:$0xff] }
 0x21b   :  { %4210 = vmatpush1.bf16.msra.mxu1 %v5402_v17  ;;  %4170 = vmatprep.subr.bf16.mxu0 %v5267_v20  ;;  %v800_v11 = vld [vmem:[#allocation8 + $0x2b0] sm:$0xff]  ;;  %v5354_v20 = vcombine.low %v804_v3, %v808_v4 }
 0x21c   :  { %4211 = vmatprep.subr.bf16.mxu1 %v5395_v22  ;;  %v924_v19 = vld [vmem:[#allocation8 + $0x690] sm:$0xff]  ;;  %v5482_v22 = vcombine.low %v932_v5, %v936_v6  ;;  %v5347_v23 = vcombine.high %v796_v10, %v800_v11 }
 0x21d   :  { %v928_v17 = vld [vmem:[#allocation8 + $0x6b0] sm:$0xff] }
 0x21e   :  { %4171 = vmatpush1.bf16.msra.mxu0 %v5266_v26  ;;  %v5475_v24 = vcombine.high %v924_v19, %v928_v17  ;;  %v788_v16 = vld [vmem:[#allocation8 + $0x250] sm:$0xff] }
 0x21f   :  { %4212 = vmatpush1.bf16.msra.mxu1 %v5394_v27  ;;  %4172 = vmatprep.subr.bf16.mxu0 %v5387_v30  ;;  %v792_v25 = vld [vmem:[#allocation8 + $0x270] sm:$0xff]  ;;  %v5346_v30 = vcombine.low %v796_v10, %v800_v11 }
 0x220   :  { %4213 = vmatprep.subr.bf16.mxu1 %v5515_v36  ;;  %v916_v26 = vld [vmem:[#allocation8 + $0x650] sm:$0xff]  ;;  %v5474_v36 = vcombine.low %v924_v19, %v928_v17  ;;  %v5339_v53 = vcombine.high %v788_v16, %v792_v25 }
 0x221   :  { %v920_v27 = vld [vmem:[#allocation8 + $0x670] sm:$0xff] }
 0x222   :  { %4173 = vmatpush2.bf16.msra.mxu0 %v5386_v45  ;;  %v5467_v50 = vcombine.high %v916_v26, %v920_v27  ;;  %v780_v38 = vld [vmem:[#allocation8 + $0x210] sm:$0xff] }
 0x223   :  { %4214 = vmatpush2.bf16.msra.mxu1 %v5514_v46  ;;  %4174 = vmatprep.subr.bf16.mxu0 %v5379_v47  ;;  %v784_v42 = vld [vmem:[#allocation8 + $0x230] sm:$0xff]  ;;  %v5338_v47 = vcombine.low %v788_v16, %v792_v25 }
 0x224   :  { %4215 = vmatprep.subr.bf16.mxu1 %v5507_v48  ;;  %v908_v45 = vld [vmem:[#allocation8 + $0x610] sm:$0xff]  ;;  %v5466_v48 = vcombine.low %v916_v26, %v920_v27  ;;  %v5331_v49 = vcombine.high %v780_v38, %v784_v42 }
 0x225   :  { %v912_v46 = vld [vmem:[#allocation8 + $0x630] sm:$0xff] }
 0x226   :  { %4175 = vmatpush2.bf16.msra.mxu0 %v5378_v55  ;;  %v5459_v51 = vcombine.high %v908_v45, %v912_v46  ;;  %v1028_v52 = vld [vmem:[#allocation8 + $0x9d0] sm:$0xff] }
 0x227   :  { %4216 = vmatpush2.bf16.msra.mxu1 %v5506_v56  ;;  %4176 = vmatprep.subr.bf16.mxu0 %v5371_v57  ;;  %v1032_v54 = vld [vmem:[#allocation8 + $0x9f0] sm:$0xff]  ;;  %v5330_v57 = vcombine.low %v780_v38, %v784_v42 }
 0x228   :  { %4217 = vmatprep.subr.bf16.mxu1 %v5499_v59  ;;  %v1156_v55 = vld [vmem:[#allocation8 + $0xdd0] sm:$0xff]  ;;  %v5458_v59 = vcombine.low %v908_v45, %v912_v46  ;;  %v5579_v60 = vcombine.high %v1028_v52, %v1032_v54 }
 0x229   :  { %v1160_v56 = vld [vmem:[#allocation8 + $0xdf0] sm:$0xff] }
 0x22a   :  { %4177 = vmatpush2.bf16.msra.mxu0 %v5370_v33  ;;  %v5707_v61 = vcombine.high %v1156_v55, %v1160_v56  ;;  %v1020_v39 = vld [vmem:[#allocation8 + $0x990] sm:$0xff]  ;;  %v5578_v33 = vcombine.low %v1028_v52, %v1032_v54 }
 0x22b   :  { %4218 = vmatpush2.bf16.msra.mxu1 %v5498_v40  ;;  %4178 = vmatprep.subr.bf16.mxu0 %v5363_v63  ;;  %v1024_v62 = vld [vmem:[#allocation8 + $0x9b0] sm:$0xff] }
 0x22c   :  { %4219 = vmatprep.subr.bf16.mxu1 %v5491_v1  ;;  %v1148_v40 = vld [vmem:[#allocation8 + $0xd90] sm:$0xff]  ;;  %v5706_v1 = vcombine.low %v1156_v55, %v1160_v56  ;;  %v5571_v3 = vcombine.high %v1020_v39, %v1024_v62  ;;  %v5570_v11 = vcombine.low %v1020_v39, %v1024_v62 }
 0x22d   :  { %v1152_v63 = vld [vmem:[#allocation8 + $0xdb0] sm:$0xff] }
 0x22e   :  { %4179 = vmatpush2.bf16.msra.mxu0 %v5362_v7  ;;  %v1012_v4 = vld [vmem:[#allocation8 + $0x950] sm:$0xff]  ;;  %v5699_v7 = vcombine.high %v1148_v40, %v1152_v63  ;;  %v5698_v17 = vcombine.low %v1148_v40, %v1152_v63 }
 0x22f   :  { %4220 = vmatpush2.bf16.msra.mxu1 %v5490_v8  ;;  %4180 = vmatprep.subr.bf16.mxu0 %v5355_v9  ;;  %v1016_v5 = vld [vmem:[#allocation8 + $0x970] sm:$0xff] }
 0x230   :  { %4221 = vmatprep.subr.bf16.mxu1 %v5483_v14  ;;  %v1140_v8 = vld [vmem:[#allocation8 + $0xd50] sm:$0xff] }
 0x231   :  { %v1144_v9 = vld [vmem:[#allocation8 + $0xd70] sm:$0xff] }
 0x232   :  { %4181 = vmatpush2.bf16.msra.mxu0 %v5354_v20  ;;  %v5563_v20 = vcombine.high %v1012_v4, %v1016_v5  ;;  %v1004_v16 = vld [vmem:[#allocation8 + $0x910] sm:$0xff]  ;;  %v5690_v42 = vcombine.low %v1140_v8, %v1144_v9 }
 0x233   :  { %4222 = vmatpush2.bf16.msra.mxu1 %v5482_v22  ;;  %4182 = vmatprep.subr.bf16.mxu0 %v5347_v23  ;;  %v1008_v25 = vld [vmem:[#allocation8 + $0x930] sm:$0xff] }
 0x234   :  { %4223 = vmatprep.subr.bf16.mxu1 %v5475_v24  ;;  %v1132_v27 = vld [vmem:[#allocation8 + $0xd10] sm:$0xff]  ;;  %v5555_v45 = vcombine.high %v1004_v16, %v1008_v25  ;;  %v5554_v52 = vcombine.low %v1004_v16, %v1008_v25 }
 0x235   :  { %v980_v63 = vld [vmem:[#allocation8 + $0x850] sm:$0xff] }
 0x236   :  { %4183 = vmatpush2.bf16.msra.mxu0 %v5346_v30  ;;  %v1136_v30 = vld [vmem:[#allocation8 + $0xd30] sm:$0xff] }
 0x237   :  { %4224 = vmatpush2.bf16.msra.mxu1 %v5474_v36  ;;  %4184 = vmatprep.subr.bf16.mxu0 %v5339_v53  ;;  %v5683_v46 = vcombine.high %v1132_v27, %v1136_v30  ;;  %v5682_v54 = vcombine.low %v1132_v27, %v1136_v30  ;;  %v1220_v16 = vld [vmem:[#allocation8 + $0xfd0] sm:$0xff] }
 0x238   :  { %4225 = vmatprep.subr.bf16.mxu1 %v5467_v50  ;;  %v5562_v50 = vcombine.low %v1012_v4, %v1016_v5  ;;  %v1112_v4 = vld [vmem:[#allocation8 + $0xc70] sm:$0xff] }
 0x239   :  { %v1224_v25 = vld [vmem:[#allocation8 + $0xff0] sm:$0xff] }
 0x23a   :  { %4185 = vmatpush2.bf16.msra.mxu0 %v5338_v47  ;;  %v996_v47 = vld [vmem:[#allocation8 + $0x8d0] sm:$0xff] }
 0x23b   :  { %4226 = vmatpush2.bf16.msra.mxu1 %v5466_v48  ;;  %4186 = vmatprep.subr.bf16.mxu0 %v5331_v49  ;;  %v1000_v48 = vld [vmem:[#allocation8 + $0x8f0] sm:$0xff] }
 0x23c   :  { %4227 = vmatprep.subr.bf16.mxu1 %v5459_v51  ;;  %v1124_v49 = vld [vmem:[#allocation8 + $0xcd0] sm:$0xff]  ;;  %v5547_v55 = vcombine.high %v996_v47, %v1000_v48  ;;  %v5546_v39 = vcombine.low %v996_v47, %v1000_v48 }
 0x23d   :  { %v1128_v51 = vld [vmem:[#allocation8 + $0xcf0] sm:$0xff] }
 0x23e   :  { %4187 = vmatpush2.bf16.msra.mxu0 %v5330_v57  ;;  %v5675_v56 = vcombine.high %v1124_v49, %v1128_v51  ;;  %v988_v57 = vld [vmem:[#allocation8 + $0x890] sm:$0xff]  ;;  %v5674_v62 = vcombine.low %v1124_v49, %v1128_v51 }
 0x23f   :  { %4228 = vmatpush2.bf16.msra.mxu1 %v5458_v59  ;;  %4238 = vmatprep.subr.bf16.mxu0 %v5579_v60  ;;  %v992_v59 = vld [vmem:[#allocation8 + $0x8b0] sm:$0xff] }
 0x240   :  { %4279 = vmatprep.subr.bf16.mxu1 %v5707_v61  ;;  %v1116_v60 = vld [vmem:[#allocation8 + $0xc90] sm:$0xff]  ;;  %v5538_v5 = vcombine.low %v988_v57, %v992_v59 }
 0x241   :  { %v3944_v6 = vpop.f32.mrf.mxu0  ;;  %4189 = vmatmul.mubr.bf16.vlgmr.msra.gmra.mxu0 %v6299_v43  ;;  %v3985_v10 = vpop.f32.mrf.mxu1  ;;  %v1120_v61 = vld [vmem:[#allocation8 + $0xcb0] sm:$0xff] }
 0x242   :  { %v3945_v14 = vadd.f32 %v3944_v6, %v6364_v21  ;;  %4230 = vmatmul.mubr.bf16.vlgmr.msra.gmra.mxu1 %v6295_v0  ;;  %4239 = vmatpush1.bf16.msra.mxu0 %v5578_v33  ;;  %v5691_v21 = vcombine.high %v1140_v8, %v1144_v9  ;;  %v5539_v33 = vcombine.high %v988_v57, %v992_v59  ;;  %v972_v9 = vld [vmem:[#allocation8 + $0x810] sm:$0xff] }
 0x243   :  { %4270 = vmatprep.mubr.bf16.mxu0 %v6325_v35  ;;  %4280 = vmatpush1.bf16.msra.mxu1 %v5706_v1  ;;  %v3946_v19 = vpop.f32.mrf.mxu0  ;;  %v3987_v24 = vpop.f32.mrf.mxu1  ;;  %v5667_v40 = vcombine.high %v1116_v60, %v1120_v61  ;;  %v984_v1 = vld [vmem:[#allocation8 + $0x870] sm:$0xff]  ;;  %v5666_v6 = vcombine.low %v1116_v60, %v1120_v61 }
 0x244   :  { %v6373_v22 = vadd.f32 %v3985_v10, %v3945_v14  ;;  %4311 = vmatprep.mubr.bf16.mxu1 %v6327_v2  ;;  %v3947_v23 = vadd.f32 %v3946_v19, %v6367_v12  ;;  %4240 = vmatprep.subr.bf16.mxu0 %v5571_v3  ;;  %v1108_v3 = vld [vmem:[#allocation8 + $0xc50] sm:$0xff]  ;;  %v5530_v19 = vcombine.low %v980_v63, %v984_v1 }
 0x245   :  { %v3948_v26 = vpop.f32.mrf.mxu0  ;;  %4281 = vmatprep.subr.bf16.mxu1 %v5699_v7  ;;  %v3989_v53 = vpop.f32.mrf.mxu1  ;;  %v5531_v7 = vcombine.high %v980_v63, %v984_v1  ;;  %v5659_v8 = vcombine.high %v1108_v3, %v1112_v4  ;;  %v976_v14 = vld [vmem:[#allocation8 + $0x830] sm:$0xff] }
 0x246   :  { %v6377_v36 = vadd.f32 %v3987_v24, %v3947_v23  ;;  %4241 = vmatpush1.bf16.msra.mxu0 %v5570_v11  ;;  %v1100_v10 = vld [vmem:[#allocation8 + $0xc10] sm:$0xff]  ;;  %v5522_v26 = vcombine.low %v972_v9, %v976_v14  ;;  %v5771_v53 = vcombine.high %v1220_v16, %v1224_v25 }
 0x247   :  { %4282 = vmatpush1.bf16.msra.mxu1 %v5698_v17  ;;  %v3949_v38 = vpop.f32.mrf.mxu0  ;;  %4242 = vmatprep.subr.bf16.mxu0 %v5563_v20  ;;  %v3990_v12 = vpop.f32.mrf.mxu1  ;;  %v1104_v11 = vld [vmem:[#allocation8 + $0xc30] sm:$0xff]  ;;  %v5658_v17 = vcombine.low %v1108_v3, %v1112_v4  ;;  %v5523_v20 = vcombine.high %v972_v9, %v976_v14 }
 0x248   :  { %4283 = vmatprep.subr.bf16.mxu1 %v5691_v21  ;;  %v5651_v23 = vcombine.high %v1100_v10, %v1104_v11  ;;  %v1092_v24 = vld [vmem:[#allocation8 + $0xbd0] sm:$0xff]  ;;  %v5650_v27 = vcombine.low %v1100_v10, %v1104_v11 }
 0x249   :  { %v1096_v21 = vld [vmem:[#allocation8 + $0xbf0] sm:$0xff] }
 0x24a   :  { %4243 = vmatpush1.bf16.msra.mxu0 %v5562_v50  ;;  %v5643_v30 = vcombine.high %v1092_v24, %v1096_v21  ;;  %v1084_v50 = vld [vmem:[#allocation8 + $0xb90] sm:$0xff]  ;;  %v5642_v12 = vcombine.low %v1092_v24, %v1096_v21 }
 0x24b   :  { %4284 = vmatpush1.bf16.msra.mxu1 %v5690_v42  ;;  %4244 = vmatprep.subr.bf16.mxu0 %v5555_v45  ;;  %v1088_v38 = vld [vmem:[#allocation8 + $0xbb0] sm:$0xff] }
 0x24c   :  { %4285 = vmatprep.subr.bf16.mxu1 %v5683_v46  ;;  %v1212_v42 = vld [vmem:[#allocation8 + $0xf90] sm:$0xff]  ;;  %v5770_v46 = vcombine.low %v1220_v16, %v1224_v25  ;;  %v5635_v47 = vcombine.high %v1084_v50, %v1088_v38 }
 0x24d   :  { %v1216_v45 = vld [vmem:[#allocation8 + $0xfb0] sm:$0xff] }
 0x24e   :  { %4245 = vmatpush1.bf16.msra.mxu0 %v5554_v52  ;;  %v5763_v48 = vcombine.high %v1212_v42, %v1216_v45  ;;  %v1076_v49 = vld [vmem:[#allocation8 + $0xb50] sm:$0xff] }
 0x24f   :  { %4286 = vmatpush1.bf16.msra.mxu1 %v5682_v54  ;;  %4246 = vmatprep.subr.bf16.mxu0 %v5547_v55  ;;  %v1080_v51 = vld [vmem:[#allocation8 + $0xb70] sm:$0xff]  ;;  %v5634_v55 = vcombine.low %v1084_v50, %v1088_v38 }
 0x250   :  { %4287 = vmatprep.subr.bf16.mxu1 %v5675_v56  ;;  %v1204_v52 = vld [vmem:[#allocation8 + $0xf50] sm:$0xff]  ;;  %v5762_v56 = vcombine.low %v1212_v42, %v1216_v45  ;;  %v5627_v57 = vcombine.high %v1076_v49, %v1080_v51 }
 0x251   :  { %v1208_v54 = vld [vmem:[#allocation8 + $0xf70] sm:$0xff] }
 0x252   :  { %4247 = vmatpush1.bf16.msra.mxu0 %v5546_v39  ;;  %v5755_v59 = vcombine.high %v1204_v52, %v1208_v54  ;;  %v1068_v60 = vld [vmem:[#allocation8 + $0xb10] sm:$0xff] }
 0x253   :  { %4288 = vmatpush1.bf16.msra.mxu1 %v5674_v62  ;;  %4248 = vmatprep.subr.bf16.mxu0 %v5539_v33  ;;  %v1072_v61 = vld [vmem:[#allocation8 + $0xb30] sm:$0xff]  ;;  %v5626_v33 = vcombine.low %v1076_v49, %v1080_v51 }
 0x254   :  { %4289 = vmatprep.subr.bf16.mxu1 %v5667_v40  ;;  %v1196_v39 = vld [vmem:[#allocation8 + $0xf10] sm:$0xff]  ;;  %v5754_v40 = vcombine.low %v1204_v52, %v1208_v54  ;;  %v5619_v63 = vcombine.high %v1068_v60, %v1072_v61  ;;  %v773_v52 = vld [vmem:[#allocation8 + $0x1d8] sm:$0xff] }
 0x255   :  { %v1200_v62 = vld [vmem:[#allocation8 + $0xf30] sm:$0xff]  ;;  %v777_v54 = vld [vmem:[#allocation8 + $0x1f8] sm:$0xff] }
 0x256   :  { %4249 = vmatpush1.bf16.msra.mxu0 %v5538_v5  ;;  %v5747_v1 = vcombine.high %v1196_v39, %v1200_v62  ;;  %v1060_v3 = vld [vmem:[#allocation8 + $0xad0] sm:$0xff] }
 0x257   :  { %4290 = vmatpush1.bf16.msra.mxu1 %v5666_v6  ;;  %4250 = vmatprep.subr.bf16.mxu0 %v5531_v7  ;;  %v1064_v4 = vld [vmem:[#allocation8 + $0xaf0] sm:$0xff]  ;;  %v5618_v7 = vcombine.low %v1068_v60, %v1072_v61  ;;  %v5325_v60 = vcombine.high %v773_v52, %v777_v54 }
 0x258   :  { %4291 = vmatprep.subr.bf16.mxu1 %v5659_v8  ;;  %v1188_v5 = vld [vmem:[#allocation8 + $0xed0] sm:$0xff]  ;;  %v5746_v8 = vcombine.low %v1196_v39, %v1200_v62  ;;  %v5611_v9 = vcombine.high %v1060_v3, %v1064_v4  ;;  %v765_v39 = vld [vmem:[#allocation8 + $0x198] sm:$0xff] }
 0x259   :  { %v1192_v6 = vld [vmem:[#allocation8 + $0xef0] sm:$0xff]  ;;  %v769_v62 = vld [vmem:[#allocation8 + $0x1b8] sm:$0xff] }
 0x25a   :  { %4251 = vmatpush1.bf16.msra.mxu0 %v5530_v19  ;;  %v5739_v14 = vcombine.high %v1188_v5, %v1192_v6  ;;  %v1052_v10 = vld [vmem:[#allocation8 + $0xa90] sm:$0xff] }
 0x25b   :  { %4292 = vmatpush1.bf16.msra.mxu1 %v5658_v17  ;;  %4252 = vmatprep.subr.bf16.mxu0 %v5523_v20  ;;  %v1056_v11 = vld [vmem:[#allocation8 + $0xab0] sm:$0xff]  ;;  %v5610_v20 = vcombine.low %v1060_v3, %v1064_v4  ;;  %v1243_v4 = vrot.slane %v6353_v58, %v196_v18 }
 0x25c   :  { %4293 = vmatprep.subr.bf16.mxu1 %v5651_v23  ;;  %v1180_v19 = vld [vmem:[#allocation8 + $0xe90] sm:$0xff]  ;;  %v5738_v23 = vcombine.low %v1188_v5, %v1192_v6  ;;  %v5603_v24 = vcombine.high %v1052_v10, %v1056_v11  ;;  %v5317_v5 = vcombine.high %v765_v39, %v769_v62  ;;  %v757_v6 = vld [vmem:[#allocation8 + $0x158] sm:$0xff] }
 0x25d   :  { %v1184_v17 = vld [vmem:[#allocation8 + $0xeb0] sm:$0xff] }
 0x25e   :  { %4253 = vmatpush1.bf16.msra.mxu0 %v5522_v26  ;;  %v5731_v21 = vcombine.high %v1180_v19, %v1184_v17  ;;  %v1044_v16 = vld [vmem:[#allocation8 + $0xa50] sm:$0xff] }
 0x25f   :  { %4294 = vmatpush1.bf16.msra.mxu1 %v5650_v27  ;;  %4254 = vmatprep.subr.bf16.mxu0 %v5643_v30  ;;  %v1048_v25 = vld [vmem:[#allocation8 + $0xa70] sm:$0xff]  ;;  %v5602_v30 = vcombine.low %v1052_v10, %v1056_v11 }
 0x260   :  { %4295 = vmatprep.subr.bf16.mxu1 %v5771_v53  ;;  %v1172_v26 = vld [vmem:[#allocation8 + $0xe50] sm:$0xff]  ;;  %v5730_v53 = vcombine.low %v1180_v19, %v1184_v17  ;;  %v5595_v50 = vcombine.high %v1044_v16, %v1048_v25  ;;  %v5316_v19 = vcombine.low %v765_v39, %v769_v62 }
 0x261   :  { %v1176_v27 = vld [vmem:[#allocation8 + $0xe70] sm:$0xff] }
 0x262   :  { %4255 = vmatpush2.bf16.msra.mxu0 %v5642_v12  ;;  %v5723_v38 = vcombine.high %v1172_v26, %v1176_v27  ;;  %v1036_v42 = vld [vmem:[#allocation8 + $0xa10] sm:$0xff] }
 0x263   :  { %4296 = vmatpush2.bf16.msra.mxu1 %v5770_v46  ;;  %4256 = vmatprep.subr.bf16.mxu0 %v5635_v47  ;;  %v1040_v45 = vld [vmem:[#allocation8 + $0xa30] sm:$0xff]  ;;  %v5594_v47 = vcombine.low %v1044_v16, %v1048_v25  ;;  %v749_v16 = vld [vmem:[#allocation8 + $0x118] sm:$0xff] }
 0x264   :  { %4297 = vmatprep.subr.bf16.mxu1 %v5763_v48  ;;  %v1164_v12 = vld [vmem:[#allocation8 + $0xe10] sm:$0xff]  ;;  %v5722_v48 = vcombine.low %v1172_v26, %v1176_v27  ;;  %v5587_v49 = vcombine.high %v1036_v42, %v1040_v45  ;;  %v753_v25 = vld [vmem:[#allocation8 + $0x138] sm:$0xff] }
 0x265   :  { %v1168_v46 = vld [vmem:[#allocation8 + $0xe30] sm:$0xff]  ;;  %v877_v27 = vld [vmem:[#allocation8 + $0x518] sm:$0xff] }
 0x266   :  { %4257 = vmatpush2.bf16.msra.mxu0 %v5634_v55  ;;  %v5715_v51 = vcombine.high %v1164_v12, %v1168_v46  ;;  %v901_v55 = vld [vmem:[#allocation8 + $0x5d8] sm:$0xff] }
 0x267   :  { %4298 = vmatpush2.bf16.msra.mxu1 %v5762_v56  ;;  %4258 = vmatprep.subr.bf16.mxu0 %v5627_v57  ;;  %v905_v56 = vld [vmem:[#allocation8 + $0x5f8] sm:$0xff]  ;;  %v5586_v57 = vcombine.low %v1036_v42, %v1040_v45 }
 0x268   :  { %4299 = vmatprep.subr.bf16.mxu1 %v5755_v59  ;;  %v5714_v59 = vcombine.low %v1164_v12, %v1168_v46  ;;  %v5453_v61 = vcombine.high %v901_v55, %v905_v56  ;;  %v5452_v3 = vcombine.low %v901_v55, %v905_v56  ;;  %v741_v46 = vld [vmem:[#allocation8 + $0xd8] sm:$0xff] }
 0x269   :  { %v733_v56 = vld [vmem:[#allocation8 + $0x98] sm:$0xff] }
 0x26a   :  { %4259 = vmatpush2.bf16.msra.mxu0 %v5626_v33  ;;  %v1239_v33 = vrot.slane %v6353_v58, %v192_v15  ;;  %v889_v15 = vld [vmem:[#allocation8 + $0x578] sm:$0xff] }
 0x26b   :  { %4300 = vmatpush2.bf16.msra.mxu1 %v5754_v40  ;;  %4260 = vmatprep.subr.bf16.mxu0 %v5619_v63  ;;  %v5324_v40 = vcombine.low %v773_v52, %v777_v54  ;;  %v893_v63 = vld [vmem:[#allocation8 + $0x598] sm:$0xff] }
 0x26c   :  { %4301 = vmatprep.subr.bf16.mxu1 %v5747_v1  ;;  %v897_v1 = vld [vmem:[#allocation8 + $0x5b8] sm:$0xff] }
 0x26d   :  { %v5444_v18 = vcombine.low %v893_v63, %v897_v1 }
 0x26e   :  { %4261 = vmatpush2.bf16.msra.mxu0 %v5618_v7  ;;  %v761_v7 = vld [vmem:[#allocation8 + $0x178] sm:$0xff] }
 0x26f   :  { %4302 = vmatpush2.bf16.msra.mxu1 %v5746_v8  ;;  %4262 = vmatprep.subr.bf16.mxu0 %v5611_v9  ;;  %v5445_v9 = vcombine.high %v893_v63, %v897_v1  ;;  %v5309_v58 = vcombine.high %v757_v6, %v761_v7  ;;  %v729_v63 = vld [vmem:[#allocation8 + $0x78] sm:$0xff] }
 0x270   :  { %4303 = vmatprep.subr.bf16.mxu1 %v5739_v14  ;;  %v885_v14 = vld [vmem:[#allocation8 + $0x558] sm:$0xff] }
 0x271   :  { %v5436_v42 = vcombine.low %v885_v14, %v889_v15  ;;  %v853_v1 = vld [vmem:[#allocation8 + $0x458] sm:$0xff] }
 0x272   :  { %4263 = vmatpush2.bf16.msra.mxu0 %v5610_v20 }
 0x273   :  { %4304 = vmatpush2.bf16.msra.mxu1 %v5738_v23  ;;  %4264 = vmatprep.subr.bf16.mxu0 %v5603_v24 }
 0x274   :  { %4305 = vmatprep.subr.bf16.mxu1 %v5731_v21  ;;  %v5437_v21 = vcombine.high %v885_v14, %v889_v15  ;;  %v845_v14 = vld [vmem:[#allocation8 + $0x418] sm:$0xff] }
 0x275   :  { %v849_v15 = vld [vmem:[#allocation8 + $0x438] sm:$0xff] }
 0x276   :  { %4265 = vmatpush2.bf16.msra.mxu0 %v5602_v30  ;;  %v881_v30 = vld [vmem:[#allocation8 + $0x538] sm:$0xff] }
 0x277   :  { %4306 = vmatpush2.bf16.msra.mxu1 %v5730_v53  ;;  %4266 = vmatprep.subr.bf16.mxu0 %v5595_v50  ;;  %v5308_v50 = vcombine.low %v757_v6, %v761_v7  ;;  %v5429_v12 = vcombine.high %v877_v27, %v881_v30  ;;  %v5428_v52 = vcombine.low %v877_v27, %v881_v30  ;;  %v829_v27 = vld [vmem:[#allocation8 + $0x398] sm:$0xff] }
 0x278   :  { %4307 = vmatprep.subr.bf16.mxu1 %v5723_v38  ;;  %v833_v30 = vld [vmem:[#allocation8 + $0x3b8] sm:$0xff] }
 0x27a   :  { %4267 = vmatpush2.bf16.msra.mxu0 %v5594_v47  ;;  %v745_v47 = vld [vmem:[#allocation8 + $0xf8] sm:$0xff] }
 0x27b   :  { %4308 = vmatpush2.bf16.msra.mxu1 %v5722_v48  ;;  %4268 = vmatprep.subr.bf16.mxu0 %v5587_v49  ;;  %v869_v48 = vld [vmem:[#allocation8 + $0x4d8] sm:$0xff]  ;;  %v5293_v54 = vcombine.high %v741_v46, %v745_v47 }
 0x27c   :  { %4309 = vmatprep.subr.bf16.mxu1 %v5715_v51  ;;  %v873_v49 = vld [vmem:[#allocation8 + $0x4f8] sm:$0xff]  ;;  %v5300_v51 = vcombine.low %v749_v16, %v753_v25 }
 0x27d   :  { %v5421_v55 = vcombine.high %v869_v48, %v873_v49  ;;  %v5420_v39 = vcombine.low %v869_v48, %v873_v49  ;;  %v953_v48 = vld [vmem:[#allocation8 + $0x778] sm:$0xff]  ;;  %v5380_v49 = vcombine.low %v829_v27, %v833_v30 }
 0x27e   :  { %4269 = vmatpush2.bf16.msra.mxu0 %v5586_v57  ;;  %v737_v57 = vld [vmem:[#allocation8 + $0xb8] sm:$0xff] }
 0x27f   :  { %4310 = vmatpush2.bf16.msra.mxu1 %v5714_v59  ;;  %4320 = vmatprep.subr.bf16.mxu0 %v5325_v60  ;;  %v861_v59 = vld [vmem:[#allocation8 + $0x498] sm:$0xff]  ;;  %v5285_v62 = vcombine.high %v733_v56, %v737_v57 }
 0x280   :  { %4361 = vmatprep.subr.bf16.mxu1 %v5453_v61  ;;  %v865_v60 = vld [vmem:[#allocation8 + $0x4b8] sm:$0xff]  ;;  %v5292_v61 = vcombine.low %v741_v46, %v745_v47 }
 0x281   :  { %v4026_v8 = vpop.f32.mrf.mxu0  ;;  %4271 = vmatmul.mubr.bf16.vlgmr.msra.gmra.mxu0 %v6343_v37  ;;  %v825_v46 = vld [vmem:[#allocation8 + $0x378] sm:$0xff] }
 0x282   :  { %v4027_v10 = vadd.f32 %v4026_v8, %v1239_v33  ;;  %v4067_v11 = vpop.f32.mrf.mxu1  ;;  %4312 = vmatmul.mubr.bf16.vlgmr.msra.gmra.mxu1 %v6341_v28  ;;  %4321 = vmatpush1.bf16.msra.mxu0 %v5324_v40  ;;  %v5413_v33 = vcombine.high %v861_v59, %v865_v60  ;;  %v725_v40 = vld [vmem:[#allocation8 + $0x58] sm:$0xff] }
 0x283   :  { %4352 = vmatprep.mubr.bf16.mxu0 %v6297_v41  ;;  %4362 = vmatpush1.bf16.msra.mxu1 %v5452_v3  ;;  %v4028_v17 = vpop.f32.mrf.mxu0  ;;  %v857_v3 = vld [vmem:[#allocation8 + $0x478] sm:$0xff]  ;;  %v5277_v6 = vcombine.high %v725_v40, %v729_v63 }
 0x284   :  { %v6388_v20 = vadd.f32 %v4067_v11, %v4027_v10  ;;  %4393 = vmatprep.mubr.bf16.mxu1 %v6301_v44  ;;  %v4029_v23 = vadd.f32 %v4028_v17, %v1243_v4  ;;  %v4069_v24 = vpop.f32.mrf.mxu1  ;;  %4322 = vmatprep.subr.bf16.mxu0 %v5317_v5  ;;  %v5301_v44 = vcombine.high %v749_v16, %v753_v25  ;;  %v717_v8 = vld [vmem:[#allocation8 + $0x18] sm:$0xff] }
 0x285   :  { %v4030_v26 = vpop.f32.mrf.mxu0  ;;  %4363 = vmatprep.subr.bf16.mxu1 %v5445_v9  ;;  %v5284_v4 = vcombine.low %v733_v56, %v737_v57  ;;  %v5412_v5 = vcombine.low %v861_v59, %v865_v60  ;;  %v5405_v7 = vcombine.high %v853_v1, %v857_v3  ;;  %v721_v9 = vld [vmem:[#allocation8 + $0x38] sm:$0xff]  ;;  %v5276_v10 = vcombine.low %v725_v40, %v729_v63 }
 0x286   :  { %v6391_v53 = vadd.f32 %v4069_v24, %v4029_v23  ;;  %v4071_v41 = vpop.f32.mrf.mxu1  ;;  %4323 = vmatpush1.bf16.msra.mxu0 %v5316_v19  ;;  %v5404_v11 = vcombine.low %v853_v1, %v857_v3  ;;  %v5269_v19 = vcombine.high %v717_v8, %v721_v9  ;;  %v5397_v17 = vcombine.high %v845_v14, %v849_v15  ;;  %v965_v23 = vld [vmem:[#allocation8 + $0x7d8] sm:$0xff] }
 0x287   :  { %4364 = vmatpush1.bf16.msra.mxu1 %v5444_v18  ;;  %v4031_v38 = vpop.f32.mrf.mxu0  ;;  %4324 = vmatprep.subr.bf16.mxu0 %v5309_v58  ;;  %v837_v18 = vld [vmem:[#allocation8 + $0x3d8] sm:$0xff]  ;;  %v5396_v16 = vcombine.low %v845_v14, %v849_v15 }
 0x288   :  { %v4072_v45 = vpop.f32.mrf.mxu1  ;;  %4365 = vmatprep.subr.bf16.mxu1 %v5437_v21  ;;  %v841_v58 = vld [vmem:[#allocation8 + $0x3f8] sm:$0xff]  ;;  %v5268_v21 = vcombine.low %v717_v8, %v721_v9 }
 0x289   :  { %v969_v24 = vld [vmem:[#allocation8 + $0x7f8] sm:$0xff]  ;;  %v5389_v25 = vcombine.high %v837_v18, %v841_v58  ;;  %v5388_v38 = vcombine.low %v837_v18, %v841_v58 }
 0x28a   :  { %4325 = vmatpush1.bf16.msra.mxu0 %v5308_v50  ;;  %v5517_v26 = vcombine.high %v965_v23, %v969_v24  ;;  %v957_v41 = vld [vmem:[#allocation8 + $0x798] sm:$0xff] }
 0x28b   :  { %4366 = vmatpush1.bf16.msra.mxu1 %v5436_v42  ;;  %4326 = vmatprep.subr.bf16.mxu0 %v5301_v44  ;;  %v961_v50 = vld [vmem:[#allocation8 + $0x7b8] sm:$0xff]  ;;  %v5516_v42 = vcombine.low %v965_v23, %v969_v24  ;;  %v5381_v44 = vcombine.high %v829_v27, %v833_v30 }
 0x28c   :  { %4367 = vmatprep.subr.bf16.mxu1 %v5429_v12  ;;  %v5509_v45 = vcombine.high %v957_v41, %v961_v50  ;;  %v821_v12 = vld [vmem:[#allocation8 + $0x358] sm:$0xff] }
 0x28d   :  { %v949_v47 = vld [vmem:[#allocation8 + $0x758] sm:$0xff]  ;;  %v5372_v60 = vcombine.low %v821_v12, %v825_v46 }
 0x28e   :  { %4327 = vmatpush1.bf16.msra.mxu0 %v5300_v51  ;;  %v5508_v51 = vcombine.low %v957_v41, %v961_v50  ;;  %v817_v56 = vld [vmem:[#allocation8 + $0x338] sm:$0xff] }
 0x28f   :  { %4368 = vmatpush1.bf16.msra.mxu1 %v5428_v52  ;;  %4328 = vmatprep.subr.bf16.mxu0 %v5293_v54  ;;  %v5373_v52 = vcombine.high %v821_v12, %v825_v46  ;;  %v5501_v54 = vcombine.high %v949_v47, %v953_v48  ;;  %v941_v57 = vld [vmem:[#allocation8 + $0x718] sm:$0xff] }
 0x290   :  { %4369 = vmatprep.subr.bf16.mxu1 %v5421_v55  ;;  %v813_v55 = vld [vmem:[#allocation8 + $0x318] sm:$0xff] }
 0x291   :  { %v945_v59 = vld [vmem:[#allocation8 + $0x738] sm:$0xff]  ;;  %v5364_v3 = vcombine.low %v813_v55, %v817_v56 }
 0x292   :  { %4329 = vmatpush1.bf16.msra.mxu0 %v5292_v61  ;;  %v5500_v61 = vcombine.low %v949_v47, %v953_v48  ;;  %v809_v40 = vld [vmem:[#allocation8 + $0x2f8] sm:$0xff] }
 0x293   :  { %4370 = vmatpush1.bf16.msra.mxu1 %v5420_v39  ;;  %4330 = vmatprep.subr.bf16.mxu0 %v5285_v62  ;;  %v5365_v39 = vcombine.high %v813_v55, %v817_v56  ;;  %v5493_v62 = vcombine.high %v941_v57, %v945_v59  ;;  %v933_v63 = vld [vmem:[#allocation8 + $0x6d8] sm:$0xff] }
 0x294   :  { %4371 = vmatprep.subr.bf16.mxu1 %v5413_v33  ;;  %v805_v33 = vld [vmem:[#allocation8 + $0x2d8] sm:$0xff] }
 0x295   :  { %v937_v1 = vld [vmem:[#allocation8 + $0x6f8] sm:$0xff]  ;;  %v5356_v15 = vcombine.low %v805_v33, %v809_v40 }
 0x296   :  { %4331 = vmatpush1.bf16.msra.mxu0 %v5284_v4  ;;  %v5492_v4 = vcombine.low %v941_v57, %v945_v59  ;;  %v801_v8 = vld [vmem:[#allocation8 + $0x2b8] sm:$0xff] }
 0x297   :  { %4372 = vmatpush1.bf16.msra.mxu1 %v5412_v5  ;;  %4332 = vmatprep.subr.bf16.mxu0 %v5277_v6  ;;  %v5357_v5 = vcombine.high %v805_v33, %v809_v40  ;;  %v5485_v6 = vcombine.high %v933_v63, %v937_v1  ;;  %v925_v9 = vld [vmem:[#allocation8 + $0x698] sm:$0xff] }
 0x298   :  { %4373 = vmatprep.subr.bf16.mxu1 %v5405_v7  ;;  %v797_v7 = vld [vmem:[#allocation8 + $0x298] sm:$0xff] }
 0x299   :  { %v929_v14 = vld [vmem:[#allocation8 + $0x6b8] sm:$0xff]  ;;  %v5348_v24 = vcombine.low %v797_v7, %v801_v8 }
 0x29a   :  { %4333 = vmatpush1.bf16.msra.mxu0 %v5276_v10  ;;  %v5484_v10 = vcombine.low %v933_v63, %v937_v1  ;;  %v793_v18 = vld [vmem:[#allocation8 + $0x278] sm:$0xff] }
 0x29b   :  { %4374 = vmatpush1.bf16.msra.mxu1 %v5404_v11  ;;  %4334 = vmatprep.subr.bf16.mxu0 %v5269_v19  ;;  %v5349_v11 = vcombine.high %v797_v7, %v801_v8  ;;  %v5477_v19 = vcombine.high %v925_v9, %v929_v14  ;;  %v917_v58 = vld [vmem:[#allocation8 + $0x658] sm:$0xff] }
 0x29c   :  { %4375 = vmatprep.subr.bf16.mxu1 %v5397_v17  ;;  %v789_v17 = vld [vmem:[#allocation8 + $0x258] sm:$0xff] }
 0x29d   :  { %v921_v23 = vld [vmem:[#allocation8 + $0x678] sm:$0xff]  ;;  %v5340_v50 = vcombine.low %v789_v17, %v793_v18 }
 0x29e   :  { %4335 = vmatpush1.bf16.msra.mxu0 %v5268_v21  ;;  %v5476_v21 = vcombine.low %v925_v9, %v929_v14  ;;  %v785_v27 = vld [vmem:[#allocation8 + $0x238] sm:$0xff] }
 0x29f   :  { %4376 = vmatpush1.bf16.msra.mxu1 %v5396_v16  ;;  %4336 = vmatprep.subr.bf16.mxu0 %v5389_v25  ;;  %v5341_v16 = vcombine.high %v789_v17, %v793_v18  ;;  %v5469_v25 = vcombine.high %v917_v58, %v921_v23  ;;  %v909_v30 = vld [vmem:[#allocation8 + $0x618] sm:$0xff] }
 0x2a0   :  { %4377 = vmatprep.subr.bf16.mxu1 %v5517_v26  ;;  %v781_v26 = vld [vmem:[#allocation8 + $0x218] sm:$0xff] }
 0x2a1   :  { %v913_v41 = vld [vmem:[#allocation8 + $0x638] sm:$0xff]  ;;  %v5332_v48 = vcombine.low %v781_v26, %v785_v27 }
 0x2a2   :  { %4337 = vmatpush2.bf16.msra.mxu0 %v5388_v38  ;;  %v5468_v38 = vcombine.low %v917_v58, %v921_v23  ;;  %v1033_v12 = vld [vmem:[#allocation8 + $0x9f8] sm:$0xff] }
 0x2a3   :  { %4378 = vmatpush2.bf16.msra.mxu1 %v5516_v42  ;;  %4338 = vmatprep.subr.bf16.mxu0 %v5381_v44  ;;  %v5333_v42 = vcombine.high %v781_v26, %v785_v27  ;;  %v5461_v44 = vcombine.high %v909_v30, %v913_v41  ;;  %v1157_v46 = vld [vmem:[#allocation8 + $0xdd8] sm:$0xff] }
 0x2a4   :  { %4379 = vmatprep.subr.bf16.mxu1 %v5509_v45  ;;  %v1029_v45 = vld [vmem:[#allocation8 + $0x9d8] sm:$0xff] }
 0x2a5   :  { %v1161_v47 = vld [vmem:[#allocation8 + $0xdf8] sm:$0xff]  ;;  %v5580_v56 = vcombine.low %v1029_v45, %v1033_v12 }
 0x2a6   :  { %4339 = vmatpush2.bf16.msra.mxu0 %v5380_v49  ;;  %v5460_v49 = vcombine.low %v909_v30, %v913_v41  ;;  %v1025_v55 = vld [vmem:[#allocation8 + $0x9b8] sm:$0xff] }
 0x2a7   :  { %4380 = vmatpush2.bf16.msra.mxu1 %v5508_v51  ;;  %4340 = vmatprep.subr.bf16.mxu0 %v5373_v52  ;;  %v5581_v51 = vcombine.high %v1029_v45, %v1033_v12  ;;  %v5709_v52 = vcombine.high %v1157_v46, %v1161_v47  ;;  %v1149_v57 = vld [vmem:[#allocation8 + $0xd98] sm:$0xff] }
 0x2a8   :  { %4381 = vmatprep.subr.bf16.mxu1 %v5501_v54  ;;  %v1021_v54 = vld [vmem:[#allocation8 + $0x998] sm:$0xff] }
 0x2a9   :  { %v1153_v59 = vld [vmem:[#allocation8 + $0xdb8] sm:$0xff] }
 0x2aa   :  { %4341 = vmatpush2.bf16.msra.mxu0 %v5372_v60  ;;  %v5708_v60 = vcombine.low %v1157_v46, %v1161_v47  ;;  %v5701_v40 = vcombine.high %v1149_v57, %v1153_v59  ;;  %v1141_v63 = vld [vmem:[#allocation8 + $0xd58] sm:$0xff]  ;;  %v5700_v7 = vcombine.low %v1149_v57, %v1153_v59 }
 0x2ab   :  { %4382 = vmatpush2.bf16.msra.mxu1 %v5500_v61  ;;  %4342 = vmatprep.subr.bf16.mxu0 %v5365_v39  ;;  %v5573_v61 = vcombine.high %v1021_v54, %v1025_v55  ;;  %v1013_v39 = vld [vmem:[#allocation8 + $0x958] sm:$0xff] }
 0x2ac   :  { %4383 = vmatprep.subr.bf16.mxu1 %v5493_v62  ;;  %v1017_v62 = vld [vmem:[#allocation8 + $0x978] sm:$0xff] }
 0x2ad   :  { %v1145_v1 = vld [vmem:[#allocation8 + $0xd78] sm:$0xff]  ;;  %v5565_v8 = vcombine.high %v1013_v39, %v1017_v62 }
 0x2ae   :  { %4343 = vmatpush2.bf16.msra.mxu0 %v5364_v3  ;;  %v1005_v14 = vld [vmem:[#allocation8 + $0x918] sm:$0xff]  ;;  %v5692_v18 = vcombine.low %v1141_v63, %v1145_v1 }
 0x2af   :  { %4384 = vmatpush2.bf16.msra.mxu1 %v5492_v4  ;;  %4344 = vmatprep.subr.bf16.mxu0 %v5357_v5  ;;  %v5572_v5 = vcombine.low %v1021_v54, %v1025_v55  ;;  %v973_v59 = vld [vmem:[#allocation8 + $0x818] sm:$0xff] }
 0x2b0   :  { %4385 = vmatprep.subr.bf16.mxu1 %v5485_v6 }
 0x2b2   :  { %4345 = vmatpush2.bf16.msra.mxu0 %v5356_v15  ;;  %v1009_v15 = vld [vmem:[#allocation8 + $0x938] sm:$0xff] }
 0x2b3   :  { %4386 = vmatpush2.bf16.msra.mxu1 %v5484_v10  ;;  %4346 = vmatprep.subr.bf16.mxu0 %v5349_v11  ;;  %v1133_v10 = vld [vmem:[#allocation8 + $0xd18] sm:$0xff]  ;;  %v5557_v58 = vcombine.high %v1005_v14, %v1009_v15  ;;  %v5556_v26 = vcombine.low %v1005_v14, %v1009_v15 }
 0x2b4   :  { %4387 = vmatprep.subr.bf16.mxu1 %v5477_v19  ;;  %v1137_v11 = vld [vmem:[#allocation8 + $0xd38] sm:$0xff]  ;;  %v5564_v19 = vcombine.low %v1013_v39, %v1017_v62 }
 0x2b5   :  { %v5684_v27 = vcombine.low %v1133_v10, %v1137_v11  ;;  %v1105_v39 = vld [vmem:[#allocation8 + $0xc38] sm:$0xff] }
 0x2b6   :  { %4347 = vmatpush2.bf16.msra.mxu0 %v5348_v24  ;;  %v997_v24 = vld [vmem:[#allocation8 + $0x8d8] sm:$0xff] }
 0x2b7   :  { %4388 = vmatpush2.bf16.msra.mxu1 %v5476_v21  ;;  %4348 = vmatprep.subr.bf16.mxu0 %v5341_v16  ;;  %v1001_v21 = vld [vmem:[#allocation8 + $0x8f8] sm:$0xff] }
 0x2b8   :  { %4389 = vmatprep.subr.bf16.mxu1 %v5469_v25  ;;  %v1125_v16 = vld [vmem:[#allocation8 + $0xcd8] sm:$0xff]  ;;  %v5549_v30 = vcombine.high %v997_v24, %v1001_v21  ;;  %v5548_v45 = vcombine.low %v997_v24, %v1001_v21 }
 0x2b9   :  { %v1129_v25 = vld [vmem:[#allocation8 + $0xcf8] sm:$0xff] }
 0x2ba   :  { %4349 = vmatpush2.bf16.msra.mxu0 %v5340_v50  ;;  %v5677_v41 = vcombine.high %v1125_v16, %v1129_v25  ;;  %v989_v50 = vld [vmem:[#allocation8 + $0x898] sm:$0xff]  ;;  %v5676_v12 = vcombine.low %v1125_v16, %v1129_v25 }
 0x2bb   :  { %4390 = vmatpush2.bf16.msra.mxu1 %v5468_v38  ;;  %4350 = vmatprep.subr.bf16.mxu0 %v5333_v42  ;;  %v993_v38 = vld [vmem:[#allocation8 + $0x8b8] sm:$0xff] }
 0x2bc   :  { %4391 = vmatprep.subr.bf16.mxu1 %v5461_v44  ;;  %v1117_v42 = vld [vmem:[#allocation8 + $0xc98] sm:$0xff]  ;;  %v5541_v46 = vcombine.high %v989_v50, %v993_v38  ;;  %v5540_v54 = vcombine.low %v989_v50, %v993_v38 }
 0x2bd   :  { %v1121_v44 = vld [vmem:[#allocation8 + $0xcb8] sm:$0xff] }
 0x2be   :  { %4351 = vmatpush2.bf16.msra.mxu0 %v5332_v48  ;;  %v5669_v47 = vcombine.high %v1117_v42, %v1121_v44  ;;  %v981_v48 = vld [vmem:[#allocation8 + $0x858] sm:$0xff]  ;;  %v5668_v55 = vcombine.low %v1117_v42, %v1121_v44 }
 0x2bf   :  { %4392 = vmatpush2.bf16.msra.mxu1 %v5460_v49  ;;  %4402 = vmatprep.subr.bf16.mxu0 %v5581_v51  ;;  %v985_v49 = vld [vmem:[#allocation8 + $0x878] sm:$0xff] }
 0x2c0   :  { %4443 = vmatprep.subr.bf16.mxu1 %v5709_v52  ;;  %v1109_v51 = vld [vmem:[#allocation8 + $0xc58] sm:$0xff]  ;;  %v5532_v62 = vcombine.low %v981_v48, %v985_v49 }
 0x2c1   :  { %v4108_v33 = vpop.f32.mrf.mxu0  ;;  %4353 = vmatmul.mubr.bf16.vlgmr.msra.gmra.mxu0 %v6299_v43  ;;  %v1113_v52 = vld [vmem:[#allocation8 + $0xc78] sm:$0xff] }
 0x2c2   :  { %v4109_v3 = vadd.f32 %v4108_v33, %v6388_v20  ;;  %v4149_v4 = vpop.f32.mrf.mxu1  ;;  %4394 = vmatmul.mubr.bf16.vlgmr.msra.gmra.mxu1 %v6295_v0  ;;  %4403 = vmatpush1.bf16.msra.mxu0 %v5580_v56  ;;  %v5693_v20 = vcombine.high %v1141_v63, %v1145_v1  ;;  %v5533_v56 = vcombine.high %v981_v48, %v985_v49  ;;  %v1093_v1 = vld [vmem:[#allocation8 + $0xbd8] sm:$0xff] }
 0x2c3   :  { %4434 = vmatprep.mubr.bf16.mxu0 %v6325_v35  ;;  %4444 = vmatpush1.bf16.msra.mxu1 %v5708_v60  ;;  %v6397_v6 = vpop.f32.mrf.mxu0  ;;  %v5661_v57 = vcombine.high %v1109_v51, %v1113_v52  ;;  %v977_v60 = vld [vmem:[#allocation8 + $0x838] sm:$0xff]  ;;  %v5660_v33 = vcombine.low %v1109_v51, %v1113_v52 }
 0x2c4   :  { %v6399_v9 = vadd.f32 %v4149_v4, %v4109_v3  ;;  %4475 = vmatprep.mubr.bf16.mxu1 %v6327_v2  ;;  %v6402_v43 = vpop.f32.mrf.mxu1  ;;  %4404 = vmatprep.subr.bf16.mxu0 %v5573_v61  ;;  %v5685_v2 = vcombine.high %v1133_v10, %v1137_v11  ;;  %v1101_v61 = vld [vmem:[#allocation8 + $0xc18] sm:$0xff] }
 0x2c5   :  { %v4112_v0 = vpop.f32.mrf.mxu0  ;;  %4445 = vmatprep.subr.bf16.mxu1 %v5701_v40  ;;  %v5525_v40 = vcombine.high %v973_v59, %v977_v60  ;;  %v5653_v63 = vcombine.high %v1101_v61, %v1105_v39  ;;  %v1097_v3 = vld [vmem:[#allocation8 + $0xbf8] sm:$0xff] }
 0x2c6   :  { %v4153_v35 = vpop.f32.mrf.mxu1  ;;  %4405 = vmatpush1.bf16.msra.mxu0 %v5572_v5  ;;  %v1221_v4 = vld [vmem:[#allocation8 + $0xfd8] sm:$0xff] }
 0x2c7   :  { %4446 = vmatpush1.bf16.msra.mxu1 %v5700_v7  ;;  %v4113_v17 = vpop.f32.mrf.mxu0  ;;  %4406 = vmatprep.subr.bf16.mxu0 %v5565_v8  ;;  %v1225_v5 = vld [vmem:[#allocation8 + $0xff8] sm:$0xff]  ;;  %v5524_v7 = vcombine.low %v973_v59, %v977_v60  ;;  %v5652_v8 = vcombine.low %v1101_v61, %v1105_v39  ;;  %v5644_v35 = vcombine.low %v1093_v1, %v1097_v3 }
 0x2c8   :  { %v4154_v23 = vpop.f32.mrf.mxu1  ;;  %4447 = vmatprep.subr.bf16.mxu1 %v5693_v20  ;;  %v5645_v20 = vcombine.high %v1093_v1, %v1097_v3  ;;  %v5773_v14 = vcombine.high %v1221_v4, %v1225_v5  ;;  %v1085_v15 = vld [vmem:[#allocation8 + $0xb98] sm:$0xff] }
 0x2c9   :  { %v1089_v0 = vld [vmem:[#allocation8 + $0xbb8] sm:$0xff] }
 0x2ca   :  { %4407 = vmatpush1.bf16.msra.mxu0 %v5564_v19  ;;  %v1213_v10 = vld [vmem:[#allocation8 + $0xf98] sm:$0xff]  ;;  %v5772_v19 = vcombine.low %v1221_v4, %v1225_v5  ;;  %v5637_v17 = vcombine.high %v1085_v15, %v1089_v0  ;;  %v5636_v21 = vcombine.low %v1085_v15, %v1089_v0  ;;  %v4111_v0 = vadd.f32 %v6397_v6, %v6391_v53 }
 0x2cb   :  { %4448 = vmatpush1.bf16.msra.mxu1 %v5692_v18  ;;  %4408 = vmatprep.subr.bf16.mxu0 %v5557_v58  ;;  %v1217_v11 = vld [vmem:[#allocation8 + $0xfb8] sm:$0xff]  ;;  %v4485_v53 = vmax.f32 %v6377_v36, 0.0 }
 0x2cc   :  { %4449 = vmatprep.subr.bf16.mxu1 %v5685_v2  ;;  %v5765_v18 = vcombine.high %v1213_v10, %v1217_v11  ;;  %v1077_v58 = vld [vmem:[#allocation8 + $0xb58] sm:$0xff]  ;;  %v5764_v16 = vcombine.low %v1213_v10, %v1217_v11 }
 0x2cd   :  { %v1081_v23 = vld [vmem:[#allocation8 + $0xb78] sm:$0xff] }
 0x2ce   :  { %4409 = vmatpush1.bf16.msra.mxu0 %v5556_v26  ;;  %v1205_v2 = vld [vmem:[#allocation8 + $0xf58] sm:$0xff]  ;;  %v5629_v25 = vcombine.high %v1077_v58, %v1081_v23  ;;  %v5628_v38 = vcombine.low %v1077_v58, %v1081_v23  ;;  %v5940_v23 = vld [vmem:[#allocation11 + $0x78] sm:$0xff]  }
 0x2cf   :  { %4450 = vmatpush1.bf16.msra.mxu1 %v5684_v27  ;;  %4410 = vmatprep.subr.bf16.mxu0 %v5549_v30  ;;  %v1209_v24 = vld [vmem:[#allocation8 + $0xf78] sm:$0xff] }
 0x2d0   :  { %4451 = vmatprep.subr.bf16.mxu1 %v5677_v41  ;;  %v5757_v26 = vcombine.high %v1205_v2, %v1209_v24  ;;  %v1069_v27 = vld [vmem:[#allocation8 + $0xb18] sm:$0xff]  ;;  %v5756_v42 = vcombine.low %v1205_v2, %v1209_v24  ;;  %v5941_v2 = vld [vmem:[#allocation11 + $0xf8] sm:$0xff]  }
 0x2d1   :  { %v1073_v30 = vld [vmem:[#allocation8 + $0xb38] sm:$0xff]  ;;  %v5942_v24 = vld [vmem:[#allocation11 + $0x38] sm:$0xff]  }
 0x2d2   :  { %4411 = vmatpush1.bf16.msra.mxu0 %v5548_v45  ;;  %v1197_v41 = vld [vmem:[#allocation8 + $0xf18] sm:$0xff]  ;;  %v5621_v44 = vcombine.high %v1069_v27, %v1073_v30  ;;  %v5620_v49 = vcombine.low %v1069_v27, %v1073_v30 }
 0x2d3   :  { %4452 = vmatpush1.bf16.msra.mxu1 %v5676_v12  ;;  %4412 = vmatprep.subr.bf16.mxu0 %v5541_v46  ;;  %v1201_v50 = vld [vmem:[#allocation8 + $0xf38] sm:$0xff] }
 0x2d4   :  { %4453 = vmatprep.subr.bf16.mxu1 %v5669_v47  ;;  %v5749_v45 = vcombine.high %v1197_v41, %v1201_v50  ;;  %v1061_v12 = vld [vmem:[#allocation8 + $0xad8] sm:$0xff]  ;;  %v5748_v51 = vcombine.low %v1197_v41, %v1201_v50 }
 0x2d5   :  { %v1065_v46 = vld [vmem:[#allocation8 + $0xaf8] sm:$0xff] }
 0x2d6   :  { %4413 = vmatpush1.bf16.msra.mxu0 %v5540_v54  ;;  %v1189_v47 = vld [vmem:[#allocation8 + $0xed8] sm:$0xff]  ;;  %v5613_v52 = vcombine.high %v1061_v12, %v1065_v46  ;;  %v5612_v60 = vcombine.low %v1061_v12, %v1065_v46  ;;  %v5950_v12 = vld [vmem:[#allocation11 + $0x28] sm:$0xff]  }
 0x2d7   :  { %4454 = vmatpush1.bf16.msra.mxu1 %v5668_v55  ;;  %4414 = vmatprep.subr.bf16.mxu0 %v5533_v56  ;;  %v1193_v48 = vld [vmem:[#allocation8 + $0xef8] sm:$0xff]  ;;  %v5951_v46 = vld [vmem:[#allocation11 + $0xa8] sm:$0xff]  }
 0x2d8   :  { %4455 = vmatprep.subr.bf16.mxu1 %v5661_v57  ;;  %v5741_v54 = vcombine.high %v1189_v47, %v1193_v48  ;;  %v1053_v55 = vld [vmem:[#allocation8 + $0xa98] sm:$0xff]  ;;  %v5740_v61 = vcombine.low %v1189_v47, %v1193_v48  ;;  %v5952_v47 = vld [vmem:[#allocation11 + $0x60] sm:$0xff]  }
 0x2d9   :  { %v1057_v56 = vld [vmem:[#allocation8 + $0xab8] sm:$0xff] }
 0x2da   :  { %4415 = vmatpush1.bf16.msra.mxu0 %v5532_v62  ;;  %v1181_v57 = vld [vmem:[#allocation8 + $0xe98] sm:$0xff]  ;;  %v5605_v39 = vcombine.high %v1053_v55, %v1057_v56  ;;  %v5604_v3 = vcombine.low %v1053_v55, %v1057_v56  ;;  %v5957_v55 = vld [vmem:[#allocation11 + $0xd8] sm:$0xff]  }
 0x2db   :  { %4456 = vmatpush1.bf16.msra.mxu1 %v5660_v33  ;;  %4416 = vmatprep.subr.bf16.mxu0 %v5525_v40  ;;  %v1185_v59 = vld [vmem:[#allocation8 + $0xeb8] sm:$0xff]  ;;  %v5958_v56 = vld [vmem:[#allocation11 + $0x18] sm:$0xff]  }
 0x2dc   :  { %4457 = vmatprep.subr.bf16.mxu1 %v5653_v63  ;;  %v5733_v62 = vcombine.high %v1181_v57, %v1185_v59  ;;  %v1045_v33 = vld [vmem:[#allocation8 + $0xa58] sm:$0xff]  ;;  %v5732_v4 = vcombine.low %v1181_v57, %v1185_v59  ;;  %v5959_v57 = vld [vmem:[#allocation11 + $0x98] sm:$0xff]  }
 0x2dd   :  { %v1049_v40 = vld [vmem:[#allocation8 + $0xa78] sm:$0xff] }
 0x2de   :  { %4417 = vmatpush1.bf16.msra.mxu0 %v5524_v7  ;;  %v1173_v63 = vld [vmem:[#allocation8 + $0xe58] sm:$0xff]  ;;  %v5597_v5 = vcombine.high %v1045_v33, %v1049_v40  ;;  %v5596_v10 = vcombine.low %v1045_v33, %v1049_v40  ;;  %v5965_v33 = vld [vmem:[#allocation11 + $0xc8] sm:$0xff]  }
 0x2df   :  { %4458 = vmatpush1.bf16.msra.mxu1 %v5652_v8  ;;  %4418 = vmatprep.subr.bf16.mxu0 %v5645_v20  ;;  %v1177_v1 = vld [vmem:[#allocation8 + $0xe78] sm:$0xff]  ;;  %v5966_v40 = vld [vmem:[#allocation11 + $0x8] sm:$0xff]  }
 0x2e0   :  { %4459 = vmatprep.subr.bf16.mxu1 %v5773_v14  ;;  %v5725_v7 = vcombine.high %v1173_v63, %v1177_v1  ;;  %v1037_v8 = vld [vmem:[#allocation8 + $0xa18] sm:$0xff]  ;;  %v5724_v11 = vcombine.low %v1173_v63, %v1177_v1  ;;  %v5967_v63 = vld [vmem:[#allocation11 + $0x88] sm:$0xff]   ;;  %v5968_v1 = vld [vmem:[#allocation11 + $0x40] sm:$0xff]  }
 0x2e1   :  { %v1041_v20 = vld [vmem:[#allocation8 + $0xa38] sm:$0xff] }
 0x2e2   :  { %4419 = vmatpush2.bf16.msra.mxu0 %v5644_v35  ;;  %v1165_v14 = vld [vmem:[#allocation8 + $0xe18] sm:$0xff]  ;;  %v5589_v35 = vcombine.high %v1037_v8, %v1041_v20 }
 0x2e3   :  { %4460 = vmatpush2.bf16.msra.mxu1 %v5772_v19  ;;  %4420 = vmatprep.subr.bf16.mxu0 %v5637_v17  ;;  %v1169_v15 = vld [vmem:[#allocation8 + $0xe38] sm:$0xff]  ;;  %v4152_v17 = vadd.f32 %v6402_v43, %v4111_v0 }
 0x2e4   :  { %4461 = vmatprep.subr.bf16.mxu1 %v5765_v18  ;;  %v5717_v19 = vcombine.high %v1165_v14, %v1169_v15  ;;  %v5588_v18 = vcombine.low %v1037_v8, %v1041_v20  ;;  %v5716_v58 = vcombine.low %v1165_v14, %v1169_v15  ;;  %v5946_v36 = vld [vmem:[#allocation11 + $0x30] sm:$0xff]   ;;  %v5972_v8 = vld [vmem:[#allocation11 + $0x178] sm:$0xff]   ;;  %v4486_v20 = vmax.f32 %v6399_v9, 0.0 }
 0x2e5   :  { %v4487_v6 = vmax.f32 %v4152_v17, 0.0  ;;  %v5947_v50 = vld [vmem:[#allocation11 + $0xb0] sm:$0xff]   ;;  %v5988_v14 = vld [vmem:[#allocation11 + $0x1f8] sm:$0xff]   ;;  %v5976_v17 = vld [vmem:[#allocation11 + $0x168] sm:$0xff]  }
 0x2e6   :  { %4421 = vmatpush2.bf16.msra.mxu0 %v5636_v21  ;;  %v5943_v21 = vld [vmem:[#allocation11 + $0xb8] sm:$0xff]   ;;  %v5960_v59 = vld [vmem:[#allocation11 + $0x50] sm:$0xff]  }
 0x2e7   :  { %4462 = vmatpush2.bf16.msra.mxu1 %v5764_v16  ;;  %4422 = vmatprep.subr.bf16.mxu0 %v5629_v25  ;;  %v5944_v16 = vld [vmem:[#allocation11 + $0x70] sm:$0xff]   ;;  %v4493_v25 = vpack.c.bf16 %v4485_v53, %v4485_v53  ;;  %v4495_v27 = vpack.c.bf16 %v4487_v6, %v4487_v6  ;;  %v5973_v15 = vld [vmem:[#allocation11 + $0x138] sm:$0xff]   ;;  %v5994_v53 = vld [vmem:[#allocation11 + $0x1e0] sm:$0xff]  }
 0x2e8   :  { %4463 = vmatprep.subr.bf16.mxu1 %v5757_v26  ;;  %v5945_v26 = vld [vmem:[#allocation11 + $0xf0] sm:$0xff]   ;;  %v5979_v6 = vld [vmem:[#allocation11 + $0x120] sm:$0xff]  }
 0x2e9   :  { %v5991_v9 = vld [vmem:[#allocation11 + $0x1b0] sm:$0xff]  }
 0x2ea   :  { %4423 = vmatpush2.bf16.msra.mxu0 %v5628_v38  ;;  %v5948_v38 = vld [vmem:[#allocation11 + $0x68] sm:$0xff]  }
 0x2eb   :  { %4464 = vmatpush2.bf16.msra.mxu1 %v5756_v42  ;;  %4424 = vmatprep.subr.bf16.mxu0 %v5621_v44  ;;  %v5949_v44 = vld [vmem:[#allocation11 + $0xe8] sm:$0xff]  }
 0x2ec   :  { %4465 = vmatprep.subr.bf16.mxu1 %v5749_v45 }
 0x2ee   :  { %4425 = vmatpush2.bf16.msra.mxu0 %v5620_v49  ;;  %v5953_v49 = vld [vmem:[#allocation11 + $0xe0] sm:$0xff]  }
 0x2ef   :  { %4466 = vmatpush2.bf16.msra.mxu1 %v5748_v51  ;;  %4426 = vmatprep.subr.bf16.mxu0 %v5613_v52  ;;  %v5954_v51 = vld [vmem:[#allocation11 + $0x20] sm:$0xff]  }
 0x2f0   :  { %4467 = vmatprep.subr.bf16.mxu1 %v5741_v54  ;;  %v5955_v52 = vld [vmem:[#allocation11 + $0xa0] sm:$0xff]   ;;  %v5956_v54 = vld [vmem:[#allocation11 + $0x58] sm:$0xff]  }
 0x2f2   :  { %4427 = vmatpush2.bf16.msra.mxu0 %v5612_v60  ;;  %v5961_v60 = vld [vmem:[#allocation11 + $0xd0] sm:$0xff]  }
 0x2f3   :  { %4468 = vmatpush2.bf16.msra.mxu1 %v5740_v61  ;;  %4428 = vmatprep.subr.bf16.mxu0 %v5605_v39  ;;  %v5962_v61 = vld [vmem:[#allocation11 + $0x10] sm:$0xff]  }
 0x2f4   :  { %4469 = vmatprep.subr.bf16.mxu1 %v5733_v62  ;;  %v5963_v39 = vld [vmem:[#allocation11 + $0x90] sm:$0xff]   ;;  %v5964_v62 = vld [vmem:[#allocation11 + $0x48] sm:$0xff]  }
 0x2f6   :  { %4429 = vmatpush2.bf16.msra.mxu0 %v5604_v3  ;;  %v5969_v3 = vld [vmem:[#allocation11 + $0xc0] sm:$0xff]  }
 0x2f7   :  { %4470 = vmatpush2.bf16.msra.mxu1 %v5732_v4  ;;  %4430 = vmatprep.subr.bf16.mxu0 %v5597_v5  ;;  %v5970_v4 = vld [vmem:[#allocation11] sm:$0xff]   ;;  %v4484_v5 = vmax.f32 %v6373_v22, 0.0  ;;  %v5975_v22 = vld [vmem:[#allocation11 + $0x130] sm:$0xff]  }
 0x2f8   :  { %4471 = vmatprep.subr.bf16.mxu1 %v5725_v7  ;;  %v5971_v7 = vld [vmem:[#allocation11 + $0x80] sm:$0xff]  }
 0x2f9   :  { %v4492_v0 = vpack.c.bf16 %v4484_v5, %v4484_v5 }
 0x2fa   :  { %4431 = vmatpush2.bf16.msra.mxu0 %v5596_v10  ;;  %v5974_v10 = vld [vmem:[#allocation11 + $0x170] sm:$0xff]  }
 0x2fb   :  { %4472 = vmatpush2.bf16.msra.mxu1 %v5724_v11  ;;  %4432 = vmatprep.subr.bf16.mxu0 %v5589_v35  ;;  %v5989_v11 = vld [vmem:[#allocation11 + $0x1b8] sm:$0xff]   ;;  %v4494_v35 = vpack.c.bf16 %v4486_v20, %v4486_v20 }
 0x2fc   :  { %4473 = vmatprep.subr.bf16.mxu1 %v5717_v19  ;;  %v5990_v19 = vld [vmem:[#allocation11 + $0x1f0] sm:$0xff]  }
 0x2fe   :  { %4433 = vmatpush2.bf16.msra.mxu0 %v5588_v18  ;;  %v5992_v18 = vld [vmem:[#allocation11 + $0x1e8] sm:$0xff]  }
 0x2ff   :  { %4474 = vmatpush2.bf16.msra.mxu1 %v5716_v58  ;;  %5839 = vmatprep.subr.bf16.mxu0 %v5940_v23  ;;  %v5977_v58 = vld [vmem:[#allocation11 + $0x128] sm:$0xff]   ;;  %v5978_v23 = vld [vmem:[#allocation11 + $0x160] sm:$0xff]  }
 0x300   :  { %5861 = vmatprep.subr.bf16.mxu1 %v5941_v2  ;;  %v5993_v2 = vld [vmem:[#allocation11 + $0x1a8] sm:$0xff]  }
 0x301   :  { %v6408_v43 = vpop.f32.mrf.mxu0  ;;  %4435 = vmatmul.mubr.bf16.vlgmr.msra.gmra.mxu0 %v6343_v37 }
 0x302   :  { %v6411_v30 = vpop.f32.mrf.mxu1  ;;  %4476 = vmatmul.mubr.bf16.vlgmr.msra.gmra.mxu1 %v6341_v28  ;;  %5840 = vmatpush3.bf16.msra.mxu0 %v5942_v24  ;;  %v5980_v24 = vld [vmem:[#allocation11 + $0x158] sm:$0xff]  }
 0x303   :  { %5051 = vmatprep.mubr.bf16.mxu0 %v4493_v25  ;;  %5862 = vmatpush3.bf16.msra.mxu1 %v5943_v21  ;;  %v6414_v41 = vpop.f32.mrf.mxu0  ;;  %v5995_v21 = vld [vmem:[#allocation11 + $0x1a0] sm:$0xff]   ;;  %v5981_v25 = vld [vmem:[#allocation11 + $0x118] sm:$0xff]  }
 0x304   :  { %5091 = vmatprep.mubr.bf16.mxu1 %v4495_v27  ;;  %v6416_v42 = vpop.f32.mrf.mxu1  ;;  %5841 = vmatprep.subr.bf16.mxu0 %v5944_v16  ;;  %v5996_v16 = vld [vmem:[#allocation11 + $0x1d8] sm:$0xff]  }
 0x305   :  { %v4194_v37 = vpop.f32.mrf.mxu0  ;;  %5863 = vmatprep.subr.bf16.mxu1 %v5945_v26  ;;  %v5982_v26 = vld [vmem:[#allocation11 + $0x150] sm:$0xff]   ;;  %v5997_v27 = vld [vmem:[#allocation11 + $0x198] sm:$0xff]  }
 0x306   :  { %v4235_v45 = vpop.f32.mrf.mxu1  ;;  %5842 = vmatpush3.bf16.msra.mxu0 %v5946_v36  ;;  %v5983_v36 = vld [vmem:[#allocation11 + $0x110] sm:$0xff]   ;;  %v6004_v37 = vld [vmem:[#allocation10] sm:$0xff] }
 0x307   :  { %5864 = vmatpush3.bf16.msra.mxu1 %v5947_v50  ;;  %v4195_v28 = vpop.f32.mrf.mxu0  ;;  %5843 = vmatprep.subr.bf16.mxu0 %v5948_v38  ;;  %v5984_v50 = vld [vmem:[#allocation11 + $0x148] sm:$0xff]   ;;  %v1247_v45 = vrot.slane %v6004_v37, %v200_v32  ;;  %v5999_v32 = vld [vmem:[#allocation11 + $0x190] sm:$0xff]  }
 0x308   :  { %v4236_v48 = vpop.f32.mrf.mxu1  ;;  %5865 = vmatprep.subr.bf16.mxu1 %v5949_v44  ;;  %v5985_v38 = vld [vmem:[#allocation11 + $0x108] sm:$0xff]   ;;  %v5986_v44 = vld [vmem:[#allocation11 + $0x140] sm:$0xff]  }
 0x309   :  { %v5987_v28 = vld [vmem:[#allocation11 + $0x100] sm:$0xff]  }
 0x30a   :  { %5844 = vmatpush3.bf16.msra.mxu0 %v5950_v12  ;;  %v1251_v12 = vrot.slane %v6004_v37, %v204_v29 }
 0x30b   :  { %5866 = vmatpush3.bf16.msra.mxu1 %v5951_v46  ;;  %5845 = vmatprep.subr.bf16.mxu0 %v5952_v47  ;;  %v4191_v46 = vadd.f32 %v6408_v43, %v1247_v45  ;;  %v6000_v43 = vld [vmem:[#allocation11 + $0x1c8] sm:$0xff]  }
 0x30c   :  { %5867 = vmatprep.subr.bf16.mxu1 %v5953_v49  ;;  %v4193_v47 = vadd.f32 %v6414_v41, %v1251_v12 }
 0x30d   :  { %v4232_v48 = vadd.f32 %v6411_v30, %v4191_v46 }
 0x30e   :  { %5846 = vmatpush3.bf16.msra.mxu0 %v5954_v51  ;;  %v5998_v51 = vld [vmem:[#allocation11 + $0x1d0] sm:$0xff]  }
 0x30f   :  { %5868 = vmatpush3.bf16.msra.mxu1 %v5955_v52  ;;  %5847 = vmatprep.subr.bf16.mxu0 %v5956_v54  ;;  %v4234_v52 = vadd.f32 %v6416_v42, %v4193_v47  ;;  %v6002_v42 = vld [vmem:[#allocation11 + $0x1c0] sm:$0xff]  }
 0x310   :  { %5869 = vmatprep.subr.bf16.mxu1 %v5957_v55 }
 0x312   :  { %5848 = vmatpush3.bf16.msra.mxu0 %v5958_v56 }
 0x313   :  { %5870 = vmatpush3.bf16.msra.mxu1 %v5959_v57  ;;  %5849 = vmatprep.subr.bf16.mxu0 %v5960_v59 }
 0x314   :  { %5871 = vmatprep.subr.bf16.mxu1 %v5961_v60 }
 0x316   :  { %5850 = vmatpush3.bf16.msra.mxu0 %v5962_v61 }
 0x317   :  { %5872 = vmatpush3.bf16.msra.mxu1 %v5963_v39  ;;  %5851 = vmatprep.subr.bf16.mxu0 %v5964_v62  ;;  %v6001_v39 = vld [vmem:[#allocation11 + $0x188] sm:$0xff]  }
 0x318   :  { %5873 = vmatprep.subr.bf16.mxu1 %v5965_v33 }
 0x31a   :  { %5852 = vmatpush3.bf16.msra.mxu0 %v5966_v40 }
 0x31b   :  { %5874 = vmatpush3.bf16.msra.mxu1 %v5967_v63  ;;  %5853 = vmatprep.subr.bf16.mxu0 %v5968_v1  ;;  %v6003_v1 = vld [vmem:[#allocation11 + $0x180] sm:$0xff]  }
 0x31c   :  { %5875 = vmatprep.subr.bf16.mxu1 %v5969_v3 }
 0x31e   :  { %5854 = vmatpush3.bf16.msra.mxu0 %v5970_v4 }
 0x31f   :  { %5876 = vmatpush3.bf16.msra.mxu1 %v5971_v7  ;;  %5883 = vmatprep.subr.bf16.mxu0 %v5972_v8 }
 0x320   :  { %5905 = vmatprep.subr.bf16.mxu1 %v5988_v14 }
 0x321   :  { %5052 = vmatmul.mubr.bf16.vlgmr.msra.gmra.mxu0 %v4492_v0 }
 0x322   :  { %5092 = vmatmul.mubr.bf16.vlgmr.msra.gmra.mxu1 %v4494_v35  ;;  %5884 = vmatpush3.bf16.msra.mxu0 %v5973_v15 }
 0x323   :  { %5885 = vmatprep.subr.bf16.mxu0 %v5974_v10  ;;  %5906 = vmatpush3.bf16.msra.mxu1 %v5989_v11  ;;  %v1255_v10 = vrot.slane %v6004_v37, %v208_v31  ;;  %v1259_v11 = vrot.slane %v6004_v37, %v212_v34 }
 0x324   :  { %5907 = vmatprep.subr.bf16.mxu1 %v5990_v19 }
 0x326   :  { %5886 = vmatpush3.bf16.msra.mxu0 %v5975_v22 }
 0x327   :  { %5887 = vmatprep.subr.bf16.mxu0 %v5976_v17  ;;  %5908 = vmatpush3.bf16.msra.mxu1 %v5991_v9 }
 0x328   :  { %5909 = vmatprep.subr.bf16.mxu1 %v5992_v18 }
 0x32a   :  { %5888 = vmatpush3.bf16.msra.mxu0 %v5977_v58 }
 0x32b   :  { %5889 = vmatprep.subr.bf16.mxu0 %v5978_v23  ;;  %5910 = vmatpush3.bf16.msra.mxu1 %v5993_v2 }
 0x32c   :  { %5911 = vmatprep.subr.bf16.mxu1 %v5994_v53 }
 0x32e   :  { %5890 = vmatpush3.bf16.msra.mxu0 %v5979_v6 }
 0x32f   :  { %5891 = vmatprep.subr.bf16.mxu0 %v5980_v24  ;;  %5912 = vmatpush3.bf16.msra.mxu1 %v5995_v21 }
 0x330   :  { %5913 = vmatprep.subr.bf16.mxu1 %v5996_v16 }
 0x332   :  { %5892 = vmatpush3.bf16.msra.mxu0 %v5981_v25 }
 0x333   :  { %5893 = vmatprep.subr.bf16.mxu0 %v5982_v26  ;;  %5914 = vmatpush3.bf16.msra.mxu1 %v5997_v27 }
 0x334   :  { %5915 = vmatprep.subr.bf16.mxu1 %v5998_v51 }
 0x336   :  { %5894 = vmatpush3.bf16.msra.mxu0 %v5983_v36 }
 0x337   :  { %5895 = vmatprep.subr.bf16.mxu0 %v5984_v50  ;;  %5916 = vmatpush3.bf16.msra.mxu1 %v5999_v32 }
 0x338   :  { %5917 = vmatprep.subr.bf16.mxu1 %v6000_v43 }
 0x33a   :  { %5896 = vmatpush3.bf16.msra.mxu0 %v5985_v38  ;;  %v5774_v38 = vld [vmem:[#allocation13] ss:$0 sm:$0xff] }
 0x33b   :  { %5897 = vmatprep.subr.bf16.mxu0 %v5986_v44  ;;  %5918 = vmatpush3.bf16.msra.mxu1 %v6001_v39 }
 0x33c   :  { %5919 = vmatprep.subr.bf16.mxu1 %v6002_v42 }
 0x33e   :  { %5898 = vmatpush3.bf16.msra.mxu0 %v5987_v28 }
 0x33f   :  { %5920 = vmatpush3.bf16.msra.mxu1 %v6003_v1 }
 0x341   :  { %v4272_v49 = vpop.f32.mrf.mxu0 }
 0x342   :  { %v4273_v54 = vadd.f32 %v4272_v49, %v4232_v48  ;;  %v4313_v55 = vpop.f32.mrf.mxu1 }
 0x343   :  { %v4274_v56 = vpop.f32.mrf.mxu0 }
 0x344   :  { %v4314_v29 = vadd.f32 %v4313_v55, %v4273_v54  ;;  %v4275_v57 = vadd.f32 %v4274_v56, %v4234_v52  ;;  %v4315_v59 = vpop.f32.mrf.mxu1 }
 0x345   :  { %v4276_v60 = vpop.f32.mrf.mxu0 }
 0x346   :  { %v4316_v61 = vadd.f32 %v4315_v59, %v4275_v57  ;;  %v4317_v41 = vpop.f32.mrf.mxu1  ;;  %v4488_v62 = vmax.f32 %v4314_v29, 0.0 }
 0x347   :  { %v4277_v30 = vpop.f32.mrf.mxu0 }
 0x348   :  { %v4489_v33 = vmax.f32 %v4316_v61, 0.0  ;;  %v4318_v40 = vpop.f32.mrf.mxu1  ;;  %v4496_v3 = vpack.c.bf16 %v4488_v62, %v4488_v62 }
 0x34a   :  { %v4497_v63 = vpack.c.bf16 %v4489_v33, %v4489_v33 }
 0x34c   :  { %5131 = vmatprep.mubr.bf16.mxu0 %v4497_v63 }
 0x34d   :  { %5132 = vmatmul.mubr.bf16.vlgmr.msra.gmra.mxu0 %v4496_v3 }
 0x381   :  { %v4354_v4 = vpop.f32.mrf.mxu0 }
 0x382   :  { %v4395_v5 = vpop.f32.mrf.mxu1  ;;  %v4355_v35 = vadd.f32 %v4354_v4, %v1255_v10 }
 0x383   :  { %v4356_v7 = vpop.f32.mrf.mxu0 }
 0x384   :  { %v4397_v8 = vpop.f32.mrf.mxu1  ;;  %v4357_v19 = vadd.f32 %v4356_v7, %v1259_v11  ;;  %v4396_v22 = vadd.f32 %v4395_v5, %v4355_v35 }
 0x385   :  { %v4358_v20 = vpop.f32.mrf.mxu0 }
 0x386   :  { %v4399_v14 = vpop.f32.mrf.mxu1  ;;  %v4398_v9 = vadd.f32 %v4397_v8, %v4357_v19 }
 0x387   :  { %v4359_v15 = vpop.f32.mrf.mxu0 }
 0x388   :  { %v4400_v0 = vpop.f32.mrf.mxu1 }
 0x3c1   :  { %v4436_v17 = vpop.f32.mrf.mxu0 }
 0x3c2   :  { %v4437_v18 = vadd.f32 %v4436_v17, %v4396_v22  ;;  %v4477_v58 = vpop.f32.mrf.mxu1 }
 0x3c3   :  { %v4438_v23 = vpop.f32.mrf.mxu0 }
 0x3c4   :  { %v4478_v2 = vadd.f32 %v4477_v58, %v4437_v18  ;;  %v4439_v53 = vadd.f32 %v4438_v23, %v4398_v9  ;;  %v4479_v6 = vpop.f32.mrf.mxu1 }
 0x3c5   :  { %v4440_v24 = vpop.f32.mrf.mxu0 }
 0x3c6   :  { %v4480_v21 = vadd.f32 %v4479_v6, %v4439_v53  ;;  %v4481_v16 = vpop.f32.mrf.mxu1  ;;  %v4490_v25 = vmax.f32 %v4478_v2, 0.0 }
 0x3c7   :  { %v4441_v26 = vpop.f32.mrf.mxu0 }
 0x3c8   :  { %v4491_v31 = vmax.f32 %v4480_v21, 0.0  ;;  %v4482_v27 = vpop.f32.mrf.mxu1  ;;  %v4498_v34 = vpack.c.bf16 %v4490_v25, %v4490_v25 }
 0x3ca   :  { %v4499_v13 = vpack.c.bf16 %v4491_v31, %v4491_v31 }
 0x3cc   :  { %5171 = vmatprep.mubr.bf16.mxu1 %v4499_v13 }
 0x3cd   :  { %5172 = vmatmul.mubr.bf16.vlgmr.msra.gmra.mxu1 %v4498_v34 }
 0x3e1   :  { %v5855_v36 = vpop.f32.mrf.mxu0 }
 0x3e2   :  { %v5877_v50 = vpop.f32.mrf.mxu1 }
 0x3e3   :  { %v5856_v44 = vpop.f32.mrf.mxu0 }
 0x3e4   :  { %v5857_v37 = vadd.f32 %v5856_v44, %v5855_v36  ;;  %v5878_v45 = vpop.f32.mrf.mxu1 }
 0x3e5   :  { %v5879_v12 = vadd.f32 %v5878_v45, %v5877_v50  ;;  %v5858_v28 = vpop.f32.mrf.mxu0 }
 0x3e6   :  { %v5054_v46 = vadd.f32 %v5857_v37, %v5774_v38  ;;  %v5880_v47 = vpop.f32.mrf.mxu1 }
 0x3e7   :  { %v5859_v48 = vpop.f32.mrf.mxu0 }
 0x3e8   :  { %v5094_v49 = vadd.f32 %v5879_v12, %v5054_v46  ;;  %v5881_v51 = vpop.f32.mrf.mxu1 }
 0x40d   :  { %v5899_v52 = vpop.f32.mrf.mxu0 }
 0x40f   :  { %v5900_v54 = vpop.f32.mrf.mxu0 }
 0x410   :  { %v5901_v55 = vadd.f32 %v5900_v54, %v5899_v52 }
 0x411   :  { %v5902_v32 = vpop.f32.mrf.mxu0 }
 0x412   :  { %v5134_v56 = vadd.f32 %v5901_v55, %v5094_v49 }
 0x413   :  { %v5903_v29 = vpop.f32.mrf.mxu0 }
 0x48d   :  { %v5921_v57 = vpop.f32.mrf.mxu1 }
 0x48f   :  { %v5922_v59 = vpop.f32.mrf.mxu1 }
 0x490   :  { %v5923_v60 = vadd.f32 %v5922_v59, %v5921_v57 }
 0x491   :  { %v5924_v43 = vpop.f32.mrf.mxu1 }
 0x492   :  { %v5174_v61 = vadd.f32 %v5923_v60, %v5134_v56 }
 0x493   :  { %v5925_v41 = vpop.f32.mrf.mxu1 }
 0x494   :  { %5179 = vst [vmem:[#allocation14] sm:$0xff] %v5174_v61 }
 0x495   :  { %6156 = shalt.err (!%p6153_p11)
}
 0x496   :  { %5189 = dma.vmem_to_hbm [thread:$0]  %s5187_s6, 128, %s6442_s7, [#allocation4]  }
 0x497   :  { %6173 = dma.done.wait [#allocation4], 128  }
 0x498   :  { %6174 = vsyncadd [#allocation4], 4294967168 }
 0x499   :  { %5193 = vsyncpa [#allocation3], 1 }
 0x49a   :  { %5194 = vsyncpa [#allocation6], 1 }
 0x49b   :  { %5195 = vsyncpa [#allocation9], 1 }
 0x49c   :  { %5196 = vsyncpa [#allocation12], 1 }
 0x49d   :  { %5197 = vsyncpa [#allocation4], 1 }

</bundles_post_ra>
